<compile_context>
chip_gen: v6e
topology: v6e:2x2x1
jax: 0.10.0
libtpu: 0.0.40
codegen_flags: <defaults>
</compile_context>

<pallas_src>
import functools

import jax
import jax.numpy as jnp
from jax import lax
from jax.experimental import pallas as pl
from jax.experimental.pallas import tpu as pltpu

_BN_EPS = 1e-5


# ---------------------------------------------------------------------------
# helpers
# ---------------------------------------------------------------------------

def _lane_tile(n, max_tile=8192):
    """Largest lane tile (multiple of 128, <= max_tile) dividing n."""
    assert n % 128 == 0
    t = 128
    while t * 2 <= max_tile and n % (t * 2) == 0:
        t *= 2
    return t


def _pad_lanes(a, hwp):
    hw = a.shape[-1]
    if hw == hwp:
        return a
    pad = [(0, 0)] * (a.ndim - 1) + [(0, hwp - hw)]
    return jnp.pad(a, pad)


# ---------------------------------------------------------------------------
# Kernel 1: guided_map = 1x1conv(scale-folded) -> +shift -> LeakyReLU -> 1x1conv
# ---------------------------------------------------------------------------

def _guided_map_kernel(x_ref, w1_ref, t1_ref, w2_ref, b2_ref, o_ref):
    x = x_ref[0]                                                   # (Cin, thw)
    h = jnp.dot(w1_ref[...], x, preferred_element_type=jnp.float32) + t1_ref[...]
    h = jnp.maximum(h, 0.2 * h)                                    # LeakyReLU(0.2)
    g = jnp.dot(w2_ref[...], h, preferred_element_type=jnp.float32) + b2_ref[...]
    o_ref[0] = g.astype(o_ref.dtype)


def guided_map(x2, w1_eff, shift1, w2, b2):
    """x2: (B, Cin, HWp) -> guide (B, 3, HWp)."""
    B, Cin, HWp = x2.shape
    thw = _lane_tile(HWp)
    return pl.pallas_call(
        _guided_map_kernel,
        out_shape=jax.ShapeDtypeStruct((B, 3, HWp), jnp.float32),
        grid_spec=pltpu.PrefetchScalarGridSpec(
            num_scalar_prefetch=0,
            grid=(B, HWp // thw),
            in_specs=[
                pl.BlockSpec((1, Cin, thw), lambda b, i: (b, 0, i)),
                pl.BlockSpec((32, Cin), lambda b, i: (0, 0)),
                pl.BlockSpec((32, 1), lambda b, i: (0, 0)),
                pl.BlockSpec((3, 32), lambda b, i: (0, 0)),
                pl.BlockSpec((3, 1), lambda b, i: (0, 0)),
            ],
            out_specs=pl.BlockSpec((1, 3, thw), lambda b, i: (b, 0, i)),
        ),
        compiler_params=pltpu.CompilerParams(
            dimension_semantics=("parallel", "parallel")),
    )(x2, w1_eff, shift1, w2, b2)


# ---------------------------------------------------------------------------
# Kernels 2a/2b: separable 3x3 dilated all-ones box filter (zero padded).
# guide^2 and guide*mask are formed in VMEM, never round-tripping HBM.
# TODO(synk): spatially tile H/W with a halo for very large images (blocks here
# are whole padded planes, <=4 per step).
# ---------------------------------------------------------------------------

def _boxsum(xp, r, H, W):
    """xp: (..., H+2r, W+2r) -> separable 3-tap / 3-tap sum (..., H, W)."""
    v = xp[..., 0:H, :] + xp[..., r:H + r, :] + xp[..., 2 * r:H + 2 * r, :]
    return v[..., 0:W] + v[..., r:W + r] + v[..., 2 * r:W + 2 * r]


def _make_box_guide_kernel(H, W, r):
    def kern(gp_ref, ninv_ref, mx_ref, vx_ref):
        g = gp_ref[0]                                              # (3, Hp, Wp)
        ninv = ninv_ref[...]                                       # (1, H, W)
        mx = _boxsum(g, r, H, W) * ninv
        vx = _boxsum(g * g, r, H, W) * ninv - mx * mx
        mx_ref[0] = mx
        vx_ref[0] = vx
    return kern


def box_guide(guide_pad, ninv, H, W, r):
    """guide_pad (B,3,Hp,Wp) -> mean_x, var_x (B,3,H,W)."""
    B = guide_pad.shape[0]
    Hp, Wp = H + 2 * r, W + 2 * r
    return pl.pallas_call(
        _make_box_guide_kernel(H, W, r),
        out_shape=(jax.ShapeDtypeStruct((B, 3, H, W), jnp.float32),
                   jax.ShapeDtypeStruct((B, 3, H, W), jnp.float32)),
        grid_spec=pltpu.PrefetchScalarGridSpec(
            num_scalar_prefetch=0,
            grid=(B,),
            in_specs=[
                pl.BlockSpec((1, 3, Hp, Wp), lambda b: (b, 0, 0, 0)),
                pl.BlockSpec((1, H, W), lambda b: (0, 0, 0)),
            ],
            out_specs=(pl.BlockSpec((1, 3, H, W), lambda b: (b, 0, 0, 0)),
                       pl.BlockSpec((1, 3, H, W), lambda b: (b, 0, 0, 0))),
        ),
        compiler_params=pltpu.CompilerParams(dimension_semantics=("parallel",)),
    )(guide_pad, ninv)


def _make_box_mask_kernel(H, W, r):
    def kern(gp_ref, mp_ref, ninv_ref, my_ref, egm_ref):
        g = gp_ref[0]                                              # (3, Hp, Wp)
        m = mp_ref[0]                                              # (1, Hp, Wp)
        ninv = ninv_ref[...]                                       # (1, H, W)
        my_ref[0] = _boxsum(m, r, H, W) * ninv                     # (1, H, W)
        egm_ref[0, 0] = _boxsum(g * m, r, H, W) * ninv             # (3, H, W)
    return kern


def box_mask(guide_pad, mask_pad, ninv, H, W, r):
    """-> mean_y (B,O,H,W), ex_gm = box(guide*mask)/N (B,O,3,H,W)."""
    B, O = mask_pad.shape[0], mask_pad.shape[1]
    Hp, Wp = H + 2 * r, W + 2 * r
    return pl.pallas_call(
        _make_box_mask_kernel(H, W, r),
        out_shape=(jax.ShapeDtypeStruct((B, O, H, W), jnp.float32),
                   jax.ShapeDtypeStruct((B, O, 3, H, W), jnp.float32)),
        grid_spec=pltpu.PrefetchScalarGridSpec(
            num_scalar_prefetch=0,
            grid=(B, O),          # o innermost -> guide block resident per b
            in_specs=[
                pl.BlockSpec((1, 3, Hp, Wp), lambda b, o: (b, 0, 0, 0)),
                pl.BlockSpec((1, 1, Hp, Wp), lambda b, o: (b, o, 0, 0)),
                pl.BlockSpec((1, H, W), lambda b, o: (0, 0, 0)),
            ],
            out_specs=(pl.BlockSpec((1, 1, H, W), lambda b, o: (b, o, 0, 0)),
                       pl.BlockSpec((1, 1, 3, H, W),
                                    lambda b, o: (b, o, 0, 0, 0))),
        ),
        compiler_params=pltpu.CompilerParams(
            dimension_semantics=("parallel", "parallel")),
    )(guide_pad, mask_pad, ninv)


# ---------------------------------------------------------------------------
# Kernel 3: per-object T moments (T rebuilt in VMEM; accumulated over B*HW).
# Outputs the 2x2 block structure of E[T T^T] to avoid in-kernel concatenation.
# ---------------------------------------------------------------------------

_DOTT = (((1,), (1,)), ((), ()))


def _tmom_kernel(egm_ref, my_ref, mx_ref, vx_ref,
                 sc_ref, sv_ref, cc_ref, cv_ref, vv_ref):
    first = (pl.program_id(1) == 0) & (pl.program_id(2) == 0)

    @pl.when(first)
    def _():
        sc_ref[...] = jnp.zeros_like(sc_ref)
        sv_ref[...] = jnp.zeros_like(sv_ref)
        cc_ref[...] = jnp.zeros_like(cc_ref)
        cv_ref[...] = jnp.zeros_like(cv_ref)
        vv_ref[...] = jnp.zeros_like(vv_ref)

    egm = egm_ref[0, 0]                                            # (3, thw)
    my = my_ref[0, 0]                                              # (1, thw)
    mx = mx_ref[0]                                                 # (3, thw)
    vx = vx_ref[0]                                                 # (3, thw)
    cov = egm - mx * my                                            # (3, thw)
    sc_ref[0] += jnp.sum(cov, axis=1, keepdims=True)
    sv_ref[0] += jnp.sum(vx, axis=1, keepdims=True)
    cc_ref[0] += lax.dot_general(cov, cov, _DOTT,
                                 preferred_element_type=jnp.float32)
    cv_ref[0] += lax.dot_general(cov, vx, _DOTT,
                                 preferred_element_type=jnp.float32)
    vv_ref[0] += lax.dot_general(vx, vx, _DOTT,
                                 preferred_element_type=jnp.float32)


def t_moments(egm, my, mx, vx):
    B, O, _, HWp = egm.shape
    thw = _lane_tile(HWp)
    grid = (O, B, HWp // thw)     # o outermost: per-object accumulators resident
    s31 = jax.ShapeDtypeStruct((O, 3, 1), jnp.float32)
    s33 = jax.ShapeDtypeStruct((O, 3, 3), jnp.float32)
    acc1 = pl.BlockSpec((1, 3, 1), lambda o, b, i: (o, 0, 0))
    acc3 = pl.BlockSpec((1, 3, 3), lambda o, b, i: (o, 0, 0))
    return pl.pallas_call(
        _tmom_kernel,
        out_shape=(s31, s31, s33, s33, s33),
        grid_spec=pltpu.PrefetchScalarGridSpec(
            num_scalar_prefetch=0,
            grid=grid,
            in_specs=[
                pl.BlockSpec((1, 1, 3, thw), lambda o, b, i: (b, o, 0, i)),
                pl.BlockSpec((1, 1, 1, thw), lambda o, b, i: (b, o, 0, i)),
                pl.BlockSpec((1, 3, thw), lambda o, b, i: (b, 0, i)),
                pl.BlockSpec((1, 3, thw), lambda o, b, i: (b, 0, i)),
            ],
            out_specs=(acc1, acc1, acc3, acc3, acc3),
        ),
        compiler_params=pltpu.CompilerParams(
            dimension_semantics=("parallel", "arbitrary", "arbitrary")),
    )(egm, my, mx, vx)


# ---------------------------------------------------------------------------
# Kernel 4: conv_a hidden-activation moments:  R = relu(W1_eff @ T + shift1)
#           accumulate sum(R) and R @ R^T per object (for the second BN).
# ---------------------------------------------------------------------------

def _make_rmom_kernel(thw, hw_valid, need_mask):
    def kern(egm_ref, my_ref, mx_ref, vx_ref, w1c_ref, w1v_ref, t1_ref,
             sr_ref, ssq_ref):
        first = (pl.program_id(1) == 0) & (pl.program_id(2) == 0)

        @pl.when(first)
        def _():
            sr_ref[...] = jnp.zeros_like(sr_ref)
            ssq_ref[...] = jnp.zeros_like(ssq_ref)

        egm = egm_ref[0, 0]
        my = my_ref[0, 0]
        mx = mx_ref[0]
        vx = vx_ref[0]
        cov = egm - mx * my                                        # (3, thw)
        h = (jnp.dot(w1c_ref[0], cov, preferred_element_type=jnp.float32)
             + jnp.dot(w1v_ref[0], vx, preferred_element_type=jnp.float32)
             + t1_ref[0])
        r = jnp.maximum(h, 0.0)                                    # (32, thw)
        if need_mask:                                              # pad pixels
            lane = lax.broadcasted_iota(jnp.int32, (1, thw), 1)
            r = jnp.where(pl.program_id(2) * thw + lane < hw_valid, r, 0.0)
        sr_ref[0] += jnp.sum(r, axis=1, keepdims=True)
        ssq_ref[0] += lax.dot_general(r, r, _DOTT,
                                      preferred_element_type=jnp.float32)
    return kern


def r_moments(egm, my, mx, vx, w1c, w1v, t1, hw_valid):
    B, O, _, HWp = egm.shape
    thw = _lane_tile(HWp)
    grid = (O, B, HWp // thw)
    return pl.pallas_call(
        _make_rmom_kernel(thw, hw_valid, HWp != hw_valid),
        out_shape=(jax.ShapeDtypeStruct((O, 32, 1), jnp.float32),
                   jax.ShapeDtypeStruct((O, 32, 32), jnp.float32)),
        grid_spec=pltpu.PrefetchScalarGridSpec(
            num_scalar_prefetch=0,
            grid=grid,
            in_specs=[
                pl.BlockSpec((1, 1, 3, thw), lambda o, b, i: (b, o, 0, i)),
                pl.BlockSpec((1, 1, 1, thw), lambda o, b, i: (b, o, 0, i)),
                pl.BlockSpec((1, 3, thw), lambda o, b, i: (b, 0, i)),
                pl.BlockSpec((1, 3, thw), lambda o, b, i: (b, 0, i)),
                pl.BlockSpec((1, 32, 3), lambda o, b, i: (o, 0, 0)),
                pl.BlockSpec((1, 32, 3), lambda o, b, i: (o, 0, 0)),
                pl.BlockSpec((1, 32, 1), lambda o, b, i: (o, 0, 0)),
            ],
            out_specs=(pl.BlockSpec((1, 32, 1), lambda o, b, i: (o, 0, 0)),
                       pl.BlockSpec((1, 32, 32), lambda o, b, i: (o, 0, 0))),
        ),
        compiler_params=pltpu.CompilerParams(
            dimension_semantics=("parallel", "arbitrary", "arbitrary")),
    )(egm, my, mx, vx, w1c, w1v, t1)


# ---------------------------------------------------------------------------
# Kernel 5: full conv_a (scale-folded BNs) + guided-filter epilogue
#           out = clamp(mean_y + mean_c(A*(guide-mean_x)), 0, 1) * bmask
# ---------------------------------------------------------------------------

def _conva_filter_kernel(egm_ref, my_ref, mx_ref, vx_ref, g_ref, bm_ref,
                         w1c_ref, w1v_ref, t1_ref, w2_ref, t2_ref, w3_ref,
                         o_ref):
    egm = egm_ref[0, 0]                                            # (3, thw)
    my = my_ref[0, 0]                                              # (1, thw)
    mx = mx_ref[0]                                                 # (3, thw)
    vx = vx_ref[0]                                                 # (3, thw)
    g = g_ref[0]                                                   # (3, thw)
    cov = egm - mx * my
    h1 = jnp.maximum(
        jnp.dot(w1c_ref[0], cov, preferred_element_type=jnp.float32)
        + jnp.dot(w1v_ref[0], vx, preferred_element_type=jnp.float32)
        + t1_ref[0], 0.0)                                          # (32, thw)
    h2 = jnp.maximum(
        jnp.dot(w2_ref[0], h1, preferred_element_type=jnp.float32)
        + t2_ref[0], 0.0)                                          # (32, thw)
    A = jnp.dot(w3_ref[...], h2, preferred_element_type=jnp.float32)  # (3,thw)
    q = my + jnp.sum(A * (g - mx), axis=0, keepdims=True) * (1.0 / 3.0)
    q = jnp.clip(q, 0.0, 1.0)
    o_ref[0, 0] = (q * bm_ref[0, 0]).astype(o_ref.dtype)


def conva_guided_filter(egm, my, mx, vx, guide, bmask,
                        w1c, w1v, t1, w2e, t2, w3):
    """Returns refined masks (B, O, 1, HWp)."""
    B, O, _, HWp = egm.shape
    thw = _lane_tile(HWp)
    grid = (B, HWp // thw, O)     # o innermost: guide/mean_x/var_x stay resident
    return pl.pallas_call(
        _conva_filter_kernel,
        out_shape=jax.ShapeDtypeStruct((B, O, 1, HWp), jnp.float32),
        grid_spec=pltpu.PrefetchScalarGridSpec(
            num_scalar_prefetch=0,
            grid=grid,
            in_specs=[
                pl.BlockSpec((1, 1, 3, thw), lambda b, i, o: (b, o, 0, i)),
                pl.BlockSpec((1, 1, 1, thw), lambda b, i, o: (b, o, 0, i)),
                pl.BlockSpec((1, 3, thw), lambda b, i, o: (b, 0, i)),
                pl.BlockSpec((1, 3, thw), lambda b, i, o: (b, 0, i)),
                pl.BlockSpec((1, 3, thw), lambda b, i, o: (b, 0, i)),
                pl.BlockSpec((1, 1, 1, thw), lambda b, i, o: (b, o, 0, i)),
                pl.BlockSpec((1, 32, 3), lambda b, i, o: (o, 0, 0)),
                pl.BlockSpec((1, 32, 3), lambda b, i, o: (o, 0, 0)),
                pl.BlockSpec((1, 32, 1), lambda b, i, o: (o, 0, 0)),
                pl.BlockSpec((1, 32, 32), lambda b, i, o: (o, 0, 0)),
                pl.BlockSpec((1, 32, 1), lambda b, i, o: (o, 0, 0)),
                pl.BlockSpec((3, 32), lambda b, i, o: (0, 0)),
            ],
            out_specs=pl.BlockSpec((1, 1, 1, thw), lambda b, i, o: (b, o, 0, i)),
        ),
        compiler_params=pltpu.CompilerParams(
            dimension_semantics=("parallel", "parallel", "parallel")),
    )(egm, my, mx, vx, guide, bmask, w1c, w1v, t1, w2e, t2, w3)


# ---------------------------------------------------------------------------
# Kernel 6: instance-mask reduction over objects + panoptic blend
# ---------------------------------------------------------------------------

def _panoptic_kernel(bb_ref, yi_ref, seg_ref, pan_ref):
    bb = bb_ref[0]                                                 # (O, thw)
    yi = yi_ref[0]                                                 # (O, 1)
    weighted = yi * bb
    inst = jnp.sum(weighted, axis=0, keepdims=True) > 0.5          # (1, thw)
    pan_ref[0] = jnp.where(inst, weighted, seg_ref[0]).astype(pan_ref.dtype)


def panoptic_combine(bbox_out, y_inst, seg_r):
    """bbox_out:(B,O,HWp) y_inst:(B,O,1) seg_r:(B,1,HWp) -> (B,O,HWp)."""
    B, O, HWp = bbox_out.shape
    thw = _lane_tile(HWp)
    return pl.pallas_call(
        _panoptic_kernel,
        out_shape=jax.ShapeDtypeStruct((B, O, HWp), jnp.float32),
        grid_spec=pltpu.PrefetchScalarGridSpec(
            num_scalar_prefetch=0,
            grid=(B, HWp // thw),
            in_specs=[
                pl.BlockSpec((1, O, thw), lambda b, i: (b, 0, i)),
                pl.BlockSpec((1, O, 1), lambda b, i: (b, 0, 0)),
                pl.BlockSpec((1, 1, thw), lambda b, i: (b, 0, i)),
            ],
            out_specs=pl.BlockSpec((1, O, thw), lambda b, i: (b, 0, i)),
        ),
        compiler_params=pltpu.CompilerParams(
            dimension_semantics=("parallel", "parallel")),
    )(bbox_out, y_inst, seg_r)


# ---------------------------------------------------------------------------
# Plain-JAX glue: resizes, gathers, analytic training-mode BatchNorm folding
# ---------------------------------------------------------------------------
# TODO(synk): bilinear/nearest resampling and the index gathers
# (batched_index_select, alpha gather) have no clean Pallas equivalent and are
# left as XLA glue.
# TODO(synk): optionally store the per-object box-output streams in bf16 on
# v6e/v7x (halves HBM traffic); kept f32 here to preserve the analytic BN math.

def _bilinear_resize(x, out_h, out_w):
    return jax.image.resize(x, x.shape[:-2] + (out_h, out_w), method="bilinear")


def _nearest_resize(x, out_h, out_w):
    in_h, in_w = x.shape[-2], x.shape[-1]
    hi = (jnp.arange(out_h) * in_h) // out_h   # PyTorch 'nearest': floor scale
    wi = (jnp.arange(out_w) * in_w) // out_w
    return x[..., hi[:, None], wi[None, :]]


def _bn_affine_global(w_lin, mean_in, m2_in, gamma, beta, eps=_BN_EPS):
    """Training-mode BN folded to scale/shift for h = w_lin @ t (no bias)."""
    mean_h = jnp.dot(w_lin, mean_in)
    ex2_h = jnp.sum(jnp.dot(w_lin, m2_in) * w_lin, axis=1)
    var_h = jnp.maximum(ex2_h - mean_h * mean_h, 0.0)
    inv = lax.rsqrt(var_h + eps)
    scale = gamma * inv
    shift = beta - mean_h * scale
    return (scale.reshape(-1, 1).astype(jnp.float32),
            shift.reshape(-1, 1).astype(jnp.float32))


def _bn_affine_per_object(w_lin, mean_in, m2_in, gamma, beta, eps=_BN_EPS):
    """mean_in:(O,Ci) m2_in:(O,Ci,Ci) -> per-object scale/shift (O,Cout,1)."""
    mean_h = jnp.einsum('ki,oi->ok', w_lin, mean_in)
    ex2_h = jnp.einsum('ki,oij,kj->ok', w_lin, m2_in, w_lin)
    var_h = jnp.maximum(ex2_h - mean_h * mean_h, 0.0)
    inv = lax.rsqrt(var_h + eps)
    scale = gamma[None, :] * inv
    shift = beta[None, :] - mean_h * scale
    return (scale[..., None].astype(jnp.float32),
            shift[..., None].astype(jnp.float32))


# ---------------------------------------------------------------------------
# ISA forward
# ---------------------------------------------------------------------------

@functools.partial(jax.jit, static_argnames=("radius",))
def isa_forward(x, stage_mask, bbox, bbox_mask, y, seg, y_instance_mask,
                params, radius=1):
    B, Cin, H, W = x.shape
    O = bbox.shape[1]
    HW = H * W
    HWp = ((HW + 127) // 128) * 128            # lane-dense padding
    r = radius

    # ---- resizes / gathers (plain-JAX glue) ----
    bbox_r = _bilinear_resize(bbox.astype(jnp.float32), H, W)       # (B,O,H,W)
    bmask_r = _nearest_resize(bbox_mask.astype(jnp.float32), H, W)  # (B,O,H,W)
    seg_r = _bilinear_resize(seg.astype(jnp.float32), H, W)         # (B,1,H,W)

    seman = jax.vmap(lambda sm, yy: sm[yy])(stage_mask, y)          # (B,O,H,W)
    seman = jax.nn.sigmoid(seman) * bmask_r

    alpha = jax.nn.sigmoid(params["alpha"])[0, :, 0]                # (ncls,)
    alpha_bo = alpha[y].reshape(B, O, 1, 1)
    # second bilinear resize of bbox in the reference is identity at (H, W)
    mask_mix = bbox_r * (1.0 - alpha_bo) + seman * alpha_bo         # (B,O,H,W)

    # ---- guided_map (BN scale folded into the 1x1 conv weight) ----
    x2 = x.reshape(B, Cin, HW).astype(jnp.float32)
    xt = jnp.transpose(x2, (1, 0, 2)).reshape(Cin, B * HW)
    mean_x0 = jnp.mean(xt, axis=1)
    m2_x0 = jnp.dot(xt, xt.T) / (B * HW)
    g_scale, g_shift = _bn_affine_global(
        params["g_w1"], mean_x0, m2_x0, params["g_gamma"], params["g_beta"])
    g_w1_eff = g_scale * params["g_w1"]
    guide = guided_map(_pad_lanes(x2, HWp), g_w1_eff, g_shift,
                       params["g_w2"], params["g_b2"].reshape(3, 1))  # (B,3,HWp)
    guide_im = guide[..., :HW].reshape(B, 3, H, W)

    # ---- analytic N (all-ones dilated 3x3 box sum with zero padding) ----
    def _cnt(n):
        idx = jnp.arange(n)
        return sum(((idx + d >= 0) & (idx + d < n)).astype(jnp.float32)
                   for d in (-r, 0, r))
    ninv = (1.0 / (_cnt(H)[:, None] * _cnt(W)[None, :] + 1e-8)).reshape(1, H, W)

    # ---- separable box filters (guide^2, guide*mask formed in VMEM) ----
    guide_pad = jnp.pad(guide_im, ((0, 0), (0, 0), (r, r), (r, r)))
    mask_pad = jnp.pad(mask_mix, ((0, 0), (0, 0), (r, r), (r, r)))
    mean_x_im, var_x_im = box_guide(guide_pad, ninv, H, W, r)        # (B,3,H,W)
    mean_y_im, ex_gm_im = box_mask(guide_pad, mask_pad, ninv, H, W, r)

    mx = _pad_lanes(mean_x_im.reshape(B, 3, HW), HWp)                # (B,3,HWp)
    vx = _pad_lanes(var_x_im.reshape(B, 3, HW), HWp)
    my = _pad_lanes(mean_y_im.reshape(B, O, 1, HW), HWp)             # (B,O,1,HWp)
    egm = _pad_lanes(ex_gm_im.reshape(B, O, 3, HW), HWp)             # (B,O,3,HWp)
    bmask2 = _pad_lanes(bmask_r.reshape(B, O, 1, HW), HWp)

    Mo = float(B * HW)

    # ---- conv_a BN1 (training-mode per-object batch stats from T moments) ----
    sc, sv, cc, cv, vv = t_moments(egm, my, mx, vx)
    mean_T = jnp.concatenate([sc, sv], axis=1)[..., 0] / Mo          # (O,6)
    top = jnp.concatenate([cc, cv], axis=2)
    bot = jnp.concatenate([jnp.swapaxes(cv, 1, 2), vv], axis=2)
    m2_T = jnp.concatenate([top, bot], axis=1) / Mo                  # (O,6,6)
    a1_scale, a1_shift = _bn_affine_per_object(
        params["a_w1"], mean_T, m2_T, params["a_gamma1"], params["a_beta1"])
    w1_eff = a1_scale * params["a_w1"][None]                         # (O,32,6)
    w1c, w1v = w1_eff[:, :, 0:3], w1_eff[:, :, 3:6]

    # ---- conv_a BN2 from hidden-activation moments (Pallas accumulator) ----
    sum_r, ssq_r = r_moments(egm, my, mx, vx, w1c, w1v, a1_shift, HW)
    mean_R = sum_r[:, :, 0] / Mo                                     # (O,32)
    m2_R = ssq_r / Mo                                                # (O,32,32)
    a2_scale, a2_shift = _bn_affine_per_object(
        params["a_w2"], mean_R, m2_R, params["a_gamma2"], params["a_beta2"])
    w2_eff = a2_scale * params["a_w2"][None]                         # (O,32,32)

    # ---- fused conv_a + guided-filter epilogue ----
    filt = conva_guided_filter(egm, my, mx, vx, guide, bmask2,
                               w1c, w1v, a1_shift, w2_eff, a2_shift,
                               params["a_w3"])                       # (B,O,1,HWp)
    filt = filt.reshape(B, O, HWp)

    # ---- instance mask + panoptic blend ----
    pan = panoptic_combine(filt,
                           y_instance_mask.reshape(B, O, 1).astype(jnp.float32),
                           _pad_lanes(seg_r.reshape(B, 1, HW), HWp))

    bbox_out = filt[..., :HW].reshape(B, O, H, W)
    panoptic = pan[..., :HW].reshape(B, O, H, W)
    return bbox_out, panoptic


# ---------------------------------------------------------------------------
# Deterministic parameter init (shapes from ISA.__init__)
# ---------------------------------------------------------------------------

def init_params(key, in_ch, num_classes):
    ks = jax.random.split(key, 12)

    def rnd(k, shape, scale=0.3):
        return (scale * jax.random.normal(k, shape)).astype(jnp.float32)

    return dict(
        # guided_map: Conv2d(in_ch,32,1,bias=False), BN(32), LReLU(0.2), Conv2d(32,3,1)
        g_w1=rnd(ks[0], (32, in_ch)),
        g_gamma=(1.0 + 0.1 * jax.random.normal(ks[1], (32,))).astype(jnp.float32),
        g_beta=rnd(ks[2], (32,), 0.1),
        g_w2=rnd(ks[3], (3, 32)),
        g_b2=rnd(ks[4], (3,), 0.1),
        # conv_a: Conv(6,32,bias=F), BN, ReLU, Conv(32,32,bias=F), BN, ReLU, Conv(32,3,bias=F)
        a_w1=rnd(ks[5], (32, 6)),
        a_gamma1=(1.0 + 0.1 * jax.random.normal(ks[6], (32,))).astype(jnp.float32),
        a_beta1=rnd(ks[7], (32,), 0.1),
        a_w2=rnd(ks[8], (32, 32)),
        a_gamma2=(1.0 + 0.1 * jax.random.normal(ks[9], (32,))).astype(jnp.float32),
        a_beta2=rnd(ks[10], (32,), 0.1),
        a_w3=rnd(ks[11], (3, 32)),
        # alpha parameter (zeros, as in the module)
        alpha=jnp.zeros((1, num_classes, 1), jnp.float32),
        # box_filter weight stays at its all-ones init (depthwise box sum).
    )


if __name__ == "__main__":
    B, in_ch, H, W = 2, 3, 16, 16
    O, num_classes = 8, 10

    key = jax.random.PRNGKey(0)
    k = jax.random.split(key, 8)
    x = jax.random.normal(k[0], (B, in_ch, H, W), jnp.float32)
    stage_mask = jax.random.normal(k[1], (B, num_classes, H, W), jnp.float32)
    bbox = jax.random.uniform(k[2], (B, O, H // 2, W // 2), jnp.float32)
    bbox_mask = (jax.random.uniform(k[3], (B, O, H // 2, W // 2)) > 0.3
                 ).astype(jnp.float32)
    y = jax.random.randint(k[4], (B, O), 0, num_classes, jnp.int32)
    seg = jax.random.uniform(k[5], (B, 1, H // 2, W // 2), jnp.float32)
    y_inst = (jax.random.uniform(k[6], (B, O)) > 0.3).astype(jnp.float32)
    params = init_params(k[7], in_ch, num_classes)

    bbox_out, panoptic = isa_forward(x, stage_mask, bbox, bbox_mask, y, seg,
                                     y_inst, params, radius=1)
    jax.block_until_ready((bbox_out, panoptic))
    assert bbox_out.shape == (B, O, H, W) and panoptic.shape == (B, O, H, W)
    assert bool(jnp.all(jnp.isfinite(bbox_out)))
    assert bool(jnp.all(jnp.isfinite(panoptic)))
    print("KERNEL_OK")
</pallas_src>

<mosaic_0001>
module attributes {stable_mosaic.version = 11 : i64} {
  func.func @_guided_map_kernel(%arg0: i32, %arg1: i32, %arg2: memref<1x3x256xf32, #tpu.memory_space<vmem>>, %arg3: memref<32x3xf32, #tpu.memory_space<vmem>>, %arg4: memref<32x1xf32, #tpu.memory_space<vmem>>, %arg5: memref<3x32xf32, #tpu.memory_space<vmem>>, %arg6: memref<3x1xf32, #tpu.memory_space<vmem>>, %arg7: memref<1x3x256xf32, #tpu.memory_space<vmem>>) attributes {dimension_semantics = [#tpu.dimension_semantics<parallel>, #tpu.dimension_semantics<parallel>], iteration_bounds = array<i64: 2, 1>, scalar_prefetch = 0 : i64, scratch_operands = 0 : i64, tpu.core_type = #tpu.core_type<tc>, window_params = [{transform_indices = @transform_0, window_bounds = array<i64: 1, 3, 256>}, {pipeline_mode = #tpu.pipeline_mode<synchronous>, transform_indices = @transform_1, window_bounds = array<i64: 32, 3>}, {pipeline_mode = #tpu.pipeline_mode<synchronous>, transform_indices = @transform_2, window_bounds = array<i64: 32, 1>}, {pipeline_mode = #tpu.pipeline_mode<synchronous>, transform_indices = @transform_3, window_bounds = array<i64: 3, 32>}, {pipeline_mode = #tpu.pipeline_mode<synchronous>, transform_indices = @transform_4, window_bounds = array<i64: 3, 1>}, {transform_indices = @transform_5, window_bounds = array<i64: 1, 3, 256>}]} {
    %c0 = arith.constant 0 : index
    %c0_0 = arith.constant 0 : index
    %c0_1 = arith.constant 0 : index
    %0 = vector.load %arg2[%c0, %c0_0, %c0_1] : memref<1x3x256xf32, #tpu.memory_space<vmem>>, vector<1x3x256xf32>
    %1 = vector.shape_cast %0 : vector<1x3x256xf32> to vector<3x256xf32>
    %c0_2 = arith.constant 0 : index
    %c0_3 = arith.constant 0 : index
    %2 = vector.load %arg3[%c0_2, %c0_3] : memref<32x3xf32, #tpu.memory_space<vmem>>, vector<32x3xf32>
    %cst = arith.constant dense<0.000000e+00> : vector<32x256xf32>
    %3 = tpu.matmul %2, %1, %cst {dimension_numbers = #tpu.dot_dimension_numbers<[1], [0], [0], [1], [0, 0, 1, 1], [], []>} : vector<32x3xf32>, vector<3x256xf32>, vector<32x256xf32> -> vector<32x256xf32>
    %c0_4 = arith.constant 0 : index
    %c0_5 = arith.constant 0 : index
    %4 = vector.load %arg4[%c0_4, %c0_5] : memref<32x1xf32, #tpu.memory_space<vmem>>, vector<32x1xf32>
    %5 = vector.broadcast %4 : vector<32x1xf32> to vector<32x256xf32>
    %6 = arith.addf %3, %5 : vector<32x256xf32>
    %cst_6 = arith.constant 2.000000e-01 : f32
    %7 = vector.broadcast %cst_6 : f32 to vector<32x256xf32>
    %8 = arith.mulf %7, %6 : vector<32x256xf32>
    %9 = arith.maximumf %6, %8 : vector<32x256xf32>
    %c0_7 = arith.constant 0 : index
    %c0_8 = arith.constant 0 : index
    %10 = vector.load %arg5[%c0_7, %c0_8] : memref<3x32xf32, #tpu.memory_space<vmem>>, vector<3x32xf32>
    %cst_9 = arith.constant dense<0.000000e+00> : vector<3x256xf32>
    %11 = tpu.matmul %10, %9, %cst_9 {dimension_numbers = #tpu.dot_dimension_numbers<[1], [0], [0], [1], [0, 0, 1, 1], [], []>} : vector<3x32xf32>, vector<32x256xf32>, vector<3x256xf32> -> vector<3x256xf32>
    %c0_10 = arith.constant 0 : index
    %c0_11 = arith.constant 0 : index
    %12 = vector.load %arg6[%c0_10, %c0_11] : memref<3x1xf32, #tpu.memory_space<vmem>>, vector<3x1xf32>
    %13 = vector.broadcast %12 : vector<3x1xf32> to vector<3x256xf32>
    %14 = arith.addf %11, %13 : vector<3x256xf32>
    %c0_12 = arith.constant 0 : index
    %c0_13 = arith.constant 0 : index
    %c0_14 = arith.constant 0 : index
    %15 = vector.load %arg7[%c0_12, %c0_13, %c0_14] : memref<1x3x256xf32, #tpu.memory_space<vmem>>, vector<1x3x256xf32>
    %16 = vector.shape_cast %15 : vector<1x3x256xf32> to vector<3x256xf32>
    %17 = vector.shape_cast %14 : vector<3x256xf32> to vector<1x3x256xf32>
    tpu.vector_store %arg7[%c0_12, %c0_13, %c0_14], %17 {strides = array<i32>} : memref<1x3x256xf32, #tpu.memory_space<vmem>>, vector<1x3x256xf32>,
    return
  }
  func.func @transform_0(%arg0: i32, %arg1: i32) -> (i32, i32, i32) {
    %c0_i32 = arith.constant 0 : i32
    %c0_i32_0 = arith.constant 0 : i32
    return %arg0, %c0_i32, %arg1 : i32, i32, i32
  }
  func.func @transform_1(%arg0: i32, %arg1: i32) -> (i32, i32) {
    %c0_i32 = arith.constant 0 : i32
    %c0_i32_0 = arith.constant 0 : i32
    %c0_i32_1 = arith.constant 0 : i32
    return %c0_i32, %c0_i32_0 : i32, i32
  }
  func.func @transform_2(%arg0: i32, %arg1: i32) -> (i32, i32) {
    %c0_i32 = arith.constant 0 : i32
    %c0_i32_0 = arith.constant 0 : i32
    %c0_i32_1 = arith.constant 0 : i32
    return %c0_i32, %c0_i32_0 : i32, i32
  }
  func.func @transform_3(%arg0: i32, %arg1: i32) -> (i32, i32) {
    %c0_i32 = arith.constant 0 : i32
    %c0_i32_0 = arith.constant 0 : i32
    %c0_i32_1 = arith.constant 0 : i32
    return %c0_i32, %c0_i32_0 : i32, i32
  }
  func.func @transform_4(%arg0: i32, %arg1: i32) -> (i32, i32) {
    %c0_i32 = arith.constant 0 : i32
    %c0_i32_0 = arith.constant 0 : i32
    %c0_i32_1 = arith.constant 0 : i32
    return %c0_i32, %c0_i32_0 : i32, i32
  }
  func.func @transform_5(%arg0: i32, %arg1: i32) -> (i32, i32, i32) {
    %c0_i32 = arith.constant 0 : i32
    %c0_i32_0 = arith.constant 0 : i32
    return %arg0, %c0_i32, %arg1 : i32, i32, i32
  }
}

module attributes {stable_mosaic.version = 11 : i64} {
  func.func @kern(%arg0: i32, %arg1: memref<1x3x18x18xf32, #tpu.memory_space<vmem>>, %arg2: memref<1x16x16xf32, #tpu.memory_space<vmem>>, %arg3: memref<1x3x16x16xf32, #tpu.memory_space<vmem>>, %arg4: memref<1x3x16x16xf32, #tpu.memory_space<vmem>>) attributes {dimension_semantics = [#tpu.dimension_semantics<parallel>], iteration_bounds = array<i64: 2>, scalar_prefetch = 0 : i64, scratch_operands = 0 : i64, tpu.core_type = #tpu.core_type<tc>, window_params = [{transform_indices = @transform_0, window_bounds = array<i64: 1, 3, 18, 18>}, {pipeline_mode = #tpu.pipeline_mode<synchronous>, transform_indices = @transform_1, window_bounds = array<i64: 1, 16, 16>}, {transform_indices = @transform_2, window_bounds = array<i64: 1, 3, 16, 16>}, {transform_indices = @transform_3, window_bounds = array<i64: 1, 3, 16, 16>}]} {
    %c0 = arith.constant 0 : index
    %c0_0 = arith.constant 0 : index
    %c0_1 = arith.constant 0 : index
    %c0_2 = arith.constant 0 : index
    %0 = vector.load %arg1[%c0, %c0_0, %c0_1, %c0_2] : memref<1x3x18x18xf32, #tpu.memory_space<vmem>>, vector<1x3x18x18xf32>
    %1 = vector.shape_cast %0 : vector<1x3x18x18xf32> to vector<3x18x18xf32>
    %c0_3 = arith.constant 0 : index
    %c0_4 = arith.constant 0 : index
    %c0_5 = arith.constant 0 : index
    %2 = vector.load %arg2[%c0_3, %c0_4, %c0_5] : memref<1x16x16xf32, #tpu.memory_space<vmem>>, vector<1x16x16xf32>
    %3 = vector.extract_strided_slice %1 {offsets = [0, 0, 0], sizes = [3, 16, 18], strides = [1, 1, 1]} : vector<3x18x18xf32> to vector<3x16x18xf32>
    %4 = vector.extract_strided_slice %1 {offsets = [0, 1, 0], sizes = [3, 16, 18], strides = [1, 1, 1]} : vector<3x18x18xf32> to vector<3x16x18xf32>
    %5 = arith.addf %3, %4 : vector<3x16x18xf32>
    %6 = vector.extract_strided_slice %1 {offsets = [0, 2, 0], sizes = [3, 16, 18], strides = [1, 1, 1]} : vector<3x18x18xf32> to vector<3x16x18xf32>
    %7 = arith.addf %5, %6 : vector<3x16x18xf32>
    %8 = vector.extract_strided_slice %7 {offsets = [0, 0, 0], sizes = [3, 16, 16], strides = [1, 1, 1]} : vector<3x16x18xf32> to vector<3x16x16xf32>
    %9 = vector.extract_strided_slice %7 {offsets = [0, 0, 1], sizes = [3, 16, 16], strides = [1, 1, 1]} : vector<3x16x18xf32> to vector<3x16x16xf32>
    %10 = arith.addf %8, %9 : vector<3x16x16xf32>
    %11 = vector.extract_strided_slice %7 {offsets = [0, 0, 2], sizes = [3, 16, 16], strides = [1, 1, 1]} : vector<3x16x18xf32> to vector<3x16x16xf32>
    %12 = arith.addf %10, %11 : vector<3x16x16xf32>
    %13 = vector.broadcast %2 : vector<1x16x16xf32> to vector<3x16x16xf32>
    %14 = arith.mulf %12, %13 : vector<3x16x16xf32>
    %15 = arith.mulf %1, %1 : vector<3x18x18xf32>
    %16 = vector.extract_strided_slice %15 {offsets = [0, 0, 0], sizes = [3, 16, 18], strides = [1, 1, 1]} : vector<3x18x18xf32> to vector<3x16x18xf32>
    %17 = vector.extract_strided_slice %15 {offsets = [0, 1, 0], sizes = [3, 16, 18], strides = [1, 1, 1]} : vector<3x18x18xf32> to vector<3x16x18xf32>
    %18 = arith.addf %16, %17 : vector<3x16x18xf32>
    %19 = vector.extract_strided_slice %15 {offsets = [0, 2, 0], sizes = [3, 16, 18], strides = [1, 1, 1]} : vector<3x18x18xf32> to vector<3x16x18xf32>
    %20 = arith.addf %18, %19 : vector<3x16x18xf32>
    %21 = vector.extract_strided_slice %20 {offsets = [0, 0, 0], sizes = [3, 16, 16], strides = [1, 1, 1]} : vector<3x16x18xf32> to vector<3x16x16xf32>
    %22 = vector.extract_strided_slice %20 {offsets = [0, 0, 1], sizes = [3, 16, 16], strides = [1, 1, 1]} : vector<3x16x18xf32> to vector<3x16x16xf32>
    %23 = arith.addf %21, %22 : vector<3x16x16xf32>
    %24 = vector.extract_strided_slice %20 {offsets = [0, 0, 2], sizes = [3, 16, 16], strides = [1, 1, 1]} : vector<3x16x18xf32> to vector<3x16x16xf32>
    %25 = arith.addf %23, %24 : vector<3x16x16xf32>
    %26 = vector.broadcast %2 : vector<1x16x16xf32> to vector<3x16x16xf32>
    %27 = arith.mulf %25, %26 : vector<3x16x16xf32>
    %28 = arith.mulf %14, %14 : vector<3x16x16xf32>
    %29 = arith.subf %27, %28 : vector<3x16x16xf32>
    %c0_6 = arith.constant 0 : index
    %c0_7 = arith.constant 0 : index
    %c0_8 = arith.constant 0 : index
    %c0_9 = arith.constant 0 : index
    %30 = vector.load %arg3[%c0_6, %c0_7, %c0_8, %c0_9] : memref<1x3x16x16xf32, #tpu.memory_space<vmem>>, vector<1x3x16x16xf32>
    %31 = vector.shape_cast %30 : vector<1x3x16x16xf32> to vector<3x16x16xf32>
    %32 = vector.shape_cast %14 : vector<3x16x16xf32> to vector<1x3x16x16xf32>
    tpu.vector_store %arg3[%c0_6, %c0_7, %c0_8, %c0_9], %32 {strides = array<i32>} : memref<1x3x16x16xf32, #tpu.memory_space<vmem>>, vector<1x3x16x16xf32>,
    %c0_10 = arith.constant 0 : index
    %c0_11 = arith.constant 0 : index
    %c0_12 = arith.constant 0 : index
    %c0_13 = arith.constant 0 : index
    %33 = vector.load %arg4[%c0_10, %c0_11, %c0_12, %c0_13] : memref<1x3x16x16xf32, #tpu.memory_space<vmem>>, vector<1x3x16x16xf32>
    %34 = vector.shape_cast %33 : vector<1x3x16x16xf32> to vector<3x16x16xf32>
    %35 = vector.shape_cast %29 : vector<3x16x16xf32> to vector<1x3x16x16xf32>
    tpu.vector_store %arg4[%c0_10, %c0_11, %c0_12, %c0_13], %35 {strides = array<i32>} : memref<1x3x16x16xf32, #tpu.memory_space<vmem>>, vector<1x3x16x16xf32>,
    return
  }
  func.func @transform_0(%arg0: i32) -> (i32, i32, i32, i32) {
    %c0_i32 = arith.constant 0 : i32
    %c0_i32_0 = arith.constant 0 : i32
    %c0_i32_1 = arith.constant 0 : i32
    %c0_i32_2 = arith.constant 0 : i32
    return %arg0, %c0_i32, %c0_i32_0, %c0_i32_1 : i32, i32, i32, i32
  }
  func.func @transform_1(%arg0: i32) -> (i32, i32, i32) {
    %c0_i32 = arith.constant 0 : i32
    %c0_i32_0 = arith.constant 0 : i32
    %c0_i32_1 = arith.constant 0 : i32
    %c0_i32_2 = arith.constant 0 : i32
    return %c0_i32, %c0_i32_0, %c0_i32_1 : i32, i32, i32
  }
  func.func @transform_2(%arg0: i32) -> (i32, i32, i32, i32) {
    %c0_i32 = arith.constant 0 : i32
    %c0_i32_0 = arith.constant 0 : i32
    %c0_i32_1 = arith.constant 0 : i32
    %c0_i32_2 = arith.constant 0 : i32
    return %arg0, %c0_i32, %c0_i32_0, %c0_i32_1 : i32, i32, i32, i32
  }
  func.func @transform_3(%arg0: i32) -> (i32, i32, i32, i32) {
    %c0_i32 = arith.constant 0 : i32
    %c0_i32_0 = arith.constant 0 : i32
    %c0_i32_1 = arith.constant 0 : i32
    %c0_i32_2 = arith.constant 0 : i32
    return %arg0, %c0_i32, %c0_i32_0, %c0_i32_1 : i32, i32, i32, i32
  }
}

module attributes {stable_mosaic.version = 11 : i64} {
  func.func @kern(%arg0: i32, %arg1: i32, %arg2: memref<1x3x18x18xf32, #tpu.memory_space<vmem>>, %arg3: memref<1x1x18x18xf32, #tpu.memory_space<vmem>>, %arg4: memref<1x16x16xf32, #tpu.memory_space<vmem>>, %arg5: memref<1x1x16x16xf32, #tpu.memory_space<vmem>>, %arg6: memref<1x1x3x16x16xf32, #tpu.memory_space<vmem>>) attributes {dimension_semantics = [#tpu.dimension_semantics<parallel>, #tpu.dimension_semantics<parallel>], iteration_bounds = array<i64: 2, 8>, scalar_prefetch = 0 : i64, scratch_operands = 0 : i64, tpu.core_type = #tpu.core_type<tc>, window_params = [{transform_indices = @transform_0, window_bounds = array<i64: 1, 3, 18, 18>}, {transform_indices = @transform_1, window_bounds = array<i64: 1, 1, 18, 18>}, {pipeline_mode = #tpu.pipeline_mode<synchronous>, transform_indices = @transform_2, window_bounds = array<i64: 1, 16, 16>}, {transform_indices = @transform_3, window_bounds = array<i64: 1, 1, 16, 16>}, {transform_indices = @transform_4, window_bounds = array<i64: 1, 1, 3, 16, 16>}]} {
    %c0 = arith.constant 0 : index
    %c0_0 = arith.constant 0 : index
    %c0_1 = arith.constant 0 : index
    %c0_2 = arith.constant 0 : index
    %0 = vector.load %arg2[%c0, %c0_0, %c0_1, %c0_2] : memref<1x3x18x18xf32, #tpu.memory_space<vmem>>, vector<1x3x18x18xf32>
    %1 = vector.shape_cast %0 : vector<1x3x18x18xf32> to vector<3x18x18xf32>
    %c0_3 = arith.constant 0 : index
    %c0_4 = arith.constant 0 : index
    %c0_5 = arith.constant 0 : index
    %c0_6 = arith.constant 0 : index
    %2 = vector.load %arg3[%c0_3, %c0_4, %c0_5, %c0_6] : memref<1x1x18x18xf32, #tpu.memory_space<vmem>>, vector<1x1x18x18xf32>
    %3 = vector.shape_cast %2 : vector<1x1x18x18xf32> to vector<1x18x18xf32>
    %c0_7 = arith.constant 0 : index
    %c0_8 = arith.constant 0 : index
    %c0_9 = arith.constant 0 : index
    %4 = vector.load %arg4[%c0_7, %c0_8, %c0_9] : memref<1x16x16xf32, #tpu.memory_space<vmem>>, vector<1x16x16xf32>
    %5 = vector.extract_strided_slice %3 {offsets = [0, 0, 0], sizes = [1, 16, 18], strides = [1, 1, 1]} : vector<1x18x18xf32> to vector<1x16x18xf32>
    %6 = vector.extract_strided_slice %3 {offsets = [0, 1, 0], sizes = [1, 16, 18], strides = [1, 1, 1]} : vector<1x18x18xf32> to vector<1x16x18xf32>
    %7 = arith.addf %5, %6 : vector<1x16x18xf32>
    %8 = vector.extract_strided_slice %3 {offsets = [0, 2, 0], sizes = [1, 16, 18], strides = [1, 1, 1]} : vector<1x18x18xf32> to vector<1x16x18xf32>
    %9 = arith.addf %7, %8 : vector<1x16x18xf32>
    %10 = vector.extract_strided_slice %9 {offsets = [0, 0, 0], sizes = [1, 16, 16], strides = [1, 1, 1]} : vector<1x16x18xf32> to vector<1x16x16xf32>
    %11 = vector.extract_strided_slice %9 {offsets = [0, 0, 1], sizes = [1, 16, 16], strides = [1, 1, 1]} : vector<1x16x18xf32> to vector<1x16x16xf32>
    %12 = arith.addf %10, %11 : vector<1x16x16xf32>
    %13 = vector.extract_strided_slice %9 {offsets = [0, 0, 2], sizes = [1, 16, 16], strides = [1, 1, 1]} : vector<1x16x18xf32> to vector<1x16x16xf32>
    %14 = arith.addf %12, %13 : vector<1x16x16xf32>
    %15 = arith.mulf %14, %4 : vector<1x16x16xf32>
    %c0_10 = arith.constant 0 : index
    %c0_11 = arith.constant 0 : index
    %c0_12 = arith.constant 0 : index
    %c0_13 = arith.constant 0 : index
    %16 = vector.load %arg5[%c0_10, %c0_11, %c0_12, %c0_13] : memref<1x1x16x16xf32, #tpu.memory_space<vmem>>, vector<1x1x16x16xf32>
    %17 = vector.shape_cast %16 : vector<1x1x16x16xf32> to vector<1x16x16xf32>
    %18 = vector.shape_cast %15 : vector<1x16x16xf32> to vector<1x1x16x16xf32>
    tpu.vector_store %arg5[%c0_10, %c0_11, %c0_12, %c0_13], %18 {strides = array<i32>} : memref<1x1x16x16xf32, #tpu.memory_space<vmem>>, vector<1x1x16x16xf32>,
    %19 = vector.broadcast %3 : vector<1x18x18xf32> to vector<3x18x18xf32>
    %20 = arith.mulf %1, %19 : vector<3x18x18xf32>
    %21 = vector.extract_strided_slice %20 {offsets = [0, 0, 0], sizes = [3, 16, 18], strides = [1, 1, 1]} : vector<3x18x18xf32> to vector<3x16x18xf32>
    %22 = vector.extract_strided_slice %20 {offsets = [0, 1, 0], sizes = [3, 16, 18], strides = [1, 1, 1]} : vector<3x18x18xf32> to vector<3x16x18xf32>
    %23 = arith.addf %21, %22 : vector<3x16x18xf32>
    %24 = vector.extract_strided_slice %20 {offsets = [0, 2, 0], sizes = [3, 16, 18], strides = [1, 1, 1]} : vector<3x18x18xf32> to vector<3x16x18xf32>
    %25 = arith.addf %23, %24 : vector<3x16x18xf32>
    %26 = vector.extract_strided_slice %25 {offsets = [0, 0, 0], sizes = [3, 16, 16], strides = [1, 1, 1]} : vector<3x16x18xf32> to vector<3x16x16xf32>
    %27 = vector.extract_strided_slice %25 {offsets = [0, 0, 1], sizes = [3, 16, 16], strides = [1, 1, 1]} : vector<3x16x18xf32> to vector<3x16x16xf32>
    %28 = arith.addf %26, %27 : vector<3x16x16xf32>
    %29 = vector.extract_strided_slice %25 {offsets = [0, 0, 2], sizes = [3, 16, 16], strides = [1, 1, 1]} : vector<3x16x18xf32> to vector<3x16x16xf32>
    %30 = arith.addf %28, %29 : vector<3x16x16xf32>
    %31 = vector.broadcast %4 : vector<1x16x16xf32> to vector<3x16x16xf32>
    %32 = arith.mulf %30, %31 : vector<3x16x16xf32>
    %c0_14 = arith.constant 0 : index
    %c0_15 = arith.constant 0 : index
    %c0_16 = arith.constant 0 : index
    %c0_17 = arith.constant 0 : index
    %c0_18 = arith.constant 0 : index
    %33 = vector.load %arg6[%c0_14, %c0_15, %c0_16, %c0_17, %c0_18] : memref<1x1x3x16x16xf32, #tpu.memory_space<vmem>>, vector<1x1x3x16x16xf32>
    %34 = vector.shape_cast %33 : vector<1x1x3x16x16xf32> to vector<3x16x16xf32>
    %35 = vector.shape_cast %32 : vector<3x16x16xf32> to vector<1x1x3x16x16xf32>
    tpu.vector_store %arg6[%c0_14, %c0_15, %c0_16, %c0_17, %c0_18], %35 {strides = array<i32>} : memref<1x1x3x16x16xf32, #tpu.memory_space<vmem>>, vector<1x1x3x16x16xf32>,
    return
  }
  func.func @transform_0(%arg0: i32, %arg1: i32) -> (i32, i32, i32, i32) {
    %c0_i32 = arith.constant 0 : i32
    %c0_i32_0 = arith.constant 0 : i32
    %c0_i32_1 = arith.constant 0 : i32
    %c0_i32_2 = arith.constant 0 : i32
    return %arg0, %c0_i32, %c0_i32_0, %c0_i32_1 : i32, i32, i32, i32
  }
  func.func @transform_1(%arg0: i32, %arg1: i32) -> (i32, i32, i32, i32) {
    %c0_i32 = arith.constant 0 : i32
    %c0_i32_0 = arith.constant 0 : i32
    %c0_i32_1 = arith.constant 0 : i32
    return %arg0, %arg1, %c0_i32, %c0_i32_0 : i32, i32, i32, i32
  }
  func.func @transform_2(%arg0: i32, %arg1: i32) -> (i32, i32, i32) {
    %c0_i32 = arith.constant 0 : i32
    %c0_i32_0 = arith.constant 0 : i32
    %c0_i32_1 = arith.constant 0 : i32
    %c0_i32_2 = arith.constant 0 : i32
    return %c0_i32, %c0_i32_0, %c0_i32_1 : i32, i32, i32
  }
  func.func @transform_3(%arg0: i32, %arg1: i32) -> (i32, i32, i32, i32) {
    %c0_i32 = arith.constant 0 : i32
    %c0_i32_0 = arith.constant 0 : i32
    %c0_i32_1 = arith.constant 0 : i32
    return %arg0, %arg1, %c0_i32, %c0_i32_0 : i32, i32, i32, i32
  }
  func.func @transform_4(%arg0: i32, %arg1: i32) -> (i32, i32, i32, i32, i32) {
    %c0_i32 = arith.constant 0 : i32
    %c0_i32_0 = arith.constant 0 : i32
    %c0_i32_1 = arith.constant 0 : i32
    %c0_i32_2 = arith.constant 0 : i32
    return %arg0, %arg1, %c0_i32, %c0_i32_0, %c0_i32_1 : i32, i32, i32, i32, i32
  }
}

module attributes {stable_mosaic.version = 11 : i64} {
  func.func @_tmom_kernel(%arg0: i32, %arg1: i32, %arg2: i32, %arg3: memref<1x1x3x256xf32, #tpu.memory_space<vmem>>, %arg4: memref<1x1x1x256xf32, #tpu.memory_space<vmem>>, %arg5: memref<1x3x256xf32, #tpu.memory_space<vmem>>, %arg6: memref<1x3x256xf32, #tpu.memory_space<vmem>>, %arg7: memref<1x3x1xf32, #tpu.memory_space<vmem>>, %arg8: memref<1x3x1xf32, #tpu.memory_space<vmem>>, %arg9: memref<1x3x3xf32, #tpu.memory_space<vmem>>, %arg10: memref<1x3x3xf32, #tpu.memory_space<vmem>>, %arg11: memref<1x3x3xf32, #tpu.memory_space<vmem>>) attributes {dimension_semantics = [#tpu.dimension_semantics<parallel>, #tpu.dimension_semantics<arbitrary>, #tpu.dimension_semantics<arbitrary>], iteration_bounds = array<i64: 8, 2, 1>, scalar_prefetch = 0 : i64, scratch_operands = 0 : i64, tpu.core_type = #tpu.core_type<tc>, window_params = [{transform_indices = @transform_0, window_bounds = array<i64: 1, 1, 3, 256>}, {transform_indices = @transform_1, window_bounds = array<i64: 1, 1, 1, 256>}, {transform_indices = @transform_2, window_bounds = array<i64: 1, 3, 256>}, {transform_indices = @transform_3, window_bounds = array<i64: 1, 3, 256>}, {transform_indices = @transform_4, window_bounds = array<i64: 1, 3, 1>}, {transform_indices = @transform_5, window_bounds = array<i64: 1, 3, 1>}, {transform_indices = @transform_6, window_bounds = array<i64: 1, 3, 3>}, {transform_indices = @transform_7, window_bounds = array<i64: 1, 3, 3>}, {transform_indices = @transform_8, window_bounds = array<i64: 1, 3, 3>}]} {
    %c0_i32 = arith.constant 0 : i32
    %0 = arith.cmpi eq, %arg1, %c0_i32 : i32
    %c0_i32_0 = arith.constant 0 : i32
    %1 = arith.cmpi eq, %arg2, %c0_i32_0 : i32
    %2 = arith.andi %0, %1 : i1
    %3 = arith.extui %2 : i1 to i32
    %c0_i32_1 = arith.constant 0 : i32
    %4 = arith.cmpi ne, %3, %c0_i32_1 : i32
    scf.if %4 {
      %cst_49 = arith.constant 0.000000e+00 : f32
      %53 = vector.broadcast %cst_49 : f32 to vector<1x3x1xf32>
      %c0_50 = arith.constant 0 : index
      %c0_51 = arith.constant 0 : index
      %c0_52 = arith.constant 0 : index
      %54 = vector.load %arg7[%c0_50, %c0_51, %c0_52] : memref<1x3x1xf32, #tpu.memory_space<vmem>>, vector<1x3x1xf32>
      tpu.vector_store %arg7[%c0_50, %c0_51, %c0_52], %53 {strides = array<i32>} : memref<1x3x1xf32, #tpu.memory_space<vmem>>, vector<1x3x1xf32>,
      %cst_53 = arith.constant 0.000000e+00 : f32
      %55 = vector.broadcast %cst_53 : f32 to vector<1x3x1xf32>
      %c0_54 = arith.constant 0 : index
      %c0_55 = arith.constant 0 : index
      %c0_56 = arith.constant 0 : index
      %56 = vector.load %arg8[%c0_54, %c0_55, %c0_56] : memref<1x3x1xf32, #tpu.memory_space<vmem>>, vector<1x3x1xf32>
      tpu.vector_store %arg8[%c0_54, %c0_55, %c0_56], %55 {strides = array<i32>} : memref<1x3x1xf32, #tpu.memory_space<vmem>>, vector<1x3x1xf32>,
      %cst_57 = arith.constant 0.000000e+00 : f32
      %57 = vector.broadcast %cst_57 : f32 to vector<1x3x3xf32>
      %c0_58 = arith.constant 0 : index
      %c0_59 = arith.constant 0 : index
      %c0_60 = arith.constant 0 : index
      %58 = vector.load %arg9[%c0_58, %c0_59, %c0_60] : memref<1x3x3xf32, #tpu.memory_space<vmem>>, vector<1x3x3xf32>
      tpu.vector_store %arg9[%c0_58, %c0_59, %c0_60], %57 {strides = array<i32>} : memref<1x3x3xf32, #tpu.memory_space<vmem>>, vector<1x3x3xf32>,
      %cst_61 = arith.constant 0.000000e+00 : f32
      %59 = vector.broadcast %cst_61 : f32 to vector<1x3x3xf32>
      %c0_62 = arith.constant 0 : index
      %c0_63 = arith.constant 0 : index
      %c0_64 = arith.constant 0 : index
      %60 = vector.load %arg10[%c0_62, %c0_63, %c0_64] : memref<1x3x3xf32, #tpu.memory_space<vmem>>, vector<1x3x3xf32>
      tpu.vector_store %arg10[%c0_62, %c0_63, %c0_64], %59 {strides = array<i32>} : memref<1x3x3xf32, #tpu.memory_space<vmem>>, vector<1x3x3xf32>,
      %cst_65 = arith.constant 0.000000e+00 : f32
      %61 = vector.broadcast %cst_65 : f32 to vector<1x3x3xf32>
      %c0_66 = arith.constant 0 : index
      %c0_67 = arith.constant 0 : index
      %c0_68 = arith.constant 0 : index
      %62 = vector.load %arg11[%c0_66, %c0_67, %c0_68] : memref<1x3x3xf32, #tpu.memory_space<vmem>>, vector<1x3x3xf32>
      tpu.vector_store %arg11[%c0_66, %c0_67, %c0_68], %61 {strides = array<i32>} : memref<1x3x3xf32, #tpu.memory_space<vmem>>, vector<1x3x3xf32>,
    } else {
    }
    %c0 = arith.constant 0 : index
    %c0_2 = arith.constant 0 : index
    %c0_3 = arith.constant 0 : index
    %c0_4 = arith.constant 0 : index
    %5 = vector.load %arg3[%c0, %c0_2, %c0_3, %c0_4] : memref<1x1x3x256xf32, #tpu.memory_space<vmem>>, vector<1x1x3x256xf32>
    %6 = vector.shape_cast %5 : vector<1x1x3x256xf32> to vector<3x256xf32>
    %c0_5 = arith.constant 0 : index
    %c0_6 = arith.constant 0 : index
    %c0_7 = arith.constant 0 : index
    %c0_8 = arith.constant 0 : index
    %7 = vector.load %arg4[%c0_5, %c0_6, %c0_7, %c0_8] : memref<1x1x1x256xf32, #tpu.memory_space<vmem>>, vector<1x1x1x256xf32>
    %8 = vector.shape_cast %7 : vector<1x1x1x256xf32> to vector<1x256xf32>
    %c0_9 = arith.constant 0 : index
    %c0_10 = arith.constant 0 : index
    %c0_11 = arith.constant 0 : index
    %9 = vector.load %arg5[%c0_9, %c0_10, %c0_11] : memref<1x3x256xf32, #tpu.memory_space<vmem>>, vector<1x3x256xf32>
    %10 = vector.shape_cast %9 : vector<1x3x256xf32> to vector<3x256xf32>
    %c0_12 = arith.constant 0 : index
    %c0_13 = arith.constant 0 : index
    %c0_14 = arith.constant 0 : index
    %11 = vector.load %arg6[%c0_12, %c0_13, %c0_14] : memref<1x3x256xf32, #tpu.memory_space<vmem>>, vector<1x3x256xf32>
    %12 = vector.shape_cast %11 : vector<1x3x256xf32> to vector<3x256xf32>
    %13 = vector.broadcast %8 : vector<1x256xf32> to vector<3x256xf32>
    %14 = arith.mulf %10, %13 : vector<3x256xf32>
    %15 = arith.subf %6, %14 : vector<3x256xf32>
    %c0_15 = arith.constant 0 : index
    %c0_16 = arith.constant 0 : index
    %c0_17 = arith.constant 0 : index
    %16 = vector.load %arg7[%c0_15, %c0_16, %c0_17] : memref<1x3x1xf32, #tpu.memory_space<vmem>>, vector<1x3x1xf32>
    %17 = vector.shape_cast %16 : vector<1x3x1xf32> to vector<3x1xf32>
    %cst = arith.constant dense<0.000000e+00> : vector<3xf32>
    %18 = vector.multi_reduction <add>, %15, %cst [1] : vector<3x256xf32> to vector<3xf32>
    %19 = vector.shape_cast %18 : vector<3xf32> to vector<3x1xf32>
    %20 = arith.addf %17, %19 : vector<3x1xf32>
    %c0_18 = arith.constant 0 : index
    %c0_19 = arith.constant 0 : index
    %c0_20 = arith.constant 0 : index
    %21 = vector.load %arg7[%c0_18, %c0_19, %c0_20] : memref<1x3x1xf32, #tpu.memory_space<vmem>>, vector<1x3x1xf32>
    %22 = vector.shape_cast %21 : vector<1x3x1xf32> to vector<3x1xf32>
    %23 = vector.shape_cast %20 : vector<3x1xf32> to vector<1x3x1xf32>
    tpu.vector_store %arg7[%c0_18, %c0_19, %c0_20], %23 {strides = array<i32>} : memref<1x3x1xf32, #tpu.memory_space<vmem>>, vector<1x3x1xf32>,
    %c0_21 = arith.constant 0 : index
    %c0_22 = arith.constant 0 : index
    %c0_23 = arith.constant 0 : index
    %24 = vector.load %arg8[%c0_21, %c0_22, %c0_23] : memref<1x3x1xf32, #tpu.memory_space<vmem>>, vector<1x3x1xf32>
    %25 = vector.shape_cast %24 : vector<1x3x1xf32> to vector<3x1xf32>
    %cst_24 = arith.constant dense<0.000000e+00> : vector<3xf32>
    %26 = vector.multi_reduction <add>, %12, %cst_24 [1] : vector<3x256xf32> to vector<3xf32>
    %27 = vector.shape_cast %26 : vector<3xf32> to vector<3x1xf32>
    %28 = arith.addf %25, %27 : vector<3x1xf32>
    %c0_25 = arith.constant 0 : index
    %c0_26 = arith.constant 0 : index
    %c0_27 = arith.constant 0 : index
    %29 = vector.load %arg8[%c0_25, %c0_26, %c0_27] : memref<1x3x1xf32, #tpu.memory_space<vmem>>, vector<1x3x1xf32>
    %30 = vector.shape_cast %29 : vector<1x3x1xf32> to vector<3x1xf32>
    %31 = vector.shape_cast %28 : vector<3x1xf32> to vector<1x3x1xf32>
    tpu.vector_store %arg8[%c0_25, %c0_26, %c0_27], %31 {strides = array<i32>} : memref<1x3x1xf32, #tpu.memory_space<vmem>>, vector<1x3x1xf32>,
    %c0_28 = arith.constant 0 : index
    %c0_29 = arith.constant 0 : index
    %c0_30 = arith.constant 0 : index
    %32 = vector.load %arg9[%c0_28, %c0_29, %c0_30] : memref<1x3x3xf32, #tpu.memory_space<vmem>>, vector<1x3x3xf32>
    %33 = vector.shape_cast %32 : vector<1x3x3xf32> to vector<3x3xf32>
    %cst_31 = arith.constant dense<0.000000e+00> : vector<3x3xf32>
    %34 = tpu.matmul %15, %15, %cst_31 {dimension_numbers = #tpu.dot_dimension_numbers<[1], [1], [0], [0], [0, 0, 1, 0], [], []>} : vector<3x256xf32>, vector<3x256xf32>, vector<3x3xf32> -> vector<3x3xf32>
    %35 = arith.addf %33, %34 : vector<3x3xf32>
    %c0_32 = arith.constant 0 : index
    %c0_33 = arith.constant 0 : index
    %c0_34 = arith.constant 0 : index
    %36 = vector.load %arg9[%c0_32, %c0_33, %c0_34] : memref<1x3x3xf32, #tpu.memory_space<vmem>>, vector<1x3x3xf32>
    %37 = vector.shape_cast %36 : vector<1x3x3xf32> to vector<3x3xf32>
    %38 = vector.shape_cast %35 : vector<3x3xf32> to vector<1x3x3xf32>
    tpu.vector_store %arg9[%c0_32, %c0_33, %c0_34], %38 {strides = array<i32>} : memref<1x3x3xf32, #tpu.memory_space<vmem>>, vector<1x3x3xf32>,
    %c0_35 = arith.constant 0 : index
    %c0_36 = arith.constant 0 : index
    %c0_37 = arith.constant 0 : index
    %39 = vector.load %arg10[%c0_35, %c0_36, %c0_37] : memref<1x3x3xf32, #tpu.memory_space<vmem>>, vector<1x3x3xf32>
    %40 = vector.shape_cast %39 : vector<1x3x3xf32> to vector<3x3xf32>
    %cst_38 = arith.constant dense<0.000000e+00> : vector<3x3xf32>
    %41 = tpu.matmul %15, %12, %cst_38 {dimension_numbers = #tpu.dot_dimension_numbers<[1], [1], [0], [0], [0, 0, 1, 0], [], []>} : vector<3x256xf32>, vector<3x256xf32>, vector<3x3xf32> -> vector<3x3xf32>
    %42 = arith.addf %40, %41 : vector<3x3xf32>
    %c0_39 = arith.constant 0 : index
    %c0_40 = arith.constant 0 : index
    %c0_41 = arith.constant 0 : index
    %43 = vector.load %arg10[%c0_39, %c0_40, %c0_41] : memref<1x3x3xf32, #tpu.memory_space<vmem>>, vector<1x3x3xf32>
    %44 = vector.shape_cast %43 : vector<1x3x3xf32> to vector<3x3xf32>
    %45 = vector.shape_cast %42 : vector<3x3xf32> to vector<1x3x3xf32>
    tpu.vector_store %arg10[%c0_39, %c0_40, %c0_41], %45 {strides = array<i32>} : memref<1x3x3xf32, #tpu.memory_space<vmem>>, vector<1x3x3xf32>,
    %c0_42 = arith.constant 0 : index
    %c0_43 = arith.constant 0 : index
    %c0_44 = arith.constant 0 : index
    %46 = vector.load %arg11[%c0_42, %c0_43, %c0_44] : memref<1x3x3xf32, #tpu.memory_space<vmem>>, vector<1x3x3xf32>
    %47 = vector.shape_cast %46 : vector<1x3x3xf32> to vector<3x3xf32>
    %cst_45 = arith.constant dense<0.000000e+00> : vector<3x3xf32>
    %48 = tpu.matmul %12, %12, %cst_45 {dimension_numbers = #tpu.dot_dimension_numbers<[1], [1], [0], [0], [0, 0, 1, 0], [], []>} : vector<3x256xf32>, vector<3x256xf32>, vector<3x3xf32> -> vector<3x3xf32>
    %49 = arith.addf %47, %48 : vector<3x3xf32>
    %c0_46 = arith.constant 0 : index
    %c0_47 = arith.constant 0 : index
    %c0_48 = arith.constant 0 : index
    %50 = vector.load %arg11[%c0_46, %c0_47, %c0_48] : memref<1x3x3xf32, #tpu.memory_space<vmem>>, vector<1x3x3xf32>
    %51 = vector.shape_cast %50 : vector<1x3x3xf32> to vector<3x3xf32>
    %52 = vector.shape_cast %49 : vector<3x3xf32> to vector<1x3x3xf32>
    tpu.vector_store %arg11[%c0_46, %c0_47, %c0_48], %52 {strides = array<i32>} : memref<1x3x3xf32, #tpu.memory_space<vmem>>, vector<1x3x3xf32>,
    return
  }
  func.func @transform_0(%arg0: i32, %arg1: i32, %arg2: i32) -> (i32, i32, i32, i32) {
    %c0_i32 = arith.constant 0 : i32
    %c0_i32_0 = arith.constant 0 : i32
    return %arg1, %arg0, %c0_i32, %arg2 : i32, i32, i32, i32
  }
  func.func @transform_1(%arg0: i32, %arg1: i32, %arg2: i32) -> (i32, i32, i32, i32) {
    %c0_i32 = arith.constant 0 : i32
    %c0_i32_0 = arith.constant 0 : i32
    return %arg1, %arg0, %c0_i32, %arg2 : i32, i32, i32, i32
  }
  func.func @transform_2(%arg0: i32, %arg1: i32, %arg2: i32) -> (i32, i32, i32) {
    %c0_i32 = arith.constant 0 : i32
    %c0_i32_0 = arith.constant 0 : i32
    return %arg1, %c0_i32, %arg2 : i32, i32, i32
  }
  func.func @transform_3(%arg0: i32, %arg1: i32, %arg2: i32) -> (i32, i32, i32) {
    %c0_i32 = arith.constant 0 : i32
    %c0_i32_0 = arith.constant 0 : i32
    return %arg1, %c0_i32, %arg2 : i32, i32, i32
  }
  func.func @transform_4(%arg0: i32, %arg1: i32, %arg2: i32) -> (i32, i32, i32) {
    %c0_i32 = arith.constant 0 : i32
    %c0_i32_0 = arith.constant 0 : i32
    %c0_i32_1 = arith.constant 0 : i32
    return %arg0, %c0_i32, %c0_i32_0 : i32, i32, i32
  }
  func.func @transform_5(%arg0: i32, %arg1: i32, %arg2: i32) -> (i32, i32, i32) {
    %c0_i32 = arith.constant 0 : i32
    %c0_i32_0 = arith.constant 0 : i32
    %c0_i32_1 = arith.constant 0 : i32
    return %arg0, %c0_i32, %c0_i32_0 : i32, i32, i32
  }
  func.func @transform_6(%arg0: i32, %arg1: i32, %arg2: i32) -> (i32, i32, i32) {
    %c0_i32 = arith.constant 0 : i32
    %c0_i32_0 = arith.constant 0 : i32
    %c0_i32_1 = arith.constant 0 : i32
    return %arg0, %c0_i32, %c0_i32_0 : i32, i32, i32
  }
  func.func @transform_7(%arg0: i32, %arg1: i32, %arg2: i32) -> (i32, i32, i32) {
    %c0_i32 = arith.constant 0 : i32
    %c0_i32_0 = arith.constant 0 : i32
    %c0_i32_1 = arith.constant 0 : i32
    return %arg0, %c0_i32, %c0_i32_0 : i32, i32, i32
  }
  func.func @transform_8(%arg0: i32, %arg1: i32, %arg2: i32) -> (i32, i32, i32) {
    %c0_i32 = arith.constant 0 : i32
    %c0_i32_0 = arith.constant 0 : i32
    %c0_i32_1 = arith.constant 0 : i32
    return %arg0, %c0_i32, %c0_i32_0 : i32, i32, i32
  }
}

module attributes {stable_mosaic.version = 11 : i64} {
  func.func @kern(%arg0: i32, %arg1: i32, %arg2: i32, %arg3: memref<1x1x3x256xf32, #tpu.memory_space<vmem>>, %arg4: memref<1x1x1x256xf32, #tpu.memory_space<vmem>>, %arg5: memref<1x3x256xf32, #tpu.memory_space<vmem>>, %arg6: memref<1x3x256xf32, #tpu.memory_space<vmem>>, %arg7: memref<1x32x3xf32, #tpu.memory_space<vmem>>, %arg8: memref<1x32x3xf32, #tpu.memory_space<vmem>>, %arg9: memref<1x32x1xf32, #tpu.memory_space<vmem>>, %arg10: memref<1x32x1xf32, #tpu.memory_space<vmem>>, %arg11: memref<1x32x32xf32, #tpu.memory_space<vmem>>) attributes {dimension_semantics = [#tpu.dimension_semantics<parallel>, #tpu.dimension_semantics<arbitrary>, #tpu.dimension_semantics<arbitrary>], iteration_bounds = array<i64: 8, 2, 1>, scalar_prefetch = 0 : i64, scratch_operands = 0 : i64, tpu.core_type = #tpu.core_type<tc>, window_params = [{transform_indices = @transform_0, window_bounds = array<i64: 1, 1, 3, 256>}, {transform_indices = @transform_1, window_bounds = array<i64: 1, 1, 1, 256>}, {transform_indices = @transform_2, window_bounds = array<i64: 1, 3, 256>}, {transform_indices = @transform_3, window_bounds = array<i64: 1, 3, 256>}, {transform_indices = @transform_4, window_bounds = array<i64: 1, 32, 3>}, {transform_indices = @transform_5, window_bounds = array<i64: 1, 32, 3>}, {transform_indices = @transform_6, window_bounds = array<i64: 1, 32, 1>}, {transform_indices = @transform_7, window_bounds = array<i64: 1, 32, 1>}, {transform_indices = @transform_8, window_bounds = array<i64: 1, 32, 32>}]} {
    %c0_i32 = arith.constant 0 : i32
    %0 = arith.cmpi eq, %arg1, %c0_i32 : i32
    %c0_i32_0 = arith.constant 0 : i32
    %1 = arith.cmpi eq, %arg2, %c0_i32_0 : i32
    %2 = arith.andi %0, %1 : i1
    %3 = arith.extui %2 : i1 to i32
    %c0_i32_1 = arith.constant 0 : i32
    %4 = arith.cmpi ne, %3, %c0_i32_1 : i32
    scf.if %4 {
      %cst_40 = arith.constant 0.000000e+00 : f32
      %44 = vector.broadcast %cst_40 : f32 to vector<1x32x1xf32>
      %c0_41 = arith.constant 0 : index
      %c0_42 = arith.constant 0 : index
      %c0_43 = arith.constant 0 : index
      %45 = vector.load %arg10[%c0_41, %c0_42, %c0_43] : memref<1x32x1xf32, #tpu.memory_space<vmem>>, vector<1x32x1xf32>
      tpu.vector_store %arg10[%c0_41, %c0_42, %c0_43], %44 {strides = array<i32>} : memref<1x32x1xf32, #tpu.memory_space<vmem>>, vector<1x32x1xf32>,
      %cst_44 = arith.constant 0.000000e+00 : f32
      %46 = vector.broadcast %cst_44 : f32 to vector<1x32x32xf32>
      %c0_45 = arith.constant 0 : index
      %c0_46 = arith.constant 0 : index
      %c0_47 = arith.constant 0 : index
      %47 = vector.load %arg11[%c0_45, %c0_46, %c0_47] : memref<1x32x32xf32, #tpu.memory_space<vmem>>, vector<1x32x32xf32>
      tpu.vector_store %arg11[%c0_45, %c0_46, %c0_47], %46 {strides = array<i32>} : memref<1x32x32xf32, #tpu.memory_space<vmem>>, vector<1x32x32xf32>,
    } else {
    }
    %c0 = arith.constant 0 : index
    %c0_2 = arith.constant 0 : index
    %c0_3 = arith.constant 0 : index
    %c0_4 = arith.constant 0 : index
    %5 = vector.load %arg3[%c0, %c0_2, %c0_3, %c0_4] : memref<1x1x3x256xf32, #tpu.memory_space<vmem>>, vector<1x1x3x256xf32>
    %6 = vector.shape_cast %5 : vector<1x1x3x256xf32> to vector<3x256xf32>
    %c0_5 = arith.constant 0 : index
    %c0_6 = arith.constant 0 : index
    %c0_7 = arith.constant 0 : index
    %c0_8 = arith.constant 0 : index
    %7 = vector.load %arg4[%c0_5, %c0_6, %c0_7, %c0_8] : memref<1x1x1x256xf32, #tpu.memory_space<vmem>>, vector<1x1x1x256xf32>
    %8 = vector.shape_cast %7 : vector<1x1x1x256xf32> to vector<1x256xf32>
    %c0_9 = arith.constant 0 : index
    %c0_10 = arith.constant 0 : index
    %c0_11 = arith.constant 0 : index
    %9 = vector.load %arg5[%c0_9, %c0_10, %c0_11] : memref<1x3x256xf32, #tpu.memory_space<vmem>>, vector<1x3x256xf32>
    %10 = vector.shape_cast %9 : vector<1x3x256xf32> to vector<3x256xf32>
    %c0_12 = arith.constant 0 : index
    %c0_13 = arith.constant 0 : index
    %c0_14 = arith.constant 0 : index
    %11 = vector.load %arg6[%c0_12, %c0_13, %c0_14] : memref<1x3x256xf32, #tpu.memory_space<vmem>>, vector<1x3x256xf32>
    %12 = vector.shape_cast %11 : vector<1x3x256xf32> to vector<3x256xf32>
    %13 = vector.broadcast %8 : vector<1x256xf32> to vector<3x256xf32>
    %14 = arith.mulf %10, %13 : vector<3x256xf32>
    %15 = arith.subf %6, %14 : vector<3x256xf32>
    %c0_15 = arith.constant 0 : index
    %c0_16 = arith.constant 0 : index
    %c0_17 = arith.constant 0 : index
    %16 = vector.load %arg7[%c0_15, %c0_16, %c0_17] : memref<1x32x3xf32, #tpu.memory_space<vmem>>, vector<1x32x3xf32>
    %17 = vector.shape_cast %16 : vector<1x32x3xf32> to vector<32x3xf32>
    %cst = arith.constant dense<0.000000e+00> : vector<32x256xf32>
    %18 = tpu.matmul %17, %15, %cst {dimension_numbers = #tpu.dot_dimension_numbers<[1], [0], [0], [1], [0, 0, 1, 1], [], []>} : vector<32x3xf32>, vector<3x256xf32>, vector<32x256xf32> -> vector<32x256xf32>
    %c0_18 = arith.constant 0 : index
    %c0_19 = arith.constant 0 : index
    %c0_20 = arith.constant 0 : index
    %19 = vector.load %arg8[%c0_18, %c0_19, %c0_20] : memref<1x32x3xf32, #tpu.memory_space<vmem>>, vector<1x32x3xf32>
    %20 = vector.shape_cast %19 : vector<1x32x3xf32> to vector<32x3xf32>
    %cst_21 = arith.constant dense<0.000000e+00> : vector<32x256xf32>
    %21 = tpu.matmul %20, %12, %cst_21 {dimension_numbers = #tpu.dot_dimension_numbers<[1], [0], [0], [1], [0, 0, 1, 1], [], []>} : vector<32x3xf32>, vector<3x256xf32>, vector<32x256xf32> -> vector<32x256xf32>
    %22 = arith.addf %18, %21 : vector<32x256xf32>
    %c0_22 = arith.constant 0 : index
    %c0_23 = arith.constant 0 : index
    %c0_24 = arith.constant 0 : index
    %23 = vector.load %arg9[%c0_22, %c0_23, %c0_24] : memref<1x32x1xf32, #tpu.memory_space<vmem>>, vector<1x32x1xf32>
    %24 = vector.shape_cast %23 : vector<1x32x1xf32> to vector<32x1xf32>
    %25 = vector.broadcast %24 : vector<32x1xf32> to vector<32x256xf32>
    %26 = arith.addf %22, %25 : vector<32x256xf32>
    %cst_25 = arith.constant 0.000000e+00 : f32
    %27 = vector.broadcast %cst_25 : f32 to vector<32x256xf32>
    %28 = arith.maximumf %26, %27 : vector<32x256xf32>
    %c0_26 = arith.constant 0 : index
    %c0_27 = arith.constant 0 : index
    %c0_28 = arith.constant 0 : index
    %29 = vector.load %arg10[%c0_26, %c0_27, %c0_28] : memref<1x32x1xf32, #tpu.memory_space<vmem>>, vector<1x32x1xf32>
    %30 = vector.shape_cast %29 : vector<1x32x1xf32> to vector<32x1xf32>
    %cst_29 = arith.constant dense<0.000000e+00> : vector<32xf32>
    %31 = vector.multi_reduction <add>, %28, %cst_29 [1] : vector<32x256xf32> to vector<32xf32>
    %32 = vector.shape_cast %31 : vector<32xf32> to vector<32x1xf32>
    %33 = arith.addf %30, %32 : vector<32x1xf32>
    %c0_30 = arith.constant 0 : index
    %c0_31 = arith.constant 0 : index
    %c0_32 = arith.constant 0 : index
    %34 = vector.load %arg10[%c0_30, %c0_31, %c0_32] : memref<1x32x1xf32, #tpu.memory_space<vmem>>, vector<1x32x1xf32>
    %35 = vector.shape_cast %34 : vector<1x32x1xf32> to vector<32x1xf32>
    %36 = vector.shape_cast %33 : vector<32x1xf32> to vector<1x32x1xf32>
    tpu.vector_store %arg10[%c0_30, %c0_31, %c0_32], %36 {strides = array<i32>} : memref<1x32x1xf32, #tpu.memory_space<vmem>>, vector<1x32x1xf32>,
    %c0_33 = arith.constant 0 : index
    %c0_34 = arith.constant 0 : index
    %c0_35 = arith.constant 0 : index
    %37 = vector.load %arg11[%c0_33, %c0_34, %c0_35] : memref<1x32x32xf32, #tpu.memory_space<vmem>>, vector<1x32x32xf32>
    %38 = vector.shape_cast %37 : vector<1x32x32xf32> to vector<32x32xf32>
    %cst_36 = arith.constant dense<0.000000e+00> : vector<32x32xf32>
    %39 = tpu.matmul %28, %28, %cst_36 {dimension_numbers = #tpu.dot_dimension_numbers<[1], [1], [0], [0], [0, 0, 1, 0], [], []>} : vector<32x256xf32>, vector<32x256xf32>, vector<32x32xf32> -> vector<32x32xf32>
    %40 = arith.addf %38, %39 : vector<32x32xf32>
    %c0_37 = arith.constant 0 : index
    %c0_38 = arith.constant 0 : index
    %c0_39 = arith.constant 0 : index
    %41 = vector.load %arg11[%c0_37, %c0_38, %c0_39] : memref<1x32x32xf32, #tpu.memory_space<vmem>>, vector<1x32x32xf32>
    %42 = vector.shape_cast %41 : vector<1x32x32xf32> to vector<32x32xf32>
    %43 = vector.shape_cast %40 : vector<32x32xf32> to vector<1x32x32xf32>
    tpu.vector_store %arg11[%c0_37, %c0_38, %c0_39], %43 {strides = array<i32>} : memref<1x32x32xf32, #tpu.memory_space<vmem>>, vector<1x32x32xf32>,
    return
  }
  func.func @transform_0(%arg0: i32, %arg1: i32, %arg2: i32) -> (i32, i32, i32, i32) {
    %c0_i32 = arith.constant 0 : i32
    %c0_i32_0 = arith.constant 0 : i32
    return %arg1, %arg0, %c0_i32, %arg2 : i32, i32, i32, i32
  }
  func.func @transform_1(%arg0: i32, %arg1: i32, %arg2: i32) -> (i32, i32, i32, i32) {
    %c0_i32 = arith.constant 0 : i32
    %c0_i32_0 = arith.constant 0 : i32
    return %arg1, %arg0, %c0_i32, %arg2 : i32, i32, i32, i32
  }
  func.func @transform_2(%arg0: i32, %arg1: i32, %arg2: i32) -> (i32, i32, i32) {
    %c0_i32 = arith.constant 0 : i32
    %c0_i32_0 = arith.constant 0 : i32
    return %arg1, %c0_i32, %arg2 : i32, i32, i32
  }
  func.func @transform_3(%arg0: i32, %arg1: i32, %arg2: i32) -> (i32, i32, i32) {
    %c0_i32 = arith.constant 0 : i32
    %c0_i32_0 = arith.constant 0 : i32
    return %arg1, %c0_i32, %arg2 : i32, i32, i32
  }
  func.func @transform_4(%arg0: i32, %arg1: i32, %arg2: i32) -> (i32, i32, i32) {
    %c0_i32 = arith.constant 0 : i32
    %c0_i32_0 = arith.constant 0 : i32
    %c0_i32_1 = arith.constant 0 : i32
    return %arg0, %c0_i32, %c0_i32_0 : i32, i32, i32
  }
  func.func @transform_5(%arg0: i32, %arg1: i32, %arg2: i32) -> (i32, i32, i32) {
    %c0_i32 = arith.constant 0 : i32
    %c0_i32_0 = arith.constant 0 : i32
    %c0_i32_1 = arith.constant 0 : i32
    return %arg0, %c0_i32, %c0_i32_0 : i32, i32, i32
  }
  func.func @transform_6(%arg0: i32, %arg1: i32, %arg2: i32) -> (i32, i32, i32) {
    %c0_i32 = arith.constant 0 : i32
    %c0_i32_0 = arith.constant 0 : i32
    %c0_i32_1 = arith.constant 0 : i32
    return %arg0, %c0_i32, %c0_i32_0 : i32, i32, i32
  }
  func.func @transform_7(%arg0: i32, %arg1: i32, %arg2: i32) -> (i32, i32, i32) {
    %c0_i32 = arith.constant 0 : i32
    %c0_i32_0 = arith.constant 0 : i32
    %c0_i32_1 = arith.constant 0 : i32
    return %arg0, %c0_i32, %c0_i32_0 : i32, i32, i32
  }
  func.func @transform_8(%arg0: i32, %arg1: i32, %arg2: i32) -> (i32, i32, i32) {
    %c0_i32 = arith.constant 0 : i32
    %c0_i32_0 = arith.constant 0 : i32
    %c0_i32_1 = arith.constant 0 : i32
    return %arg0, %c0_i32, %c0_i32_0 : i32, i32, i32
  }
}

module attributes {stable_mosaic.version = 11 : i64} {
  func.func @_conva_filter_kernel(%arg0: i32, %arg1: i32, %arg2: i32, %arg3: memref<1x1x3x256xf32, #tpu.memory_space<vmem>>, %arg4: memref<1x1x1x256xf32, #tpu.memory_space<vmem>>, %arg5: memref<1x3x256xf32, #tpu.memory_space<vmem>>, %arg6: memref<1x3x256xf32, #tpu.memory_space<vmem>>, %arg7: memref<1x3x256xf32, #tpu.memory_space<vmem>>, %arg8: memref<1x1x1x256xf32, #tpu.memory_space<vmem>>, %arg9: memref<1x32x3xf32, #tpu.memory_space<vmem>>, %arg10: memref<1x32x3xf32, #tpu.memory_space<vmem>>, %arg11: memref<1x32x1xf32, #tpu.memory_space<vmem>>, %arg12: memref<1x32x32xf32, #tpu.memory_space<vmem>>, %arg13: memref<1x32x1xf32, #tpu.memory_space<vmem>>, %arg14: memref<3x32xf32, #tpu.memory_space<vmem>>, %arg15: memref<1x1x1x256xf32, #tpu.memory_space<vmem>>) attributes {dimension_semantics = [#tpu.dimension_semantics<parallel>, #tpu.dimension_semantics<parallel>, #tpu.dimension_semantics<parallel>], iteration_bounds = array<i64: 2, 1, 8>, scalar_prefetch = 0 : i64, scratch_operands = 0 : i64, tpu.core_type = #tpu.core_type<tc>, window_params = [{transform_indices = @transform_0, window_bounds = array<i64: 1, 1, 3, 256>}, {transform_indices = @transform_1, window_bounds = array<i64: 1, 1, 1, 256>}, {transform_indices = @transform_2, window_bounds = array<i64: 1, 3, 256>}, {transform_indices = @transform_3, window_bounds = array<i64: 1, 3, 256>}, {transform_indices = @transform_4, window_bounds = array<i64: 1, 3, 256>}, {transform_indices = @transform_5, window_bounds = array<i64: 1, 1, 1, 256>}, {transform_indices = @transform_6, window_bounds = array<i64: 1, 32, 3>}, {transform_indices = @transform_7, window_bounds = array<i64: 1, 32, 3>}, {transform_indices = @transform_8, window_bounds = array<i64: 1, 32, 1>}, {transform_indices = @transform_9, window_bounds = array<i64: 1, 32, 32>}, {transform_indices = @transform_10, window_bounds = array<i64: 1, 32, 1>}, {pipeline_mode = #tpu.pipeline_mode<synchronous>, transform_indices = @transform_11, window_bounds = array<i64: 3, 32>}, {transform_indices = @transform_12, window_bounds = array<i64: 1, 1, 1, 256>}]} {
    %c0 = arith.constant 0 : index
    %c0_0 = arith.constant 0 : index
    %c0_1 = arith.constant 0 : index
    %c0_2 = arith.constant 0 : index
    %0 = vector.load %arg3[%c0, %c0_0, %c0_1, %c0_2] : memref<1x1x3x256xf32, #tpu.memory_space<vmem>>, vector<1x1x3x256xf32>
    %1 = vector.shape_cast %0 : vector<1x1x3x256xf32> to vector<3x256xf32>
    %c0_3 = arith.constant 0 : index
    %c0_4 = arith.constant 0 : index
    %c0_5 = arith.constant 0 : index
    %c0_6 = arith.constant 0 : index
    %2 = vector.load %arg4[%c0_3, %c0_4, %c0_5, %c0_6] : memref<1x1x1x256xf32, #tpu.memory_space<vmem>>, vector<1x1x1x256xf32>
    %3 = vector.shape_cast %2 : vector<1x1x1x256xf32> to vector<1x256xf32>
    %c0_7 = arith.constant 0 : index
    %c0_8 = arith.constant 0 : index
    %c0_9 = arith.constant 0 : index
    %4 = vector.load %arg5[%c0_7, %c0_8, %c0_9] : memref<1x3x256xf32, #tpu.memory_space<vmem>>, vector<1x3x256xf32>
    %5 = vector.shape_cast %4 : vector<1x3x256xf32> to vector<3x256xf32>
    %c0_10 = arith.constant 0 : index
    %c0_11 = arith.constant 0 : index
    %c0_12 = arith.constant 0 : index
    %6 = vector.load %arg6[%c0_10, %c0_11, %c0_12] : memref<1x3x256xf32, #tpu.memory_space<vmem>>, vector<1x3x256xf32>
    %7 = vector.shape_cast %6 : vector<1x3x256xf32> to vector<3x256xf32>
    %c0_13 = arith.constant 0 : index
    %c0_14 = arith.constant 0 : index
    %c0_15 = arith.constant 0 : index
    %8 = vector.load %arg7[%c0_13, %c0_14, %c0_15] : memref<1x3x256xf32, #tpu.memory_space<vmem>>, vector<1x3x256xf32>
    %9 = vector.shape_cast %8 : vector<1x3x256xf32> to vector<3x256xf32>
    %10 = vector.broadcast %3 : vector<1x256xf32> to vector<3x256xf32>
    %11 = arith.mulf %5, %10 : vector<3x256xf32>
    %12 = arith.subf %1, %11 : vector<3x256xf32>
    %c0_16 = arith.constant 0 : index
    %c0_17 = arith.constant 0 : index
    %c0_18 = arith.constant 0 : index
    %13 = vector.load %arg9[%c0_16, %c0_17, %c0_18] : memref<1x32x3xf32, #tpu.memory_space<vmem>>, vector<1x32x3xf32>
    %14 = vector.shape_cast %13 : vector<1x32x3xf32> to vector<32x3xf32>
    %cst = arith.constant dense<0.000000e+00> : vector<32x256xf32>
    %15 = tpu.matmul %14, %12, %cst {dimension_numbers = #tpu.dot_dimension_numbers<[1], [0], [0], [1], [0, 0, 1, 1], [], []>} : vector<32x3xf32>, vector<3x256xf32>, vector<32x256xf32> -> vector<32x256xf32>
    %c0_19 = arith.constant 0 : index
    %c0_20 = arith.constant 0 : index
    %c0_21 = arith.constant 0 : index
    %16 = vector.load %arg10[%c0_19, %c0_20, %c0_21] : memref<1x32x3xf32, #tpu.memory_space<vmem>>, vector<1x32x3xf32>
    %17 = vector.shape_cast %16 : vector<1x32x3xf32> to vector<32x3xf32>
    %cst_22 = arith.constant dense<0.000000e+00> : vector<32x256xf32>
    %18 = tpu.matmul %17, %7, %cst_22 {dimension_numbers = #tpu.dot_dimension_numbers<[1], [0], [0], [1], [0, 0, 1, 1], [], []>} : vector<32x3xf32>, vector<3x256xf32>, vector<32x256xf32> -> vector<32x256xf32>
    %19 = arith.addf %15, %18 : vector<32x256xf32>
    %c0_23 = arith.constant 0 : index
    %c0_24 = arith.constant 0 : index
    %c0_25 = arith.constant 0 : index
    %20 = vector.load %arg11[%c0_23, %c0_24, %c0_25] : memref<1x32x1xf32, #tpu.memory_space<vmem>>, vector<1x32x1xf32>
    %21 = vector.shape_cast %20 : vector<1x32x1xf32> to vector<32x1xf32>
    %22 = vector.broadcast %21 : vector<32x1xf32> to vector<32x256xf32>
    %23 = arith.addf %19, %22 : vector<32x256xf32>
    %cst_26 = arith.constant 0.000000e+00 : f32
    %24 = vector.broadcast %cst_26 : f32 to vector<32x256xf32>
    %25 = arith.maximumf %23, %24 : vector<32x256xf32>
    %c0_27 = arith.constant 0 : index
    %c0_28 = arith.constant 0 : index
    %c0_29 = arith.constant 0 : index
    %26 = vector.load %arg12[%c0_27, %c0_28, %c0_29] : memref<1x32x32xf32, #tpu.memory_space<vmem>>, vector<1x32x32xf32>
    %27 = vector.shape_cast %26 : vector<1x32x32xf32> to vector<32x32xf32>
    %cst_30 = arith.constant dense<0.000000e+00> : vector<32x256xf32>
    %28 = tpu.matmul %27, %25, %cst_30 {dimension_numbers = #tpu.dot_dimension_numbers<[1], [0], [0], [1], [0, 0, 1, 1], [], []>} : vector<32x32xf32>, vector<32x256xf32>, vector<32x256xf32> -> vector<32x256xf32>
    %c0_31 = arith.constant 0 : index
    %c0_32 = arith.constant 0 : index
    %c0_33 = arith.constant 0 : index
    %29 = vector.load %arg13[%c0_31, %c0_32, %c0_33] : memref<1x32x1xf32, #tpu.memory_space<vmem>>, vector<1x32x1xf32>
    %30 = vector.shape_cast %29 : vector<1x32x1xf32> to vector<32x1xf32>
    %31 = vector.broadcast %30 : vector<32x1xf32> to vector<32x256xf32>
    %32 = arith.addf %28, %31 : vector<32x256xf32>
    %cst_34 = arith.constant 0.000000e+00 : f32
    %33 = vector.broadcast %cst_34 : f32 to vector<32x256xf32>
    %34 = arith.maximumf %32, %33 : vector<32x256xf32>
    %c0_35 = arith.constant 0 : index
    %c0_36 = arith.constant 0 : index
    %35 = vector.load %arg14[%c0_35, %c0_36] : memref<3x32xf32, #tpu.memory_space<vmem>>, vector<3x32xf32>
    %cst_37 = arith.constant dense<0.000000e+00> : vector<3x256xf32>
    %36 = tpu.matmul %35, %34, %cst_37 {dimension_numbers = #tpu.dot_dimension_numbers<[1], [0], [0], [1], [0, 0, 1, 1], [], []>} : vector<3x32xf32>, vector<32x256xf32>, vector<3x256xf32> -> vector<3x256xf32>
    %37 = arith.subf %9, %5 : vector<3x256xf32>
    %38 = arith.mulf %36, %37 : vector<3x256xf32>
    %cst_38 = arith.constant dense<0.000000e+00> : vector<256xf32>
    %39 = vector.multi_reduction <add>, %38, %cst_38 [0] : vector<3x256xf32> to vector<256xf32>
    %40 = vector.shape_cast %39 : vector<256xf32> to vector<1x256xf32>
    %cst_39 = arith.constant 0.333333343 : f32
    %41 = vector.broadcast %cst_39 : f32 to vector<1x256xf32>
    %42 = arith.mulf %40, %41 : vector<1x256xf32>
    %43 = arith.addf %3, %42 : vector<1x256xf32>
    %cst_40 = arith.constant 0.000000e+00 : f32
    %cst_41 = arith.constant 1.000000e+00 : f32
    %44 = vector.broadcast %cst_40 : f32 to vector<1x256xf32>
    %45 = arith.maximumf %44, %43 : vector<1x256xf32>
    %46 = vector.broadcast %cst_41 : f32 to vector<1x256xf32>
    %47 = arith.minimumf %46, %45 : vector<1x256xf32>
    %c0_42 = arith.constant 0 : index
    %c0_43 = arith.constant 0 : index
    %c0_44 = arith.constant 0 : index
    %c0_45 = arith.constant 0 : index
    %48 = vector.load %arg8[%c0_42, %c0_43, %c0_44, %c0_45] : memref<1x1x1x256xf32, #tpu.memory_space<vmem>>, vector<1x1x1x256xf32>
    %49 = vector.shape_cast %48 : vector<1x1x1x256xf32> to vector<1x256xf32>
    %50 = arith.mulf %47, %49 : vector<1x256xf32>
    %c0_46 = arith.constant 0 : index
    %c0_47 = arith.constant 0 : index
    %c0_48 = arith.constant 0 : index
    %c0_49 = arith.constant 0 : index
    %51 = vector.load %arg15[%c0_46, %c0_47, %c0_48, %c0_49] : memref<1x1x1x256xf32, #tpu.memory_space<vmem>>, vector<1x1x1x256xf32>
    %52 = vector.shape_cast %51 : vector<1x1x1x256xf32> to vector<1x256xf32>
    %53 = vector.shape_cast %50 : vector<1x256xf32> to vector<1x1x1x256xf32>
    tpu.vector_store %arg15[%c0_46, %c0_47, %c0_48, %c0_49], %53 {strides = array<i32>} : memref<1x1x1x256xf32, #tpu.memory_space<vmem>>, vector<1x1x1x256xf32>,
    return
  }
  func.func @transform_0(%arg0: i32, %arg1: i32, %arg2: i32) -> (i32, i32, i32, i32) {
    %c0_i32 = arith.constant 0 : i32
    %c0_i32_0 = arith.constant 0 : i32
    return %arg0, %arg2, %c0_i32, %arg1 : i32, i32, i32, i32
  }
  func.func @transform_1(%arg0: i32, %arg1: i32, %arg2: i32) -> (i32, i32, i32, i32) {
    %c0_i32 = arith.constant 0 : i32
    %c0_i32_0 = arith.constant 0 : i32
    return %arg0, %arg2, %c0_i32, %arg1 : i32, i32, i32, i32
  }
  func.func @transform_2(%arg0: i32, %arg1: i32, %arg2: i32) -> (i32, i32, i32) {
    %c0_i32 = arith.constant 0 : i32
    %c0_i32_0 = arith.constant 0 : i32
    return %arg0, %c0_i32, %arg1 : i32, i32, i32
  }
  func.func @transform_3(%arg0: i32, %arg1: i32, %arg2: i32) -> (i32, i32, i32) {
    %c0_i32 = arith.constant 0 : i32
    %c0_i32_0 = arith.constant 0 : i32
    return %arg0, %c0_i32, %arg1 : i32, i32, i32
  }
  func.func @transform_4(%arg0: i32, %arg1: i32, %arg2: i32) -> (i32, i32, i32) {
    %c0_i32 = arith.constant 0 : i32
    %c0_i32_0 = arith.constant 0 : i32
    return %arg0, %c0_i32, %arg1 : i32, i32, i32
  }
  func.func @transform_5(%arg0: i32, %arg1: i32, %arg2: i32) -> (i32, i32, i32, i32) {
    %c0_i32 = arith.constant 0 : i32
    %c0_i32_0 = arith.constant 0 : i32
    return %arg0, %arg2, %c0_i32, %arg1 : i32, i32, i32, i32
  }
  func.func @transform_6(%arg0: i32, %arg1: i32, %arg2: i32) -> (i32, i32, i32) {
    %c0_i32 = arith.constant 0 : i32
    %c0_i32_0 = arith.constant 0 : i32
    %c0_i32_1 = arith.constant 0 : i32
    return %arg2, %c0_i32, %c0_i32_0 : i32, i32, i32
  }
  func.func @transform_7(%arg0: i32, %arg1: i32, %arg2: i32) -> (i32, i32, i32) {
    %c0_i32 = arith.constant 0 : i32
    %c0_i32_0 = arith.constant 0 : i32
    %c0_i32_1 = arith.constant 0 : i32
    return %arg2, %c0_i32, %c0_i32_0 : i32, i32, i32
  }
  func.func @transform_8(%arg0: i32, %arg1: i32, %arg2: i32) -> (i32, i32, i32) {
    %c0_i32 = arith.constant 0 : i32
    %c0_i32_0 = arith.constant 0 : i32
    %c0_i32_1 = arith.constant 0 : i32
    return %arg2, %c0_i32, %c0_i32_0 : i32, i32, i32
  }
  func.func @transform_9(%arg0: i32, %arg1: i32, %arg2: i32) -> (i32, i32, i32) {
    %c0_i32 = arith.constant 0 : i32
    %c0_i32_0 = arith.constant 0 : i32
    %c0_i32_1 = arith.constant 0 : i32
    return %arg2, %c0_i32, %c0_i32_0 : i32, i32, i32
  }
  func.func @transform_10(%arg0: i32, %arg1: i32, %arg2: i32) -> (i32, i32, i32) {
    %c0_i32 = arith.constant 0 : i32
    %c0_i32_0 = arith.constant 0 : i32
    %c0_i32_1 = arith.constant 0 : i32
    return %arg2, %c0_i32, %c0_i32_0 : i32, i32, i32
  }
  func.func @transform_11(%arg0: i32, %arg1: i32, %arg2: i32) -> (i32, i32) {
    %c0_i32 = arith.constant 0 : i32
    %c0_i32_0 = arith.constant 0 : i32
    %c0_i32_1 = arith.constant 0 : i32
    return %c0_i32, %c0_i32_0 : i32, i32
  }
  func.func @transform_12(%arg0: i32, %arg1: i32, %arg2: i32) -> (i32, i32, i32, i32) {
    %c0_i32 = arith.constant 0 : i32
    %c0_i32_0 = arith.constant 0 : i32
    return %arg0, %arg2, %c0_i32, %arg1 : i32, i32, i32, i32
  }
}

module attributes {stable_mosaic.version = 11 : i64} {
  func.func @_panoptic_kernel(%arg0: i32, %arg1: i32, %arg2: memref<1x8x256xf32, #tpu.memory_space<vmem>>, %arg3: memref<1x8x1xf32, #tpu.memory_space<vmem>>, %arg4: memref<1x1x256xf32, #tpu.memory_space<vmem>>, %arg5: memref<1x8x256xf32, #tpu.memory_space<vmem>>) attributes {dimension_semantics = [#tpu.dimension_semantics<parallel>, #tpu.dimension_semantics<parallel>], iteration_bounds = array<i64: 2, 1>, scalar_prefetch = 0 : i64, scratch_operands = 0 : i64, tpu.core_type = #tpu.core_type<tc>, window_params = [{transform_indices = @transform_0, window_bounds = array<i64: 1, 8, 256>}, {transform_indices = @transform_1, window_bounds = array<i64: 1, 8, 1>}, {transform_indices = @transform_2, window_bounds = array<i64: 1, 1, 256>}, {transform_indices = @transform_3, window_bounds = array<i64: 1, 8, 256>}]} {
    %c0 = arith.constant 0 : index
    %c0_0 = arith.constant 0 : index
    %c0_1 = arith.constant 0 : index
    %0 = vector.load %arg2[%c0, %c0_0, %c0_1] : memref<1x8x256xf32, #tpu.memory_space<vmem>>, vector<1x8x256xf32>
    %1 = vector.shape_cast %0 : vector<1x8x256xf32> to vector<8x256xf32>
    %c0_2 = arith.constant 0 : index
    %c0_3 = arith.constant 0 : index
    %c0_4 = arith.constant 0 : index
    %2 = vector.load %arg3[%c0_2, %c0_3, %c0_4] : memref<1x8x1xf32, #tpu.memory_space<vmem>>, vector<1x8x1xf32>
    %3 = vector.shape_cast %2 : vector<1x8x1xf32> to vector<8x1xf32>
    %4 = vector.broadcast %3 : vector<8x1xf32> to vector<8x256xf32>
    %5 = arith.mulf %4, %1 : vector<8x256xf32>
    %cst = arith.constant dense<0.000000e+00> : vector<256xf32>
    %6 = vector.multi_reduction <add>, %5, %cst [0] : vector<8x256xf32> to vector<256xf32>
    %7 = vector.shape_cast %6 : vector<256xf32> to vector<1x256xf32>
    %cst_5 = arith.constant 5.000000e-01 : f32
    %8 = vector.broadcast %cst_5 : f32 to vector<1x256xf32>
    %9 = arith.cmpf ogt, %7, %8 : vector<1x256xf32>
    %c0_6 = arith.constant 0 : index
    %c0_7 = arith.constant 0 : index
    %c0_8 = arith.constant 0 : index
    %10 = vector.load %arg4[%c0_6, %c0_7, %c0_8] : memref<1x1x256xf32, #tpu.memory_space<vmem>>, vector<1x1x256xf32>
    %11 = vector.shape_cast %10 : vector<1x1x256xf32> to vector<1x256xf32>
    %12 = vector.shape_cast %9 : vector<1x256xi1> to vector<1x256xi1>
    %13 = vector.broadcast %12 : vector<1x256xi1> to vector<8x256xi1>
    %14 = vector.shape_cast %11 : vector<1x256xf32> to vector<1x256xf32>
    %15 = vector.broadcast %14 : vector<1x256xf32> to vector<8x256xf32>
    %16 = arith.select %13, %5, %15 : vector<8x256xi1>, vector<8x256xf32>
    %c0_9 = arith.constant 0 : index
    %c0_10 = arith.constant 0 : index
    %c0_11 = arith.constant 0 : index
    %17 = vector.load %arg5[%c0_9, %c0_10, %c0_11] : memref<1x8x256xf32, #tpu.memory_space<vmem>>, vector<1x8x256xf32>
    %18 = vector.shape_cast %17 : vector<1x8x256xf32> to vector<8x256xf32>
    %19 = vector.shape_cast %16 : vector<8x256xf32> to vector<1x8x256xf32>
    tpu.vector_store %arg5[%c0_9, %c0_10, %c0_11], %19 {strides = array<i32>} : memref<1x8x256xf32, #tpu.memory_space<vmem>>, vector<1x8x256xf32>,
    return
  }
  func.func @transform_0(%arg0: i32, %arg1: i32) -> (i32, i32, i32) {
    %c0_i32 = arith.constant 0 : i32
    %c0_i32_0 = arith.constant 0 : i32
    return %arg0, %c0_i32, %arg1 : i32, i32, i32
  }
  func.func @transform_1(%arg0: i32, %arg1: i32) -> (i32, i32, i32) {
    %c0_i32 = arith.constant 0 : i32
    %c0_i32_0 = arith.constant 0 : i32
    %c0_i32_1 = arith.constant 0 : i32
    return %arg0, %c0_i32, %c0_i32_0 : i32, i32, i32
  }
  func.func @transform_2(%arg0: i32, %arg1: i32) -> (i32, i32, i32) {
    %c0_i32 = arith.constant 0 : i32
    %c0_i32_0 = arith.constant 0 : i32
    return %arg0, %c0_i32, %arg1 : i32, i32, i32
  }
  func.func @transform_3(%arg0: i32, %arg1: i32) -> (i32, i32, i32) {
    %c0_i32 = arith.constant 0 : i32
    %c0_i32_0 = arith.constant 0 : i32
    return %arg0, %c0_i32, %arg1 : i32, i32, i32
  }
}

</mosaic_0001>

<bundles_post_ra>
// kernel: isa_forward.7
= control target key start
LH: loop header
LB: loop body
LE: loop exit
PB: predicated region body
PF: predicated region fallthrough
CT: control target
= control target key end

     0   :  { %s697_s18 = smov 0   ;;  %s699_s19 = smov 0   ;;  %s767_s0 = inlined_call_operand.vmem [shape: f32[2,3,256], index: 0, kind: input, shape index: {}]   ;;  %s768_s1 = inlined_call_operand.vmem [shape: f32[32,3], index: 1, kind: input, shape index: {}]   ;;  %s769_s2 = inlined_call_operand.vmem [shape: f32[32,1], index: 2, kind: input, shape index: {}]   ;;  %s770_s3 = inlined_call_operand.vmem [shape: f32[3,32], index: 3, kind: input, shape index: {}]   ;;  %s771_s4 = inlined_call_operand.vmem [shape: f32[3,1], index: 4, kind: input, shape index: {}]   ;;  %s772_s5 = inlined_call_operand.vmem [shape: f32[2,3,256], index: 5, kind: output, shape index: {}]  }
   0x1   :  { %s701_s20 = smov 0  }
   0x2 LB: > { %s27_s21 = sadd.s32 1, %s659_s19  ;;  %p596_p0 = scmp.ge.s32.totalorder %s663_s20, 1  ;;  %s663_s20 = sphi %s701_s20, %s15_s20   ;;  %s659_s19 = sphi %s699_s19, %s774_s19   ;;  %s655_s18 = sphi %s697_s18, %s773_s18  }
   0x3   : > { %p29_p1 = scmp.ge.s32.totalorder %s27_s21, 2  ;;  %p208_p2 = scmp.lt.s32.totalorder %s663_s20, 3 }
   0x5   : > { %s776_s21 = smov (%p29_p1, %s27_s21), 0  ;;  %p209_p3 = pnand %p596_p0, %p208_p2 }
   0x6   : > { %p245_p4 = scmp.lt.s32.totalorder (!%p209_p3), %s655_s18, 1 }
   0x7   : > { %212 = sbr.rel (%p209_p3) target bundleno = 442 (0x1ba), region = 40 }
   0xc   : > { %v665_v0 = vmov 0.0   ;;  %v270_v1 = vld [vmem:[%s769_s2 + $0x8] sm:$0xff]  ;;  %s778_s18 = smov (!%p245_p4, %s655_s18), 1  ;;  %v666_v2 = vmov 0   ;;  %v272_v3 = vld [vmem:[%s769_s2 + $0x18] sm:$0xff]  ;;  %v269_v4 = vld [vmem:[%s769_s2] sm:$0xff] }
   0xd   : > { %377 = vmatprep.mubr.f32.mxu0 %v665_v0  ;;  %493 = vmatprep.mubr.f32.mxu1 %v665_v0  ;;  %s610_s26 = sshll.u32 %s778_s18, 3  ;;  %v271_v5 = vld [vmem:[%s769_s2 + $0x10] sm:$0xff]  ;;  %vm308_vm0 = vcmask 1042432   ;;  %v265_v8 = vld [vmem:[%s768_s1] sm:$0xff]  ;;  %vm295_vm1 = vcmask 23552   ;;  %v266_v10 = vld [vmem:[%s768_s1 + $0x8] sm:$0xff] }
   0xe   : > { %639 = vset.pattern.permute.xlu1 %v666_v2  ;;  %638 = vset.pattern.permute.xlu0 %v666_v2  ;;  %s252_s8 = scalar_lea.vmem %s767_s0, %s610_s26  ;;  %v419_v9 = vld [vmem:[%s771_s4] sm:$0x7]  ;;  %v267_v11 = vld [vmem:[%s768_s1 + $0x10] sm:$0xff]  ;;  %v268_v12 = vld [vmem:[%s768_s1 + $0x18] sm:$0xff]  ;;  %vm425_vm2 = vcmask 261120   ;;  %s262_s28 = scalar_lea.vmem %s772_s5, %s610_s26 }
   0xf   : > { %280 = vperm.xlu1 %639, %v270_v1   ;;  %290 = vperm.xlu0 %638, %v272_v3   ;;  %v264_v6 = vld [vmem:[%s252_s8] sm:$0x77] }
  0x10   : > { %v294_v7 = vcombine.high %v264_v6, %v264_v6  ;;  %v418_v49 = vld [vmem:[%s770_s3] sm:$0x7] }
  0x12   : > { %601 = vmatprep.subr.msk.mxu0 %vm308_vm0, %v294_v7 }
  0x13   : > { %275 = vperm.xlu1 %639, %v269_v4   ;;  %285 = vperm.xlu0 %638, %v271_v5  }
  0x14   : > { %602 = vmatpush1.msk.msra.mxu0 %vm308_vm0, %v264_v6 }
  0x15   : > { %603 = vmatmul.mubr.msk.f32.vlgmr.msra.gmra.mxu0 %vm295_vm1, %v265_v8 }
  0x16   : > { %383 = vmatprep.mubr.f32.mxu0 %v665_v0 }
  0x17   : > { %422 = vperm.xlu0 %638, %v419_v9  }
  0x19   : > { %604 = vmatmul.mubr.msk.f32.gmra.mxu0 %vm295_vm1, %v266_v10 }
  0x1a   : > { %389 = vmatprep.mubr.f32.mxu0 %v665_v0 }
  0x1d   : > { %605 = vmatmul.mubr.msk.f32.gmra.mxu0 %vm295_vm1, %v267_v11 }
  0x1e   : > { %395 = vmatprep.mubr.f32.mxu0 %v665_v0 }
  0x21   : > { %606 = vmatmul.mubr.msk.f32.gmra.mxu0 %vm295_vm1, %v268_v12 }
  0x8a   : > { %v291_v16 = vpop.permute.xlu0 %290  ;;  %v281_v19 = vpop.permute.xlu1 %280 }
  0x8e   : > { %v286_v21 = vpop.permute.xlu0 %285  ;;  %v276_v27 = vpop.permute.xlu1 %275 }
  0x92   : > { %v423_v51 = vpop.permute.xlu0 %422 }
  0xd5   : > { %v379_v13 = vpop.f32.mrf.mxu0 }
  0xd6   : > { %v380_v35 = vadd.f32 %v379_v13, %v276_v27 }
  0xd7   : > { %v381_v14 = vpop.f32.mrf.mxu0 }
  0xd8   : > { %v382_v32 = vadd.f32 %v381_v14, %v276_v27  ;;  %v402_v43 = vmul.f32 0.2, %v380_v35 }
  0xd9   : > { %v385_v15 = vpop.f32.mrf.mxu0 }
  0xda   : > { %v386_v30 = vadd.f32 %v385_v15, %v281_v19  ;;  %v403_v41 = vmul.f32 0.2, %v382_v32  ;;  %v410_v48 = vmax.f32 %v380_v35, %v402_v43 }
  0xdb   : > { %v387_v17 = vpop.f32.mrf.mxu0 }
  0xdc   : > { %v388_v28 = vadd.f32 %v387_v17, %v281_v19  ;;  %v404_v39 = vmul.f32 0.2, %v386_v30  ;;  %v411_v47 = vmax.f32 %v382_v32, %v403_v41 }
  0xdd   : > { %v391_v18 = vpop.f32.mrf.mxu0 }
  0xde   : > { %v392_v25 = vadd.f32 %v391_v18, %v286_v21  ;;  %v405_v37 = vmul.f32 0.2, %v388_v28  ;;  %v412_v46 = vmax.f32 %v386_v30, %v404_v39 }
  0xdf   : > { %v393_v20 = vpop.f32.mrf.mxu0 }
  0xe0   : > { %v394_v23 = vadd.f32 %v393_v20, %v286_v21  ;;  %v406_v36 = vmul.f32 0.2, %v392_v25  ;;  %v413_v45 = vmax.f32 %v388_v28, %v405_v37 }
  0xe1   : > { %v397_v22 = vpop.f32.mrf.mxu0 }
  0xe2   : > { %v398_v24 = vadd.f32 %v397_v22, %v291_v16  ;;  %v407_v33 = vmul.f32 0.2, %v394_v23  ;;  %v414_v44 = vmax.f32 %v392_v25, %v406_v36 }
  0xe3   : > { %v399_v26 = vpop.f32.mrf.mxu0 }
  0xe4   : > { %v400_v29 = vadd.f32 %v399_v26, %v291_v16  ;;  %v408_v31 = vmul.f32 0.2, %v398_v24  ;;  %v415_v42 = vmax.f32 %v394_v23, %v407_v33 }
  0xe6   : > { %v409_v34 = vmul.f32 0.2, %v400_v29  ;;  %v416_v40 = vmax.f32 %v398_v24, %v408_v31 }
  0xe8   : > { %v417_v38 = vmax.f32 %v400_v29, %v409_v34 }
  0xea   : > { %453 = vmatprep.subr.mxu1 %v417_v38 }
  0xeb   : > { %454 = vmatpush1.msra.mxu1 %v416_v40 }
  0xec   : > { %455 = vmatprep.subr.mxu1 %v415_v42 }
  0xed   : > { %456 = vmatpush1.msra.mxu1 %v414_v44 }
  0xee   : > { %457 = vmatprep.subr.mxu1 %v413_v45 }
  0xef   : > { %458 = vmatpush1.msra.mxu1 %v412_v46 }
  0xf0   : > { %459 = vmatprep.subr.mxu1 %v411_v47 }
  0xf1   : > { %460 = vmatpush1.msra.mxu1 %v410_v48 }
  0xf2   : > { %607 = vmatmul.mubr.msk.f32.vlgmr.msra.gmra.mxu1 %vm425_vm2, %v418_v49 }
 0x1b2   : > { %v495_v50 = vpop.f32.mrf.mxu1 }
 0x1b3   : > { %v496_v53 = vadd.f32 %v495_v50, %v423_v51 }
 0x1b4   : > { %v497_v52 = vpop.f32.mrf.mxu1 }
 0x1b5   : > { %v498_v54 = vadd.f32 %v497_v52, %v423_v51 }
 0x1b7   : > { %v502_v55 = vcombine.low %v496_v53, %v498_v54 }
 0x1b9   : > { %504 = vst [vmem:[%s262_s28] sm:$0x77] %v502_v55 }
 0x1ba PF: > { %s15_s20 = sadd.s32 1, %s663_s20   ;;  %s773_s18 = smov %s659_s19 }
 0x1bb   : > { %p12_p5 = scmp.ge.s32.totalorder %s15_s20, 4   ;;  %s774_s19 = smov %s776_s21 }
 0x1bd   :  { %14 = sbr.rel (!%p12_p5) target bundleno = 2 (0x2), region = 70 }

// kernel: isa_forward.8
= control target key start
LH: loop header
LB: loop body
LE: loop exit
PB: predicated region body
PF: predicated region fallthrough
CT: control target
= control target key end

     0   :  { %s617_s12 = smov 0   ;;  %s813_s0 = inlined_call_operand.vmem [shape: f32[2,3,18,18], index: 0, kind: input, shape index: {}]   ;;  %s814_s1 = inlined_call_operand.vmem [shape: f32[1,16,16], index: 1, kind: input, shape index: {}]   ;;  %s815_s2 = inlined_call_operand.vmem [shape: f32[2,3,16,16], index: 2, kind: output, shape index: {0}]   ;;  %s816_s3 = inlined_call_operand.vmem [shape: f32[2,3,16,16], index: 3, kind: output, shape index: {1}]  }
   0x1 LB: > { %s565_s13 = sadd.s32 4294967295, %s593_s12   ;;  %p569_p0 = scmp.ge.s32.totalorder %s593_s12, 1  ;;  %s593_s12 = sphi %s617_s12, %s14_s12  }
   0x2   : > { %p140_p1 = scmp.lt.s32.totalorder %s593_s12, 3 }
   0x4   : > { %p141_p2 = pnand %p569_p0, %p140_p1 }
   0x5   : > { %p169_p3 = scmp.lt.s32.totalorder (!%p141_p2), %s565_s13, 1  ;;  %s595_s18 = smov (!%p141_p2), 127  }
   0x6   : > { %144 = sbr.rel (%p141_p2) target bundleno = 190 (0xbe), region = 28  ;;  %s596_s19 = smov (!%p141_p2), 126  }
   0xb   : > { %s818_s13 = smov (!%p169_p3, %s565_s13), 1  ;;  %vm204_vm0 = vcmask 1046528   ;;  %vm232_vm1 = vcmask 1045504   ;;  %vm464_vm2 = vcmask 130048  }
   0xc   : > { %s575_s14 = smul.u32 72, %s818_s13 }
   0xd   : > { %s576_s20 = smul.u32 48, %s818_s13 }
   0xe   : > { %s631_s17 = scalar_lea.vmem %s813_s0, %s575_s14 }
   0xf   : > { %v634_v0 = vld [vmem:[%s631_s17 + $0x18] sm:$0xff]  ;;  %v188_v1 = vld [vmem:[%s631_s17 + $0x20] sm:$0xff]  ;;  %v185_v7 = vld [vmem:[%s631_s17 + $0x8] sm:$0xff]  ;;  %s178_s27 = scalar_lea.vmem %s815_s2, %s576_s20  ;;  %s789_s30 = scalar_lea.vmem %s816_s3, %s576_s20 }
  0x10   : > { %v184_v2 = vld [vmem:[%s631_s17] sm:$0xff]  ;;  %v210_v3 = vrot.slane %v634_v0, 1  ;;  %v211_v4 = vrot.slane %v188_v1, 1  ;;  %v238_v5 = vrot.slane %v634_v0, 2  ;;  %v239_v6 = vrot.slane %v188_v1, 2  ;;  %v191_v18 = vld [vmem:[%s631_s17 + $0x38] sm:$0xff] }
  0x11   : > { %v205_v8 = vrot.slane %v184_v2, 1  ;;  %v206_v9 = vrot.slane %v185_v7, 1  ;;  %v233_v10 = vrot.slane %v184_v2, 2  ;;  %v234_v11 = vrot.slane %v185_v7, 2  ;;  %v189_v12 = vld [vmem:[%s631_s17 + $0x28] sm:$0x3] }
  0x12   : > { %v212_v13 = vsel %vm204_vm0, %v210_v3, %v211_v4  ;;  %v240_v14 = vsel %vm232_vm1, %v238_v5, %v239_v6  ;;  %v213_v15 = vrot.slane %v189_v12, 1  ;;  %v241_v16 = vrot.slane %v189_v12, 2  ;;  %v186_v17 = vld [vmem:[%s631_s17 + $0x10] sm:$0x3]  ;;  %v192_v23 = vld [vmem:[%s631_s17 + $0x40] sm:$0x3] }
  0x13   : > { %v228_v19 = vadd.f32 %v212_v13, %v634_v0  ;;  %v207_v20 = vsel %vm204_vm0, %v205_v8, %v206_v9  ;;  %v235_v21 = vsel %vm232_vm1, %v233_v10, %v234_v11  ;;  %v208_v22 = vrot.slane %v186_v17, 1  ;;  %v190_v28 = vld [vmem:[%s631_s17 + $0x30] sm:$0xff] }
  0x14   : > { %v226_v24 = vadd.f32 %v207_v20, %v184_v2  ;;  %v214_v25 = vsel %vm204_vm0, %v211_v4, %v213_v15  ;;  %v242_v26 = vsel %vm232_vm1, %v239_v6, %v241_v16  ;;  %v236_v27 = vrot.slane %v186_v17, 2 }
  0x15   : > { %v653_v29 = vadd.f32 %v240_v14, %v228_v19  ;;  %v229_v30 = vadd.f32 %v214_v25, %v188_v1  ;;  %v209_v31 = vsel %vm204_vm0, %v206_v9, %v208_v22  ;;  %v216_v32 = vrot.slane %v191_v18, 1 }
  0x16   : > { %v656_v33 = vadd.f32 %v235_v21, %v226_v24  ;;  %v227_v34 = vadd.f32 %v209_v31, %v185_v7  ;;  %v237_v35 = vsel %vm232_vm1, %v234_v11, %v236_v27  ;;  %v218_v36 = vrot.slane %v192_v23, 1 }
  0x17   : > { %270 = vrot.lane.b32.xlu1 %v653_v29, %s595_s18  ;;  %v661_v37 = vadd.f32 %v242_v26, %v229_v30  ;;  %v244_v38 = vrot.slane %v191_v18, 2  ;;  %v246_v39 = vrot.slane %v192_v23, 2  ;;  %v215_v40 = vrot.slane %v190_v28, 1 }
  0x18   : > { %266 = vrot.lane.b32.xlu0 %v656_v33, %s595_s18  ;;  %v665_v41 = vadd.f32 %v237_v35, %v227_v34  ;;  %v219_v42 = vsel %vm204_vm0, %v216_v32, %v218_v36  ;;  %v243_v43 = vrot.slane %v190_v28, 2  ;;  %v321_v50 = vmul.f32 %v185_v7, %v185_v7 }
  0x19   : > { %v231_v44 = vadd.f32 %v219_v42, %v191_v18  ;;  %v247_v45 = vsel %vm232_vm1, %v244_v38, %v246_v39  ;;  %v217_v46 = vsel %vm204_vm0, %v215_v40, %v216_v32  ;;  %v322_v51 = vmul.f32 %v186_v17, %v186_v17 }
  0x1a   : > { %v230_v47 = vadd.f32 %v217_v46, %v190_v28  ;;  %v245_v48 = vsel %vm232_vm1, %v243_v43, %v244_v38  ;;  %v320_v53 = vmul.f32 %v184_v2, %v184_v2  ;;  %v339_v54 = vrot.slane %v321_v50, 1 }
  0x1b   : > { %272 = vrot.lane.b32.xlu1 %v661_v37, %s595_s18  ;;  %v673_v49 = vadd.f32 %v247_v45, %v231_v44  ;;  %v341_v55 = vrot.slane %v322_v51, 1  ;;  %v324_v56 = vmul.f32 %v188_v1, %v188_v1  ;;  %v325_v58 = vmul.f32 %v189_v12, %v189_v12 }
  0x1c   : > { %268 = vrot.lane.b32.xlu0 %v665_v41, %s595_s18  ;;  %v677_v52 = vadd.f32 %v245_v48, %v230_v47  ;;  %v338_v57 = vrot.slane %v320_v53, 1  ;;  %v323_v59 = vmul.f32 %v634_v0, %v634_v0  ;;  %v366_v60 = vrot.slane %v321_v50, 2 }
  0x1d   : > { %v368_v61 = vrot.slane %v322_v51, 2  ;;  %v342_v62 = vsel %vm204_vm0, %v339_v54, %v341_v55  ;;  %v365_v63 = vrot.slane %v320_v53, 2  ;;  %v344_v2 = vrot.slane %v324_v56, 1  ;;  %v751_v51 = vld [vmem:[%s814_s1 + $0x8] sm:$0xff]  ;;  %v756_v55 = vld [vmem:[%s814_s1] sm:$0xff] }
  0x1e   : > { %v340_v1 = vsel %vm204_vm0, %v338_v57, %v339_v54  ;;  %v346_v3 = vrot.slane %v325_v58, 1  ;;  %v327_v4 = vmul.f32 %v191_v18, %v191_v18  ;;  %v328_v5 = vmul.f32 %v192_v23, %v192_v23 }
  0x1f   : > { %276 = vrot.lane.b32.xlu1 %v673_v49, %s595_s18  ;;  %v343_v6 = vrot.slane %v323_v59, 1  ;;  %v326_v0 = vmul.f32 %v190_v28, %v190_v28  ;;  %v369_v7 = vsel %vm232_vm1, %v366_v60, %v368_v61  ;;  %v360_v8 = vadd.f32 %v342_v62, %v321_v50 }
  0x20   : > { %274 = vrot.lane.b32.xlu0 %v677_v52, %s595_s18  ;;  %v359_v9 = vadd.f32 %v340_v1, %v320_v53  ;;  %v371_v10 = vrot.slane %v324_v56, 2  ;;  %v373_v11 = vrot.slane %v325_v58, 2  ;;  %v367_v12 = vsel %vm232_vm1, %v365_v63, %v366_v60 }
  0x21   : > { %v347_v13 = vsel %vm204_vm0, %v344_v2, %v346_v3  ;;  %v349_v14 = vrot.slane %v327_v4, 1  ;;  %v351_v15 = vrot.slane %v328_v5, 1  ;;  %v345_v16 = vsel %vm204_vm0, %v343_v6, %v344_v2 }
  0x22   : > { %v370_v17 = vrot.slane %v323_v59, 2  ;;  %v348_v18 = vrot.slane %v326_v0, 1  ;;  %v701_v19 = vadd.f32 %v369_v7, %v360_v8  ;;  %v703_v20 = vadd.f32 %v367_v12, %v359_v9 }
  0x23   : > { %292 = vrot.lane.b32.xlu1 %v665_v41, %s596_s19  ;;  %v362_v21 = vadd.f32 %v347_v13, %v324_v56  ;;  %v374_v22 = vsel %vm232_vm1, %v371_v10, %v373_v11  ;;  %v361_v23 = vadd.f32 %v345_v16, %v323_v59  ;;  %v352_v24 = vsel %vm204_vm0, %v349_v14, %v351_v15 }
  0x24   : > { %290 = vrot.lane.b32.xlu0 %v656_v33, %s596_s19  ;;  %v376_v25 = vrot.slane %v327_v4, 2  ;;  %v378_v26 = vrot.slane %v328_v5, 2  ;;  %v372_v27 = vsel %vm232_vm1, %v370_v17, %v371_v10  ;;  %v350_v28 = vsel %vm204_vm0, %v348_v18, %v349_v14 }
  0x25   : > { %v375_v30 = vrot.slane %v326_v0, 2  ;;  %v713_v31 = vadd.f32 %v374_v22, %v362_v21  ;;  %v364_v32 = vadd.f32 %v352_v24, %v327_v4  ;;  %v717_v34 = vadd.f32 %v372_v27, %v361_v23 }
  0x26   : > { %v379_v35 = vsel %vm232_vm1, %v376_v25, %v378_v26  ;;  %v363_v36 = vadd.f32 %v350_v28, %v326_v0 }
  0x27   : > { %296 = vrot.lane.b32.xlu1 %v661_v37, %s596_s19  ;;  %v377_v38 = vsel %vm232_vm1, %v375_v30, %v376_v25  ;;  %v723_v39 = vadd.f32 %v379_v35, %v364_v32 }
  0x28   : > { %294 = vrot.lane.b32.xlu0 %v653_v29, %s596_s19  ;;  %v727_v40 = vadd.f32 %v377_v38, %v363_v36 }
  0x2b   : > { %300 = vrot.lane.b32.xlu1 %v673_v49, %s596_s19 }
  0x2c   : > { %298 = vrot.lane.b32.xlu0 %v677_v52, %s596_s19 }
  0x2f   : > { %400 = vrot.lane.b32.xlu1 %v701_v19, %s595_s18 }
  0x30   : > { %398 = vrot.lane.b32.xlu0 %v703_v20, %s595_s18 }
  0x33   : > { %404 = vrot.lane.b32.xlu1 %v713_v31, %s595_s18 }
  0x34   : > { %402 = vrot.lane.b32.xlu0 %v717_v34, %s595_s18 }
  0x37   : > { %408 = vrot.lane.b32.xlu1 %v723_v39, %s595_s18 }
  0x38   : > { %406 = vrot.lane.b32.xlu0 %v727_v40, %s595_s18 }
  0x3b   : > { %424 = vrot.lane.b32.xlu1 %v701_v19, %s596_s19 }
  0x3c   : > { %422 = vrot.lane.b32.xlu0 %v703_v20, %s596_s19 }
  0x3f   : > { %428 = vrot.lane.b32.xlu1 %v713_v31, %s596_s19 }
  0x40   : > { %426 = vrot.lane.b32.xlu0 %v717_v34, %s596_s19 }
  0x43   : > { %432 = vrot.lane.b32.xlu1 %v723_v39, %s596_s19 }
  0x44   : > { %430 = vrot.lane.b32.xlu0 %v727_v40, %s596_s19 }
  0x89   : > { %v271_v42 = vpop.permute.xlu1 %270 }
  0x8a   : > { %v267_v43 = vpop.permute.xlu0 %266  ;;  %v286_v58 = vadd.f32 %v271_v42, %v653_v29 }
  0x8b   : > { %v284_v50 = vadd.f32 %v267_v43, %v656_v33 }
  0x8d   : > { %v273_v44 = vpop.permute.xlu1 %272 }
  0x8e   : > { %v269_v45 = vpop.permute.xlu0 %268 }
  0x8f   : > { %v285_v48 = vadd.f32 %v269_v45, %v665_v41  ;;  %v287_v41 = vadd.f32 %v273_v44, %v661_v37 }
  0x91   : > { %v277_v46 = vpop.permute.xlu1 %276 }
  0x92   : > { %v275_v47 = vpop.permute.xlu0 %274  ;;  %v289_v2 = vadd.f32 %v277_v46, %v673_v49 }
  0x93   : > { %v288_v37 = vadd.f32 %v275_v47, %v677_v52 }
  0x95   : > { %v293_v53 = vpop.permute.xlu1 %292 }
  0x96   : > { %v309_v54 = vadd.f32 %v293_v53, %v285_v48  ;;  %v291_v56 = vpop.permute.xlu0 %290 }
  0x97   : > { %v308_v33 = vadd.f32 %v291_v56, %v284_v50 }
  0x98   : > { %v315_v57 = vmul.f32 %v309_v54, %v751_v51 }
  0x99   : > { %v314_v59 = vmul.f32 %v308_v33, %v756_v55  ;;  %v297_v60 = vpop.permute.xlu1 %296 }
  0x9a   : > { %466 = vst.msk [vmem:[%s178_s27 + $0x8] sm:$0xff] %vm464_vm2, %v315_v57  ;;  %v311_v61 = vadd.f32 %v297_v60, %v287_v41  ;;  %v295_v62 = vpop.permute.xlu0 %294  ;;  %v453_v18 = vmul.f32 %v315_v57, %v315_v57 }
  0x9b   : > { %465 = vst.msk [vmem:[%s178_s27] sm:$0xff] %vm464_vm2, %v314_v59  ;;  %v310_v63 = vadd.f32 %v295_v62, %v286_v58  ;;  %v452_v23 = vmul.f32 %v314_v59, %v314_v59 }
  0x9c   : > { %v317_v1 = vmul.f32 %v311_v61, %v751_v51 }
  0x9d   : > { %v316_v3 = vmul.f32 %v310_v63, %v756_v55  ;;  %v301_v4 = vpop.permute.xlu1 %300 }
  0x9e   : > { %468 = vst.msk [vmem:[%s178_s27 + $0x18] sm:$0xff] %vm464_vm2, %v317_v1  ;;  %v313_v29 = vadd.f32 %v301_v4, %v289_v2  ;;  %v299_v5 = vpop.permute.xlu0 %298 }
  0x9f   : > { %467 = vst.msk [vmem:[%s178_s27 + $0x10] sm:$0xff] %vm464_vm2, %v316_v3  ;;  %v312_v6 = vadd.f32 %v299_v5, %v288_v37  ;;  %v454_v35 = vmul.f32 %v316_v3, %v316_v3 }
  0xa0   : > { %v319_v0 = vmul.f32 %v313_v29, %v751_v51 }
  0xa1   : > { %v318_v7 = vmul.f32 %v312_v6, %v756_v55  ;;  %v401_v8 = vpop.permute.xlu1 %400 }
  0xa2   : > { %470 = vst.msk [vmem:[%s178_s27 + $0x28] sm:$0xff] %vm464_vm2, %v319_v0  ;;  %v399_v49 = vpop.permute.xlu0 %398  ;;  %v417_v12 = vadd.f32 %v401_v8, %v701_v19  ;;  %v457_v47 = vmul.f32 %v319_v0, %v319_v0 }
  0xa3   : > { %469 = vst.msk [vmem:[%s178_s27 + $0x20] sm:$0xff] %vm464_vm2, %v318_v7  ;;  %v416_v13 = vadd.f32 %v399_v49, %v703_v20  ;;  %v456_v50 = vmul.f32 %v318_v7, %v318_v7 }
  0xa5   : > { %v405_v52 = vpop.permute.xlu1 %404 }
  0xa6   : > { %v403_v9 = vpop.permute.xlu0 %402  ;;  %v419_v21 = vadd.f32 %v405_v52, %v713_v31  ;;  %v455_v31 = vmul.f32 %v317_v1, %v317_v1 }
  0xa7   : > { %v418_v24 = vadd.f32 %v403_v9, %v717_v34 }
  0xa9   : > { %v409_v10 = vpop.permute.xlu1 %408 }
  0xaa   : > { %v407_v11 = vpop.permute.xlu0 %406  ;;  %v421_v32 = vadd.f32 %v409_v10, %v723_v39 }
  0xab   : > { %v420_v36 = vadd.f32 %v407_v11, %v727_v40 }
  0xad   : > { %v425_v14 = vpop.permute.xlu1 %424 }
  0xae   : > { %v441_v15 = vadd.f32 %v425_v14, %v417_v12  ;;  %v423_v16 = vpop.permute.xlu0 %422 }
  0xaf   : > { %v440_v17 = vadd.f32 %v423_v16, %v416_v13 }
  0xb0   : > { %v447_v22 = vmul.f32 %v441_v15, %v751_v51 }
  0xb1   : > { %v446_v19 = vmul.f32 %v440_v17, %v756_v55  ;;  %v429_v20 = vpop.permute.xlu1 %428 }
  0xb2   : > { %v459_v25 = vsub.f32 %v447_v22, %v453_v18  ;;  %v443_v26 = vadd.f32 %v429_v20, %v419_v21  ;;  %v427_v27 = vpop.permute.xlu0 %426 }
  0xb3   : > { %v458_v28 = vsub.f32 %v446_v19, %v452_v23  ;;  %v442_v30 = vadd.f32 %v427_v27, %v418_v24 }
  0xb4   : > { %472 = vst.msk [vmem:[%s789_s30 + $0x8] sm:$0xff] %vm464_vm2, %v459_v25  ;;  %v449_v34 = vmul.f32 %v443_v26, %v751_v51 }
  0xb5   : > { %471 = vst.msk [vmem:[%s789_s30] sm:$0xff] %vm464_vm2, %v458_v28  ;;  %v448_v38 = vmul.f32 %v442_v30, %v756_v55  ;;  %v433_v42 = vpop.permute.xlu1 %432 }
  0xb6   : > { %v461_v43 = vsub.f32 %v449_v34, %v455_v31  ;;  %v445_v44 = vadd.f32 %v433_v42, %v421_v32  ;;  %v431_v45 = vpop.permute.xlu0 %430 }
  0xb7   : > { %v460_v46 = vsub.f32 %v448_v38, %v454_v35  ;;  %v444_v39 = vadd.f32 %v431_v45, %v420_v36 }
  0xb8   : > { %474 = vst.msk [vmem:[%s789_s30 + $0x18] sm:$0xff] %vm464_vm2, %v461_v43  ;;  %v451_v48 = vmul.f32 %v445_v44, %v751_v51 }
  0xb9   : > { %473 = vst.msk [vmem:[%s789_s30 + $0x10] sm:$0xff] %vm464_vm2, %v460_v46  ;;  %v450_v40 = vmul.f32 %v444_v39, %v756_v55 }
  0xba   : > { %v463_v53 = vsub.f32 %v451_v48, %v457_v47 }
  0xbb   : > { %v462_v54 = vsub.f32 %v450_v40, %v456_v50 }
  0xbc   : > { %476 = vst.msk [vmem:[%s789_s30 + $0x28] sm:$0xff] %vm464_vm2, %v463_v53 }
  0xbd   : > { %475 = vst.msk [vmem:[%s789_s30 + $0x20] sm:$0xff] %vm464_vm2, %v462_v54 }
  0xbe PF: > { %s14_s12 = sadd.s32 1, %s593_s12  }
  0xbf   : > { %p11_p4 = scmp.ge.s32.totalorder %s14_s12, 4  }
  0xc1   :  { %13 = sbr.rel (!%p11_p4) target bundleno = 1 (0x1), region = 70 }

// kernel: isa_forward.9
= control target key start
LH: loop header
LB: loop body
LE: loop exit
PB: predicated region body
PF: predicated region fallthrough
CT: control target
= control target key end

     0   :  { %s762_s15 = smov 0   ;;  %s764_s16 = smov 0   ;;  %s920_s0 = inlined_call_operand.vmem [shape: f32[2,3,18,18], index: 0, kind: input, shape index: {}]   ;;  %s921_s1 = inlined_call_operand.vmem [shape: f32[2,8,18,18], index: 1, kind: input, shape index: {}]   ;;  %s922_s2 = inlined_call_operand.vmem [shape: f32[1,16,16], index: 2, kind: input, shape index: {}]   ;;  %s923_s3 = inlined_call_operand.vmem [shape: f32[2,8,16,16], index: 3, kind: output, shape index: {0}]   ;;  %s924_s4 = inlined_call_operand.vmem [shape: f32[2,8,3,16,16], index: 4, kind: output, shape index: {1}]  }
   0x1   :  { %s766_s17 = smov 0   ;;  %s768_s18 = smov 0  }
   0x2   :  { %s770_s19 = smov 0  }
   0x3 LB: > { %s24_s20 = sadd.s32 1, %s725_s17  ;;  %s27_s21 = sadd.s32 1, %s729_s18  ;;  %s733_s19 = sphi %s770_s19, %s15_s19   ;;  %s729_s18 = sphi %s768_s18, %s928_s18   ;;  %s725_s17 = sphi %s766_s17, %s927_s17   ;;  %s721_s16 = sphi %s764_s16, %s926_s16   ;;  %s717_s15 = sphi %s762_s15, %s925_s15  }
   0x4   : > { %p25_p0 = scmp.ge.s32.totalorder %s24_s20, 8  ;;  %p639_p1 = scmp.ge.s32.totalorder %s733_s19, 1 }
   0x5   : > { %p197_p2 = scmp.lt.s32.totalorder %s733_s19, 17 }
   0x6   : > { %s930_s20 = smov (%p25_p0, %s24_s20), 0  ;;  %s932_s21 = smov (!%p25_p0, %s27_s21), %s729_s18 }
   0x7   : > { %p198_p3 = pnand %p639_p1, %p197_p2  ;;  %p29_p4 = scmp.ge.s32.totalorder %s932_s21, 2 }
   0x8   : > { %p245_p5 = scmp.lt.s32.totalorder (!%p198_p3), %s721_s16, 1  ;;  %p252_p6 = scmp.lt.s32.totalorder (!%p198_p3), %s717_s15, 7 }
   0x9   : > { %s934_s21 = smov (%p29_p4, %s932_s21), 0  ;;  %201 = sbr.rel (%p198_p3) target bundleno = 178 (0xb2), region = 32 }
   0xa   : > { %s735_s10 = smov (!%p198_p3), 126   ;;  %s736_s11 = smov (!%p198_p3), 127  }
   0xe   : > { %s936_s16 = smov (!%p245_p5, %s721_s16), 1  ;;  %s938_s15 = smov (!%p252_p6, %s717_s15), 7  ;;  %vm294_vm0 = vcmask 1046528   ;;  %vm304_vm1 = vcmask 1045504   ;;  %vm334_vm2 = vcmask 130048  }
   0xf   : > { %s650_s22 = smul.u32 24, %s936_s16  ;;  %s642_s25 = sshll.u32 %s938_s15, 1 }
  0x10   : > { %s649_s23 = smul.u32 3, %s938_s15  ;;  %s643_s27 = sshll.u32 %s936_s16, 4 }
  0x11   : > { %s648_s24 = smul.u32 72, %s936_s16  ;;  %s812_s9 = sadd.s32 %s643_s27, %s642_s25 }
  0x12   : > { %s256_s26 = sadd.s32 %s650_s22, %s649_s23  ;;  %s651_s12 = smul.u32 6, %s938_s15 }
  0x13   : > { %s641_s28 = sshll.u32 %s256_s26, 3  ;;  %s804_s5 = scalar_lea.vmem %s920_s0, %s648_s24 }
  0x14   : > { %s258_s8 = scalar_lea.vmem %s921_s1, %s641_s28  ;;  %v277_v0 = vld [vmem:[%s804_s5] sm:$0xff]  ;;  %v278_v1 = vld [vmem:[%s804_s5 + $0x8] sm:$0xff]  ;;  %v279_v2 = vld [vmem:[%s804_s5 + $0x10] sm:$0x3]  ;;  %s652_s13 = smul.u32 48, %s936_s16 }
  0x15   : > { %v287_v3 = vld [vmem:[%s258_s8 + $0x8] sm:$0xff]  ;;  %v814_v4 = vld [vmem:[%s258_s8 + $0x10] sm:$0x3]  ;;  %v286_v5 = vld [vmem:[%s258_s8] sm:$0xff]  ;;  %s644_s15 = sshll.u32 %s812_s9, 3 }
  0x16   : > { %v296_v6 = vrot.slane %v287_v3, 1  ;;  %v298_v7 = vrot.slane %v814_v4, 1  ;;  %v306_v8 = vrot.slane %v287_v3, 2  ;;  %v308_v9 = vrot.slane %v814_v4, 2  ;;  %v280_v10 = vld [vmem:[%s804_s5 + $0x18] sm:$0xff]  ;;  %v281_v18 = vld [vmem:[%s804_s5 + $0x20] sm:$0xff]  ;;  %s858_s14 = sadd.s32 %s652_s13, %s651_s12  ;;  %s267_s25 = scalar_lea.vmem %s923_s3, %s644_s15 }
  0x17   : > { %v295_v11 = vrot.slane %v286_v5, 1  ;;  %v305_v12 = vrot.slane %v286_v5, 2  ;;  %v337_v13 = vmul.f32 %v286_v5, %v277_v0  ;;  %v338_v14 = vmul.f32 %v287_v3, %v278_v1  ;;  %v282_v32 = vld [vmem:[%s804_s5 + $0x28] sm:$0x3]  ;;  %v283_v37 = vld [vmem:[%s804_s5 + $0x30] sm:$0xff]  ;;  %v284_v38 = vld [vmem:[%s804_s5 + $0x38] sm:$0xff] }
  0x18   : > { %v299_v15 = vsel %vm294_vm0, %v296_v6, %v298_v7  ;;  %v309_v16 = vsel %vm304_vm1, %v306_v8, %v308_v9  ;;  %v339_v17 = vmul.f32 %v814_v4, %v279_v2  ;;  %v340_v19 = vmul.f32 %v286_v5, %v280_v10  ;;  %v285_v51 = vld [vmem:[%s804_s5 + $0x40] sm:$0x3]  ;;  %s645_s28 = sshll.u32 %s858_s14, 3 }
  0x19   : > { %v303_v20 = vadd.f32 %v299_v15, %v287_v3  ;;  %v297_v21 = vsel %vm294_vm0, %v295_v11, %v296_v6  ;;  %v307_v22 = vsel %vm304_vm1, %v305_v12, %v306_v8  ;;  %v355_v23 = vrot.slane %v337_v13, 1  ;;  %s276_s5 = scalar_lea.vmem %s924_s4, %s645_s28 }
  0x1a   : > { %v302_v24 = vadd.f32 %v297_v21, %v286_v5  ;;  %v356_v25 = vrot.slane %v338_v14, 1  ;;  %v382_v26 = vrot.slane %v337_v13, 2  ;;  %v383_v27 = vrot.slane %v338_v14, 2 }
  0x1b   : > { %v825_v28 = vadd.f32 %v309_v16, %v303_v20  ;;  %v358_v29 = vrot.slane %v339_v17, 1  ;;  %v385_v30 = vrot.slane %v339_v17, 2  ;;  %v341_v31 = vmul.f32 %v287_v3, %v281_v18  ;;  %v290_v18 = vld [vmem:[%s922_s2 + $0x8] sm:$0xff] }
  0x1c   : > { %v828_v33 = vadd.f32 %v307_v22, %v302_v24  ;;  %v357_v34 = vsel %vm294_vm0, %v355_v23, %v356_v25  ;;  %v384_v35 = vsel %vm304_vm1, %v382_v26, %v383_v27  ;;  %v360_v36 = vrot.slane %v340_v19, 1  ;;  %v289_v22 = vld [vmem:[%s922_s2] sm:$0xff] }
  0x1d   : > { %326 = vrot.lane.b32.xlu1 %v825_v28, %s735_s10  ;;  %v376_v39 = vadd.f32 %v357_v34, %v337_v13  ;;  %v359_v40 = vsel %vm294_vm0, %v356_v25, %v358_v29  ;;  %v386_v41 = vsel %vm304_vm1, %v383_v27, %v385_v30  ;;  %v361_v42 = vrot.slane %v341_v31, 1 }
  0x1e   : > { %316 = vrot.lane.b32.xlu0 %v828_v33, %s736_s11  ;;  %v377_v43 = vadd.f32 %v359_v40, %v338_v14  ;;  %v387_v44 = vrot.slane %v340_v19, 2  ;;  %v388_v45 = vrot.slane %v341_v31, 2  ;;  %v342_v46 = vmul.f32 %v814_v4, %v282_v32 }
  0x1f   : > { %v841_v47 = vadd.f32 %v384_v35, %v376_v39  ;;  %v362_v48 = vsel %vm294_vm0, %v360_v36, %v361_v42  ;;  %v343_v49 = vmul.f32 %v286_v5, %v283_v37  ;;  %v344_v50 = vmul.f32 %v287_v3, %v284_v38 }
  0x20   : > { %v845_v52 = vadd.f32 %v386_v41, %v377_v43  ;;  %v363_v53 = vrot.slane %v342_v46, 1  ;;  %v378_v54 = vadd.f32 %v362_v48, %v340_v19  ;;  %v390_v55 = vrot.slane %v342_v46, 2 }
  0x21   : > { %415 = vrot.lane.b32.xlu1 %v841_v47, %s736_s11  ;;  %v365_v56 = vrot.slane %v343_v49, 1  ;;  %v366_v57 = vrot.slane %v344_v50, 1  ;;  %v389_v58 = vsel %vm304_vm1, %v387_v44, %v388_v45  ;;  %v393_v60 = vrot.slane %v344_v50, 2 }
  0x22   : > { %318 = vrot.lane.b32.xlu0 %v825_v28, %s736_s11  ;;  %v364_v59 = vsel %vm294_vm0, %v361_v42, %v363_v53  ;;  %v345_v61 = vmul.f32 %v814_v4, %v285_v51  ;;  %v391_v63 = vsel %vm304_vm1, %v388_v45, %v390_v55  ;;  %v392_v1 = vrot.slane %v343_v49, 2 }
  0x23   : > { %v379_v62 = vadd.f32 %v364_v59, %v341_v31  ;;  %v367_v0 = vsel %vm294_vm0, %v365_v56, %v366_v57  ;;  %v405_v6 = vadd.f32 %v389_v58, %v378_v54 }
  0x24   : > { %v368_v2 = vrot.slane %v345_v61, 1  ;;  %v395_v3 = vrot.slane %v345_v61, 2  ;;  %v380_v4 = vadd.f32 %v367_v0, %v343_v49  ;;  %v394_v9 = vsel %vm304_vm1, %v392_v1, %v393_v60 }
  0x25   : > { %417 = vrot.lane.b32.xlu1 %v845_v52, %s736_s11  ;;  %v406_v5 = vadd.f32 %v391_v63, %v379_v62 }
  0x26   : > { %324 = vrot.lane.b32.xlu0 %v828_v33, %s735_s10  ;;  %v369_v7 = vsel %vm294_vm0, %v366_v57, %v368_v2  ;;  %v396_v8 = vsel %vm304_vm1, %v393_v60, %v395_v3  ;;  %v407_v12 = vadd.f32 %v394_v9, %v380_v4 }
  0x27   : > { %v381_v10 = vadd.f32 %v369_v7, %v344_v50 }
  0x29   : > { %421 = vrot.lane.b32.xlu1 %v406_v5, %s736_s11  ;;  %v408_v11 = vadd.f32 %v396_v8, %v381_v10 }
  0x2a   : > { %419 = vrot.lane.b32.xlu0 %v405_v6, %s736_s11 }
  0x2d   : > { %425 = vrot.lane.b32.xlu1 %v408_v11, %s736_s11 }
  0x2e   : > { %423 = vrot.lane.b32.xlu0 %v407_v12, %s736_s11 }
  0x31   : > { %441 = vrot.lane.b32.xlu1 %v845_v52, %s735_s10 }
  0x32   : > { %439 = vrot.lane.b32.xlu0 %v841_v47, %s735_s10 }
  0x35   : > { %445 = vrot.lane.b32.xlu1 %v406_v5, %s735_s10 }
  0x36   : > { %443 = vrot.lane.b32.xlu0 %v405_v6, %s735_s10 }
  0x39   : > { %449 = vrot.lane.b32.xlu1 %v408_v11, %s735_s10 }
  0x3a   : > { %447 = vrot.lane.b32.xlu0 %v407_v12, %s735_s10 }
  0x8f   : > { %v327_v13 = vpop.permute.xlu1 %326 }
  0x90   : > { %v317_v14 = vpop.permute.xlu0 %316 }
  0x91   : > { %v322_v19 = vadd.f32 %v317_v14, %v828_v33 }
  0x93   : > { %v416_v15 = vpop.permute.xlu1 %415 }
  0x94   : > { %v319_v16 = vpop.permute.xlu0 %318  ;;  %v433_v32 = vadd.f32 %v416_v15, %v841_v47 }
  0x95   : > { %v323_v17 = vadd.f32 %v319_v16, %v825_v28 }
  0x97   : > { %v331_v20 = vadd.f32 %v327_v13, %v323_v17  ;;  %v418_v21 = vpop.permute.xlu1 %417 }
  0x98   : > { %v325_v23 = vpop.permute.xlu0 %324  ;;  %v434_v31 = vadd.f32 %v418_v21, %v845_v52 }
  0x99   : > { %v333_v24 = vmul.f32 %v331_v20, %v290_v18  ;;  %v330_v25 = vadd.f32 %v325_v23, %v322_v19 }
  0x9b   : > { %336 = vst.msk [vmem:[%s267_s25 + $0x8] sm:$0xff] %vm334_vm2, %v333_v24  ;;  %v332_v26 = vmul.f32 %v330_v25, %v289_v22  ;;  %v422_v27 = vpop.permute.xlu1 %421 }
  0x9c   : > { %v420_v28 = vpop.permute.xlu0 %419  ;;  %v436_v37 = vadd.f32 %v422_v27, %v406_v5 }
  0x9d   : > { %335 = vst.msk [vmem:[%s267_s25] sm:$0xff] %vm334_vm2, %v332_v26  ;;  %v435_v39 = vadd.f32 %v420_v28, %v405_v6 }
  0x9f   : > { %v426_v29 = vpop.permute.xlu1 %425 }
  0xa0   : > { %v424_v30 = vpop.permute.xlu0 %423  ;;  %v438_v45 = vadd.f32 %v426_v29, %v408_v11 }
  0xa1   : > { %v437_v47 = vadd.f32 %v424_v30, %v407_v12 }
  0xa3   : > { %v442_v33 = vpop.permute.xlu1 %441 }
  0xa4   : > { %v440_v34 = vpop.permute.xlu0 %439  ;;  %v458_v35 = vadd.f32 %v442_v33, %v434_v31 }
  0xa5   : > { %v457_v36 = vadd.f32 %v440_v34, %v433_v32 }
  0xa6   : > { %v464_v38 = vmul.f32 %v458_v35, %v290_v18 }
  0xa7   : > { %v463_v40 = vmul.f32 %v457_v36, %v289_v22  ;;  %v446_v41 = vpop.permute.xlu1 %445 }
  0xa8   : > { %470 = vst.msk [vmem:[%s276_s5 + $0x8] sm:$0xff] %vm334_vm2, %v464_v38  ;;  %v444_v42 = vpop.permute.xlu0 %443  ;;  %v460_v43 = vadd.f32 %v446_v41, %v436_v37 }
  0xa9   : > { %469 = vst.msk [vmem:[%s276_s5] sm:$0xff] %vm334_vm2, %v463_v40  ;;  %v459_v44 = vadd.f32 %v444_v42, %v435_v39 }
  0xaa   : > { %v466_v46 = vmul.f32 %v460_v43, %v290_v18 }
  0xab   : > { %v465_v48 = vmul.f32 %v459_v44, %v289_v22  ;;  %v450_v49 = vpop.permute.xlu1 %449 }
  0xac   : > { %472 = vst.msk [vmem:[%s276_s5 + $0x18] sm:$0xff] %vm334_vm2, %v466_v46  ;;  %v448_v50 = vpop.permute.xlu0 %447  ;;  %v462_v51 = vadd.f32 %v450_v49, %v438_v45 }
  0xad   : > { %471 = vst.msk [vmem:[%s276_s5 + $0x10] sm:$0xff] %vm334_vm2, %v465_v48  ;;  %v461_v52 = vadd.f32 %v448_v50, %v437_v47 }
  0xae   : > { %v468_v53 = vmul.f32 %v462_v51, %v290_v18 }
  0xaf   : > { %v467_v54 = vmul.f32 %v461_v52, %v289_v22 }
  0xb0   : > { %474 = vst.msk [vmem:[%s276_s5 + $0x28] sm:$0xff] %vm334_vm2, %v468_v53 }
  0xb1   : > { %473 = vst.msk [vmem:[%s276_s5 + $0x20] sm:$0xff] %vm334_vm2, %v467_v54 }
  0xb2 PF: > { %s15_s19 = sadd.s32 1, %s733_s19   ;;  %s925_s15 = smov %s725_s17 }
  0xb3   : > { %p12_p7 = scmp.ge.s32.totalorder %s15_s19, 18   ;;  %s926_s16 = smov %s729_s18 }
  0xb4   : > { %s927_s17 = smov %s930_s20  ;;  %s928_s18 = smov %s934_s21 }
  0xb5   :  { %14 = sbr.rel (!%p12_p7) target bundleno = 3 (0x3), region = 77 }

// kernel: isa_forward.10
= control target key start
LH: loop header
LB: loop body
LE: loop exit
PB: predicated region body
PF: predicated region fallthrough
CT: control target
= control target key end

     0   :  { %s1200_s27 = smov 0   ;;  %s1202_s28 = smov 0   ;;  %s1307_s0 = inlined_call_operand.vmem [shape: f32[2,8,3,256], index: 0, kind: input, shape index: {}]   ;;  %s1308_s1 = inlined_call_operand.vmem [shape: f32[2,8,1,256], index: 1, kind: input, shape index: {}]   ;;  %s1309_s2 = inlined_call_operand.vmem [shape: f32[2,3,256], index: 2, kind: input, shape index: {}]   ;;  %s1310_s3 = inlined_call_operand.vmem [shape: f32[2,3,256], index: 3, kind: input, shape index: {}]   ;;  %s1311_s4 = inlined_call_operand.vmem [shape: f32[8,3,1], index: 4, kind: output, shape index: {0}]   ;;  %s1312_s5 = inlined_call_operand.vmem [shape: f32[8,3,1], index: 5, kind: output, shape index: {1}]   ;;  %s1313_s6 = inlined_call_operand.vmem [shape: f32[8,3,3], index: 6, kind: output, shape index: {2}]   ;;  %s1314_s7 = inlined_call_operand.vmem [shape: f32[8,3,3], index: 7, kind: output, shape index: {3}]   ;;  %s1315_s8 = inlined_call_operand.vmem [shape: f32[8,3,3], index: 8, kind: output, shape index: {4}]  }
   0x1   :  { %s1204_s29 = smov 0   ;;  %s1206_s30 = smov 0  }
   0x2   :  { %s1208_s9 = smov 0  }
   0x3 LB: > { %1319 = sst [smem:[#allocation2_spill]] %s1144_s29  ;;  %s34_s10 = sadd.s32 1, %s1144_s29  ;;  %s1152_s9 = sphi %s1208_s9, %s19_s9   ;;  %s1148_s30 = sphi %s1206_s30, %s1328_s30   ;;  %s1144_s29 = sphi %s1204_s29, %s1327_s29   ;;  %s1140_s28 = sphi %s1202_s28, %s1326_s28   ;;  %s1136_s27 = sphi %s1200_s27, %s1325_s27  }
   0x4   : > { %1320 = sst [smem:[#allocation3_spill]] %s1148_s30  ;;  %s38_s11 = sadd.s32 1, %s1148_s30 }
   0x5   : > { %1321 = sst [smem:[#allocation4_spill]] %s1152_s9  ;;  %p36_p0 = scmp.ge.s32.totalorder %s34_s10, 2 }
   0x6   : > { %p1051_p1 = scmp.ge.s32.totalorder %s1152_s9, 1  ;;  %p359_p2 = scmp.lt.s32.totalorder %s1152_s9, 17 }
   0x7   : > { %s1330_s10 = smov (%p36_p0, %s34_s10), 0  ;;  %s1332_s11 = smov (!%p36_p0, %s38_s11), %s1148_s30 }
   0x8   : > { %1322 = sst [smem:[#allocation5_spill]] %s1330_s10  ;;  %p360_p3 = pnand %p1051_p1, %p359_p2 }
   0x9   : > { %p40_p4 = scmp.ge.s32.totalorder %s1332_s11, 8  ;;  %p447_p5 = scmp.lt.s32.totalorder (!%p360_p3), %s1136_s27, 1 }
   0xa   : > { %363 = sbr.rel (%p360_p3) target bundleno = 249 (0xf9), region = 36  ;;  %p449_p6 = scmp.lt.s32.totalorder (!%p360_p3), %s1140_s28, 7 }
   0xb   : > { %s1334_s11 = smov (%p40_p4, %s1332_s11), 0  ;;  %p513_p7 = scmp.eq.s32.totalorder (!%p360_p3), %s1136_s27, 0 }
   0xc   : > { %1323 = sst [smem:[#allocation6_spill]] %s1334_s11 }
   0xf   : > { %s448_s12 = scalar_select %p447_p5, %s1136_s27, 1  ;;  %vm519_vm0 = vcmask (%p513_p7), 2048   ;;  %vm522_vm1 = vcmask (%p513_p7), 18432   ;;  %v1154_v0 = vmov (%p513_p7), 0.0  }
  0x10   : > { %s1336_s28 = smov (!%p449_p6, %s1140_s28), 7 }
  0x11   : > { %s1053_s13 = sshll.u32 %s448_s12, 4  ;;  %s1069_s14 = sshll.u32 %s448_s12, 3 }
  0x12   : > { %s1052_s15 = sshll.u32 %s1336_s28, 1  ;;  %s1238_s18 = scalar_lea.vmem %s1309_s2, %s1069_s14 }
  0x13   : > { %s456_s19 = sadd.s32 %s1053_s13, %s1052_s15  ;;  %s491_s22 = scalar_lea.vmem %s1310_s3, %s1069_s14 }
  0x14   : > { %s1054_s23 = sshll.u32 %s456_s19, 2  ;;  %s471_s26 = scalar_lea.vmem %s1308_s1, %s456_s19 }
  0x15   : > { %s458_s12 = scalar_lea.vmem %s1307_s0, %s1054_s23  ;;  %s1061_s30 = sshll.u32 %s1336_s28, 2 }
  0x16   : > { %s1252_s16 = scalar_lea.vmem %s1311_s4, %s1061_s30  ;;  %s1257_s17 = scalar_lea.vmem %s1312_s5, %s1061_s30 }
  0x17   : > { %s1262_s21 = scalar_lea.vmem %s1313_s6, %s1061_s30  ;;  %s1267_s10 = scalar_lea.vmem %s1314_s7, %s1061_s30  ;;  %520 = vst.msk [vmem:[%s1252_s16] sm:$0x7] (%p513_p7), %vm519_vm0, %v1154_v0  ;;  %521 = vst.msk [vmem:[%s1257_s17] sm:$0x7] (%p513_p7), %vm519_vm0, %v1154_v0 }
  0x18   : > { %s1272_s29 = scalar_lea.vmem %s1315_s8, %s1061_s30  ;;  %518 = sbr.rel (!%p513_p7) target bundleno = 29 (0x1d), region = 40  ;;  %523 = vst.msk [vmem:[%s1262_s21] sm:$0x7] (%p513_p7), %vm522_vm1, %v1154_v0  ;;  %524 = vst.msk [vmem:[%s1267_s10] sm:$0x7] (%p513_p7), %vm522_vm1, %v1154_v0 }
  0x19   : > { %525 = vst.msk [vmem:[%s1272_s29] sm:$0x7] (%p513_p7), %vm522_vm1, %v1154_v0 }
  0x1d PF: > { %v531_v1 = vlaneseq  ;;  %v529_v2 = vld [vmem:[%s491_s22] sm:$0x77]  ;;  %vm547_vm2 = vcmask 1042432   ;;  %vm554_vm3 = vcmask 2048   ;;  %vm639_vm4 = vcmask 18432  }
  0x1e   : > { %v558_v4 = vcombine.high %v529_v2, %v529_v2  ;;  %v527_v5 = vld [vmem:[%s471_s26] sm:$0x3]  ;;  %v560_v18 = vsel %vm547_vm2, %v529_v2, 0.0 }
  0x1f   : > { %v532_v3 = vshrl.u32 %v531_v1, 7  ;;  %v528_v10 = vld [vmem:[%s1238_s18] sm:$0x77] }
  0x20   : > { %672 = vmatprep.subr.mxu1 %v558_v4  ;;  %v526_v12 = vld [vmem:[%s458_s12] sm:$0x77]  ;;  %v561_v19 = vsel %vm547_vm2, %v558_v4, 0.0 }
  0x21   : > { %v533_v6 = vsub.s32 0, %v532_v3  ;;  %v537_v7 = vsub.s32 1, %v532_v3  ;;  %673 = vmatpush1.xpose.msra.mxu1 %v529_v2  ;;  %v562_v21 = vadd.f32 %v561_v19, %v560_v18  ;;  %v543_v22 = vld [vmem:[%s1252_s16] sm:$0x7] }
  0x22   : > { %v556_v25 = vld [vmem:[%s1257_s17] sm:$0x7] }
  0x23   : > { %v534_v8 = vrot.slane %v527_v5, %v533_v6  ;;  %v538_v9 = vrot.slane %v527_v5, %v537_v7  ;;  %v641_v28 = vld [vmem:[%s1267_s10] sm:$0x7] }
  0x24   : > { %v567_v29 = vld [vmem:[%s1262_s21] sm:$0x7] }
  0x25   : > { %v539_v11 = vcombine.low %v534_v8, %v538_v9  ;;  %v714_v36 = vld [vmem:[%s1272_s29] sm:$0x7] }
  0x27   : > { %v541_v13 = vmul.f32 %v539_v11, %v528_v10 }
  0x29   : > { %v542_v14 = vsub.f32 %v526_v12, %v541_v13 }
  0x2b   : > { %v545_v15 = vcombine.high %v542_v14, %v542_v14  ;;  %v548_v16 = vsel %vm547_vm2, %v542_v14, 0.0 }
  0x2d   : > { %598 = vmatprep.subr.mxu0 %v545_v15  ;;  %632 = vmatprep.mubr.f32.mxu0 %v545_v15  ;;  %v549_v17 = vsel %vm547_vm2, %v545_v15, 0.0 }
  0x2e   : > { %599 = vmatpush1.xpose.msra.mxu0 %v542_v14  ;;  %706 = vmatprep.mubr.f32.mxu1 %v545_v15  ;;  %v550_v20 = vadd.f32 %v549_v17, %v548_v16 }
  0x2f   : > { %745 = vmatprep.subr.mxu0 %v558_v4  ;;  %707 = vmatmul.mubr.f32.vlgmr.msra.gmra.mxu1 %v542_v14 }
  0x30   : > { %551 = vadd.xlane.f32.xlu0 %v550_v20 }
  0x31   : > { %633 = vmatmul.mubr.f32.vlgmr.msra.gmra.mxu0 %v542_v14 }
  0x32   : > { %746 = vmatpush1.xpose.msra.mxu0 %v529_v2  ;;  %779 = vmatprep.mubr.f32.mxu0 %v558_v4 }
  0x34   : > { %563 = vadd.xlane.f32.xlu0 %v562_v21 }
  0x35   : > { %780 = vmatmul.mubr.f32.vlgmr.msra.gmra.mxu0 %v529_v2 }
  0xb9   : > { %v552_v23 = vpop.xlane.xlu0 %551 }
  0xba   : > { %v553_v24 = vadd.f32 %v552_v23, %v543_v22 }
  0xbc   : > { %555 = vst.msk [vmem:[%s1252_s16] sm:$0x7] %vm554_vm3, %v553_v24 }
  0xbd   : > { %v564_v26 = vpop.xlane.xlu0 %563 }
  0xbe   : > { %v565_v27 = vadd.f32 %v564_v26, %v556_v25 }
  0xc0   : > { %566 = vst.msk [vmem:[%s1257_s17] sm:$0x7] %vm554_vm3, %v565_v27 }
  0xef   : > { %v708_v30 = vpop.f32.mrf.mxu1 }
  0xf0   : > { %v712_v31 = vadd.f32 %v708_v30, %v641_v28 }
  0xf1   : > { %v634_v32 = vpop.f32.mrf.mxu0  ;;  %v710_v33 = vpop.f32.mrf.mxu1 }
  0xf2   : > { %v638_v34 = vadd.f32 %v634_v32, %v567_v29  ;;  %713 = vst.msk [vmem:[%s1267_s10] sm:$0x7] %vm639_vm4, %v712_v31 }
  0xf3   : > { %v636_v35 = vpop.f32.mrf.mxu0 }
  0xf4   : > { %640 = vst.msk [vmem:[%s1262_s21] sm:$0x7] %vm639_vm4, %v638_v34 }
  0xf5   : > { %v781_v37 = vpop.f32.mrf.mxu0 }
  0xf6   : > { %v785_v38 = vadd.f32 %v781_v37, %v714_v36 }
  0xf7   : > { %v783_v39 = vpop.f32.mrf.mxu0 }
  0xf8   : > { %786 = vst.msk [vmem:[%s1272_s29] sm:$0x7] %vm639_vm4, %v785_v38 }
  0xf9 PF: > { %s1324_s27 = sld [smem:[#allocation4_spill]] }
  0xfa   : > { %s1326_s28 = sld [smem:[#allocation3_spill]] }
  0xfb   : > { %s1327_s29 = sld [smem:[#allocation5_spill]] }
  0xfc   : > { %s1328_s30 = sld [smem:[#allocation6_spill]] }
  0xff   : > { %s19_s9 = sadd.s32 1, %s1324_s27   ;;  %s1325_s27 = sld [smem:[#allocation2_spill]] }
 0x100   : > { %p16_p8 = scmp.ge.s32.totalorder %s19_s9, 18  }
 0x102   :  { %18 = sbr.rel (!%p16_p8) target bundleno = 3 (0x3), region = 127 }

// kernel: isa_forward.11
= control target key start
LH: loop header
LB: loop body
LE: loop exit
PB: predicated region body
PF: predicated region fallthrough
CT: control target
= control target key end

     0   :  { %s1363_s27 = smov 0   ;;  %s1365_s28 = smov 0   ;;  %s1519_s0 = inlined_call_operand.vmem [shape: f32[2,8,3,256], index: 0, kind: input, shape index: {}]   ;;  %s1520_s1 = inlined_call_operand.vmem [shape: f32[2,8,1,256], index: 1, kind: input, shape index: {}]   ;;  %s1521_s2 = inlined_call_operand.vmem [shape: f32[2,3,256], index: 2, kind: input, shape index: {}]   ;;  %s1522_s3 = inlined_call_operand.vmem [shape: f32[2,3,256], index: 3, kind: input, shape index: {}]   ;;  %s1523_s4 = inlined_call_operand.vmem [shape: f32[8,32,3], index: 4, kind: input, shape index: {}]   ;;  %s1524_s5 = inlined_call_operand.vmem [shape: f32[8,32,3], index: 5, kind: input, shape index: {}]   ;;  %s1525_s6 = inlined_call_operand.vmem [shape: f32[8,32,1], index: 6, kind: input, shape index: {}]   ;;  %s1526_s7 = inlined_call_operand.vmem [shape: f32[8,32,1], index: 7, kind: output, shape index: {0}]   ;;  %s1527_s8 = inlined_call_operand.vmem [shape: f32[8,32,32], index: 8, kind: output, shape index: {1}]  }
   0x1   :  { %1528 = sst [smem:[#allocation4_spill]] %s1521_s2  ;;  %s1367_s29 = smov 0  }
   0x2   :  { %1529 = sst [smem:[#allocation5_spill]] %s1522_s3  ;;  %s1369_s30 = smov 0  }
   0x3   :  { %s1371_s9 = smov 0  }
   0x4 LB: > { %s34_s10 = sadd.s32 1, %s1305_s29  ;;  %s38_s11 = sadd.s32 1, %s1309_s30  ;;  %s1313_s9 = sphi %s1371_s9, %s19_s9   ;;  %s1309_s30 = sphi %s1369_s30, %s1539_s30   ;;  %s1305_s29 = sphi %s1367_s29, %s1538_s29   ;;  %s1301_s28 = sphi %s1365_s28, %s1537_s28   ;;  %s1297_s27 = sphi %s1363_s27, %s1536_s27  }
   0x5   : > { %p36_p0 = scmp.ge.s32.totalorder %s34_s10, 2  ;;  %p1178_p1 = scmp.ge.s32.totalorder %s1313_s9, 1 }
   0x6   : > { %p383_p2 = scmp.lt.s32.totalorder %s1313_s9, 17 }
   0x7   : > { %s1541_s10 = smov (%p36_p0, %s34_s10), 0  ;;  %s1543_s11 = smov (!%p36_p0, %s38_s11), %s1309_s30 }
   0x8   : > { %1530 = sst [smem:[#allocation2_spill]] %s1541_s10  ;;  %p384_p3 = pnand %p1178_p1, %p383_p2 }
   0x9   : > { %p40_p4 = scmp.ge.s32.totalorder %s1543_s11, 8  ;;  %p476_p5 = scmp.lt.s32.totalorder (!%p384_p3), %s1297_s27, 1 }
   0xa   : > { %387 = sbr.rel (%p384_p3) target bundleno = 476 (0x1dc), region = 48  ;;  %p478_p6 = scmp.lt.s32.totalorder (!%p384_p3), %s1301_s28, 7 }
   0xb   : > { %s1545_s11 = smov (%p40_p4, %s1543_s11), 0  ;;  %p547_p7 = scmp.eq.s32.totalorder (!%p384_p3), %s1297_s27, 0 }
   0xc   : > { %1531 = sst [smem:[#allocation3_spill]] %s1545_s11 }
   0xd   : > { %s1532_s2 = sld [smem:[#allocation4_spill]] (!%p384_p3) }
   0xe   : > { %s1533_s3 = sld [smem:[#allocation5_spill]] (!%p384_p3) }
   0xf   : > { %s477_s12 = scalar_select %p476_p5, %s1297_s27, 1  ;;  %vm553_vm0 = vcmask (%p547_p7), 7168   ;;  %vm558_vm1 = vcmask (%p547_p7), 261120   ;;  %v1315_v0 = vmov (%p547_p7), 0.0  }
  0x10   : > { %s1547_s28 = smov (!%p478_p6, %s1301_s28), 7 }
  0x11   : > { %s1180_s13 = sshll.u32 %s477_s12, 4  ;;  %s1213_s14 = sshll.u32 %s477_s12, 3 }
  0x12   : > { %s1179_s15 = sshll.u32 %s1547_s28, 1  ;;  %s1215_s16 = sshll.u32 %s1547_s28, 5 }
  0x13   : > { %s1401_s18 = scalar_lea.vmem %s1532_s2, %s1213_s14  ;;  %s1403_s19 = sadd.s32 %s1180_s13, %s1179_s15 }
  0x14   : > { %s520_s22 = scalar_lea.vmem %s1533_s3, %s1213_s14  ;;  %s1181_s23 = sshll.u32 %s1403_s19, 2 }
  0x15   : > { %s500_s26 = scalar_lea.vmem %s1520_s1, %s1403_s19  ;;  %s1416_s10 = scalar_lea.vmem %s1519_s0, %s1181_s23 }
  0x16   : > { %s1421_s15 = scalar_lea.vmem %s1523_s4, %s1215_s16  ;;  %s1426_s14 = scalar_lea.vmem %s1524_s5, %s1215_s16 }
  0x17   : > { %s1431_s24 = scalar_lea.vmem %s1525_s6, %s1215_s16  ;;  %s1436_s23 = scalar_lea.vmem %s1526_s7, %s1215_s16 }
  0x18   : > { %s1441_s17 = scalar_lea.vmem %s1527_s8, %s1215_s16  ;;  %552 = sbr.rel (!%p547_p7) target bundleno = 29 (0x1d), region = 52  ;;  %554 = vst.msk [vmem:[%s1436_s23] sm:$0xff] (%p547_p7), %vm553_vm0, %v1315_v0  ;;  %555 = vst.msk [vmem:[%s1436_s23 + $0x8] sm:$0xff] (%p547_p7), %vm553_vm0, %v1315_v0 }
  0x19   : > { %556 = vst.msk [vmem:[%s1436_s23 + $0x10] sm:$0xff] (%p547_p7), %vm553_vm0, %v1315_v0  ;;  %557 = vst.msk [vmem:[%s1436_s23 + $0x18] sm:$0xff] (%p547_p7), %vm553_vm0, %v1315_v0 }
  0x1a   : > { %559 = vst.msk [vmem:[%s1441_s17] sm:$0xff] (%p547_p7), %vm558_vm1, %v1315_v0  ;;  %560 = vst.msk [vmem:[%s1441_s17 + $0x8] sm:$0xff] (%p547_p7), %vm558_vm1, %v1315_v0 }
  0x1b   : > { %561 = vst.msk [vmem:[%s1441_s17 + $0x10] sm:$0xff] (%p547_p7), %vm558_vm1, %v1315_v0  ;;  %562 = vst.msk [vmem:[%s1441_s17 + $0x18] sm:$0xff] (%p547_p7), %vm558_vm1, %v1315_v0 }
  0x1d PF: > { %v566_v1 = vld [vmem:[%s520_s22] sm:$0x77]  ;;  %vm603_vm2 = vcmask 1042432   ;;  %v568_v2 = vlaneseq  ;;  %v1316_v4 = vmov 0.0   ;;  %vm590_vm3 = vcmask 23552   ;;  %v805_v11 = vld [vmem:[%s1431_s24 + $0x8] sm:$0xff] }
  0x1e   : > { %v589_v3 = vcombine.high %v566_v1, %v566_v1  ;;  %672 = vmatprep.mubr.f32.mxu0 %v1316_v4  ;;  %779 = vmatprep.mubr.f32.mxu1 %v1316_v4  ;;  %v584_v5 = vld [vmem:[%s1426_s14] sm:$0xff]  ;;  %v1317_v8 = vmov 0   ;;  %v807_v12 = vld [vmem:[%s1431_s24 + $0x18] sm:$0xff]  ;;  %v585_v15 = vld [vmem:[%s1426_s14 + $0x8] sm:$0xff]  ;;  %vm864_vm4 = vcmask 7168   ;;  %vm962_vm5 = vcmask 261120  }
  0x1f   : > { %v569_v6 = vshrl.u32 %v568_v2, 7  ;;  %v564_v7 = vld [vmem:[%s500_s26] sm:$0x3]  ;;  %1273 = vset.pattern.permute.xlu1 %v1317_v8  ;;  %1272 = vset.pattern.permute.xlu0 %v1317_v8  ;;  %v806_v18 = vld [vmem:[%s1431_s24 + $0x10] sm:$0xff]  ;;  %v587_v25 = vld [vmem:[%s1426_s14 + $0x18] sm:$0xff] }
  0x20   : > { %1199 = vmatprep.subr.msk.mxu0 %vm603_vm2, %v589_v3  ;;  %815 = vperm.xlu1 %1273, %v805_v11   ;;  %v804_v16 = vld [vmem:[%s1431_s24] sm:$0xff]  ;;  %v586_v22 = vld [vmem:[%s1426_s14 + $0x10] sm:$0xff]  ;;  %v581_v27 = vld [vmem:[%s1421_s15 + $0x8] sm:$0xff] }
  0x21   : > { %1200 = vmatpush1.msk.msra.mxu0 %vm603_vm2, %v566_v1  ;;  %v570_v9 = vsub.s32 0, %v569_v6  ;;  %v574_v10 = vsub.s32 1, %v569_v6  ;;  %825 = vperm.xlu0 %1272, %v807_v12   ;;  %v565_v17 = vld [vmem:[%s1401_s18] sm:$0x77]  ;;  %v582_v28 = vld [vmem:[%s1421_s15 + $0x10] sm:$0xff]  ;;  %v583_v29 = vld [vmem:[%s1421_s15 + $0x18] sm:$0xff] }
  0x22   : > { %1201 = vmatmul.mubr.msk.f32.vlgmr.msra.gmra.mxu0 %vm590_vm3, %v584_v5  ;;  %v563_v20 = vld [vmem:[%s1416_s10] sm:$0x77] }
  0x23   : > { %v571_v13 = vrot.slane %v564_v7, %v570_v9  ;;  %v575_v14 = vrot.slane %v564_v7, %v574_v10  ;;  %678 = vmatprep.mubr.f32.mxu0 %v1316_v4  ;;  %v580_v26 = vld [vmem:[%s1421_s15] sm:$0xff] }
  0x24   : > { %810 = vperm.xlu1 %1273, %v804_v16  }
  0x25   : > { %v576_v19 = vcombine.low %v571_v13, %v575_v14  ;;  %820 = vperm.xlu0 %1272, %v806_v18   ;;  %v844_v14 = vld [vmem:[%s1436_s23] sm:$0xff] }
  0x26   : > { %1202 = vmatmul.mubr.msk.f32.gmra.mxu0 %vm590_vm3, %v585_v15 }
  0x27   : > { %v578_v21 = vmul.f32 %v576_v19, %v565_v17  ;;  %684 = vmatprep.mubr.f32.mxu0 %v1316_v4  ;;  %v845_v17 = vld [vmem:[%s1436_s23 + $0x8] sm:$0xff] }
  0x29   : > { %v579_v23 = vsub.f32 %v563_v20, %v578_v21  ;;  %v846_v20 = vld [vmem:[%s1436_s23 + $0x10] sm:$0xff] }
  0x2a   : > { %1203 = vmatmul.mubr.msk.f32.gmra.mxu0 %vm590_vm3, %v586_v22 }
  0x2b   : > { %v698_v24 = vcombine.high %v579_v23, %v579_v23  ;;  %690 = vmatprep.mubr.f32.mxu0 %v1316_v4 }
  0x2d   : > { %1205 = vmatprep.subr.msk.mxu1 %vm603_vm2, %v698_v24 }
  0x2e   : > { %1206 = vmatpush1.msk.msra.mxu1 %vm603_vm2, %v579_v23  ;;  %1204 = vmatmul.mubr.msk.f32.gmra.mxu0 %vm590_vm3, %v587_v25  ;;  %v847_v23 = vld [vmem:[%s1436_s23 + $0x18] sm:$0xff] }
  0x2f   : > { %1207 = vmatmul.mubr.msk.f32.vlgmr.msra.gmra.mxu1 %vm590_vm3, %v580_v26  ;;  %v869_v26 = vld [vmem:[%s1441_s17] sm:$0xff] }
  0x30   : > { %785 = vmatprep.mubr.f32.mxu1 %v1316_v4 }
  0x33   : > { %1208 = vmatmul.mubr.msk.f32.gmra.mxu1 %vm590_vm3, %v581_v27  ;;  %v871_v27 = vld [vmem:[%s1441_s17 + $0x10] sm:$0xff] }
  0x34   : > { %791 = vmatprep.mubr.f32.mxu1 %v1316_v4 }
  0x37   : > { %1209 = vmatmul.mubr.msk.f32.gmra.mxu1 %vm590_vm3, %v582_v28 }
  0x38   : > { %797 = vmatprep.mubr.f32.mxu1 %v1316_v4 }
  0x3b   : > { %1210 = vmatmul.mubr.msk.f32.gmra.mxu1 %vm590_vm3, %v583_v29 }
  0x9b   : > { %v816_v32 = vpop.permute.xlu1 %815 }
  0x9c   : > { %v826_v38 = vpop.permute.xlu0 %825 }
  0x9f   : > { %v811_v36 = vpop.permute.xlu1 %810 }
  0xa0   : > { %v821_v53 = vpop.permute.xlu0 %820 }
  0xe2   : > { %v674_v30 = vpop.f32.mrf.mxu0 }
  0xe4   : > { %v676_v31 = vpop.f32.mrf.mxu0 }
  0xe6   : > { %v680_v33 = vpop.f32.mrf.mxu0 }
  0xe8   : > { %v682_v34 = vpop.f32.mrf.mxu0 }
  0xea   : > { %v686_v40 = vpop.f32.mrf.mxu0 }
  0xec   : > { %v688_v47 = vpop.f32.mrf.mxu0 }
  0xee   : > { %v692_v57 = vpop.f32.mrf.mxu0 }
  0xef   : > { %v781_v35 = vpop.f32.mrf.mxu1 }
  0xf0   : > { %v782_v37 = vadd.f32 %v781_v35, %v674_v30  ;;  %v694_v3 = vpop.f32.mrf.mxu0  ;;  %v872_v35 = vld [vmem:[%s1441_s17 + $0x18] sm:$0xff] }
  0xf1   : > { %v783_v39 = vpop.f32.mrf.mxu1 }
  0xf2   : > { %v828_v41 = vadd.f32 %v811_v36, %v782_v37  ;;  %v784_v42 = vadd.f32 %v783_v39, %v676_v31 }
  0xf3   : > { %v787_v43 = vpop.f32.mrf.mxu1 }
  0xf4   : > { %v829_v44 = vadd.f32 %v811_v36, %v784_v42  ;;  %v788_v45 = vadd.f32 %v787_v43, %v680_v33  ;;  %v836_v48 = vmax.f32 %v828_v41, 0.0 }
  0xf5   : > { %v789_v46 = vpop.f32.mrf.mxu1 }
  0xf6   : > { %v837_v49 = vmax.f32 %v829_v44, 0.0  ;;  %v830_v50 = vadd.f32 %v816_v32, %v788_v45  ;;  %v790_v51 = vadd.f32 %v789_v46, %v682_v34  ;;  %v870_v34 = vld [vmem:[%s1441_s17 + $0x8] sm:$0xff] }
  0xf7   : > { %v793_v52 = vpop.f32.mrf.mxu1 }
  0xf8   : > { %v831_v54 = vadd.f32 %v816_v32, %v790_v51  ;;  %v794_v55 = vadd.f32 %v793_v52, %v686_v40  ;;  %937 = vmatprep.mubr.f32.mxu0 %v837_v49  ;;  %v848_v56 = vadd.f32 %v837_v49, %v836_v48  ;;  %v838_v59 = vmax.f32 %v830_v50, 0.0 }
  0xf9   : > { %v795_v58 = vpop.f32.mrf.mxu1 }
  0xfa   : > { %v839_v60 = vmax.f32 %v831_v54, 0.0  ;;  %v832_v61 = vadd.f32 %v821_v53, %v794_v55  ;;  %v796_v62 = vadd.f32 %v795_v58, %v688_v47  ;;  %849 = vadd.xlane.f32.xlu0 %v848_v56 }
  0xfb   : > { %v799_v63 = vpop.f32.mrf.mxu1 }
  0xfc   : > { %v833_v0 = vadd.f32 %v821_v53, %v796_v62  ;;  %v800_v1 = vadd.f32 %v799_v63, %v692_v57  ;;  %v851_v2 = vadd.f32 %v839_v60, %v838_v59  ;;  %v840_v5 = vmax.f32 %v832_v61, 0.0 }
  0xfd   : > { %v801_v4 = vpop.f32.mrf.mxu1 }
  0xfe   : > { %v841_v6 = vmax.f32 %v833_v0, 0.0  ;;  %v834_v7 = vadd.f32 %v826_v38, %v800_v1  ;;  %v802_v8 = vadd.f32 %v801_v4, %v694_v3  ;;  %852 = vadd.xlane.f32.xlu1 %v851_v2 }
 0x100   : > { %v835_v9 = vadd.f32 %v826_v38, %v802_v8  ;;  %947 = vmatprep.mubr.f32.mxu1 %v841_v6  ;;  %v854_v10 = vadd.f32 %v841_v6, %v840_v5  ;;  %v842_v11 = vmax.f32 %v834_v7, 0.0 }
 0x102   : > { %v843_v12 = vmax.f32 %v835_v9, 0.0  ;;  %855 = vadd.xlane.f32.xlu0 %v854_v10 }
 0x104   : > { %897 = vmatprep.subr.mxu0 %v843_v12  ;;  %1221 = vmatprep.subr.mxu1 %v843_v12  ;;  %v857_v13 = vadd.f32 %v843_v12, %v842_v11 }
 0x105   : > { %898 = vmatpush1.xpose.msra.mxu0 %v842_v11  ;;  %1225 = vmatpush1.xpose.msra.mxu1 %v842_v11 }
 0x106   : > { %899 = vmatprep.subr.mxu0 %v841_v6  ;;  %1222 = vmatprep.subr.mxu1 %v841_v6 }
 0x107   : > { %858 = vadd.xlane.f32.xlu0 %v857_v13 }
 0x109   : > { %900 = vmatpush1.xpose.msra.mxu0 %v840_v5  ;;  %1226 = vmatpush1.xpose.msra.mxu1 %v840_v5 }
 0x10a   : > { %901 = vmatprep.subr.mxu0 %v839_v60  ;;  %1223 = vmatprep.subr.mxu1 %v839_v60 }
 0x10d   : > { %902 = vmatpush1.xpose.msra.mxu0 %v838_v59  ;;  %1227 = vmatpush1.xpose.msra.mxu1 %v838_v59 }
 0x10e   : > { %903 = vmatprep.subr.mxu0 %v837_v49  ;;  %1224 = vmatprep.subr.mxu1 %v837_v49 }
 0x111   : > { %904 = vmatpush1.xpose.msra.mxu0 %v836_v48  ;;  %1228 = vmatpush1.xpose.msra.mxu1 %v836_v48 }
 0x114   : > { %938 = vmatmul.mubr.f32.vlgmr.msra.gmra.mxu0 %v836_v48  ;;  %948 = vmatmul.mubr.f32.vlgmr.msra.gmra.mxu1 %v840_v5 }
 0x115   : > { %942 = vmatprep.mubr.f32.mxu0 %v839_v60  ;;  %952 = vmatprep.mubr.f32.mxu1 %v843_v12 }
 0x118   : > { %943 = vmatmul.mubr.f32.gmra.mxu0 %v838_v59  ;;  %953 = vmatmul.mubr.f32.gmra.mxu1 %v842_v11 }
 0x183   : > { %v850_v15 = vpop.xlane.xlu0 %849 }
 0x184   : > { %v860_v16 = vadd.f32 %v850_v15, %v844_v14 }
 0x186   : > { %865 = vst.msk [vmem:[%s1436_s23] sm:$0xff] %vm864_vm4, %v860_v16 }
 0x187   : > { %v853_v18 = vpop.xlane.xlu1 %852 }
 0x188   : > { %v861_v19 = vadd.f32 %v853_v18, %v845_v17 }
 0x18a   : > { %866 = vst.msk [vmem:[%s1436_s23 + $0x8] sm:$0xff] %vm864_vm4, %v861_v19 }
 0x18b   : > { %v856_v21 = vpop.xlane.xlu0 %855 }
 0x18c   : > { %v862_v22 = vadd.f32 %v856_v21, %v846_v20 }
 0x18e   : > { %867 = vst.msk [vmem:[%s1436_s23 + $0x10] sm:$0xff] %vm864_vm4, %v862_v22 }
 0x190   : > { %v859_v24 = vpop.xlane.xlu0 %858 }
 0x191   : > { %v863_v25 = vadd.f32 %v859_v24, %v847_v23 }
 0x193   : > { %868 = vst.msk [vmem:[%s1436_s23 + $0x18] sm:$0xff] %vm864_vm4, %v863_v25 }
 0x1d4   : > { %v939_v28 = vpop.f32.mrf.mxu0  ;;  %v949_v29 = vpop.f32.mrf.mxu1 }
 0x1d5   : > { %v958_v30 = vadd.f32 %v939_v28, %v869_v26  ;;  %v960_v31 = vadd.f32 %v949_v29, %v871_v27 }
 0x1d6   : > { %v941_v32 = vpop.f32.mrf.mxu0  ;;  %v951_v33 = vpop.f32.mrf.mxu1 }
 0x1d7   : > { %963 = vst.msk [vmem:[%s1441_s17] sm:$0xff] %vm962_vm5, %v958_v30  ;;  %965 = vst.msk [vmem:[%s1441_s17 + $0x10] sm:$0xff] %vm962_vm5, %v960_v31 }
 0x1d8   : > { %v944_v36 = vpop.f32.mrf.mxu0  ;;  %v954_v37 = vpop.f32.mrf.mxu1 }
 0x1d9   : > { %v959_v38 = vadd.f32 %v944_v36, %v870_v34  ;;  %v961_v39 = vadd.f32 %v954_v37, %v872_v35 }
 0x1da   : > { %v946_v40 = vpop.f32.mrf.mxu0  ;;  %v956_v41 = vpop.f32.mrf.mxu1 }
 0x1db   : > { %964 = vst.msk [vmem:[%s1441_s17 + $0x8] sm:$0xff] %vm962_vm5, %v959_v38  ;;  %966 = vst.msk [vmem:[%s1441_s17 + $0x18] sm:$0xff] %vm962_vm5, %v961_v39 }
 0x1dc PF: > { %s19_s9 = sadd.s32 1, %s1313_s9   ;;  %s1534_s10 = sld [smem:[#allocation2_spill]] }
 0x1dd   : > { %p16_p8 = scmp.ge.s32.totalorder %s19_s9, 18   ;;  %s1535_s18 = sld [smem:[#allocation3_spill]] }
 0x1de   : > { %s1536_s27 = smov %s1305_s29  ;;  %s1537_s28 = smov %s1309_s30 }
 0x1df   :  { %18 = sbr.rel (!%p16_p8) target bundleno = 4 (0x4), region = 112 }
 0x1e2   : > { %s1538_s29 = smov %s1534_s10 }
 0x1e3   : > { %s1539_s30 = smov %s1535_s18 }

// kernel: isa_forward.13
= control target key start
LH: loop header
LB: loop body
LE: loop exit
PB: predicated region body
PF: predicated region fallthrough
CT: control target
= control target key end

     0   :  { %s504_s12 = smov 0   ;;  %s506_s13 = smov 0   ;;  %s548_s0 = inlined_call_operand.vmem [shape: f32[2,8,256], index: 0, kind: input, shape index: {}]   ;;  %s549_s1 = inlined_call_operand.vmem [shape: f32[2,8,1], index: 1, kind: input, shape index: {}]   ;;  %s550_s2 = inlined_call_operand.vmem [shape: f32[2,1,256], index: 2, kind: input, shape index: {}]   ;;  %s551_s3 = inlined_call_operand.vmem [shape: f32[2,8,256], index: 3, kind: output, shape index: {}]  }
   0x1   :  { %s508_s14 = smov 0  }
   0x2 LB: > { %s25_s15 = sadd.s32 1, %s477_s13  ;;  %p422_p0 = scmp.ge.s32.totalorder %s481_s14, 1  ;;  %s481_s14 = sphi %s508_s14, %s13_s14   ;;  %s477_s13 = sphi %s506_s13, %s553_s13   ;;  %s473_s12 = sphi %s504_s12, %s552_s12  }
   0x3   : > { %p27_p1 = scmp.ge.s32.totalorder %s25_s15, 2  ;;  %p183_p2 = scmp.lt.s32.totalorder %s481_s14, 3 }
   0x5   : > { %s555_s15 = smov (%p27_p1, %s25_s15), 0  ;;  %p184_p3 = pnand %p422_p0, %p183_p2 }
   0x6   : > { %p228_p4 = scmp.lt.s32.totalorder (!%p184_p3), %s473_s12, 1 }
   0x7   : > { %187 = sbr.rel (%p184_p3) target bundleno = 157 (0x9d), region = 32 }
   0xc   : > { %v483_v0 = vmov 0   ;;  %s557_s12 = smov (!%p228_p4, %s473_s12), 1  ;;  %v290_v4 = vlaneseq }
   0xd   : > { %458 = vset.pattern.permute.xlu0 %v483_v0  ;;  %s425_s16 = sshll.u32 %s557_s12, 3  ;;  %s431_s20 = sshll.u32 %s557_s12, 4 }
   0xe   : > { %s240_s19 = scalar_lea.vmem %s549_s1, %s425_s16  ;;  %s235_s23 = scalar_lea.vmem %s548_s0, %s431_s20  ;;  %v291_v10 = vshrl.u32 %v290_v4, 7 }
   0xf   : > { %v262_v1 = vld [vmem:[%s240_s19] sm:$0xff]  ;;  %v261_v3 = vld [vmem:[%s235_s23 + $0x8] sm:$0xff]  ;;  %s426_s24 = sshll.u32 %s557_s12, 1  ;;  %s258_s30 = scalar_lea.vmem %s551_s3, %s431_s20 }
  0x10   : > { %265 = vperm.xlu0 %458, %v262_v1   ;;  %v260_v2 = vld [vmem:[%s235_s23] sm:$0xff]  ;;  %s248_s27 = scalar_lea.vmem %s550_s2, %s426_s24  ;;  %v292_v15 = vsub.s32 0, %v291_v10  ;;  %v296_v16 = vsub.s32 1, %v291_v10 }
  0x11   : > { %v284_v17 = vld [vmem:[%s248_s27] sm:$0x3] }
  0x12   : > { %v293_v22 = vrot.slane %v284_v17, %v292_v15  ;;  %v297_v23 = vrot.slane %v284_v17, %v296_v16 }
  0x8b   : > { %v266_v5 = vpop.permute.xlu0 %265 }
  0x8c   : > { %v268_v6 = vmul.f32 %v266_v5, %v260_v2  ;;  %v269_v7 = vmul.f32 %v266_v5, %v261_v3 }
  0x8e   : > { %v270_v8 = vrot.slane %v268_v6, 4  ;;  %v276_v9 = vrot.slane %v269_v7, 4 }
  0x90   : > { %v271_v11 = vadd.f32 %v270_v8, %v268_v6  ;;  %v277_v12 = vadd.f32 %v276_v9, %v269_v7 }
  0x92   : > { %v272_v13 = vrot.slane %v271_v11, 2  ;;  %v278_v14 = vrot.slane %v277_v12, 2 }
  0x94   : > { %v273_v18 = vadd.f32 %v272_v13, %v271_v11  ;;  %v279_v19 = vadd.f32 %v278_v14, %v277_v12 }
  0x96   : > { %v274_v20 = vrot.slane %v273_v18, 1  ;;  %v280_v21 = vrot.slane %v279_v19, 1 }
  0x98   : > { %v275_v24 = vadd.f32 %v274_v20, %v273_v18  ;;  %v281_v25 = vadd.f32 %v280_v21, %v279_v19 }
  0x9a   : > { %vm282_vm0 = vcmp.gt.f32.partialorder %v275_v24, 0.5  ;;  %vm283_vm1 = vcmp.gt.f32.partialorder %v281_v25, 0.5 }
  0x9b   : > { %v300_v26 = vsel %vm282_vm0, %v268_v6, %v293_v22  ;;  %v301_v27 = vsel %vm283_vm1, %v269_v7, %v297_v23 }
  0x9c   : > { %302 = vst [vmem:[%s258_s30] sm:$0xff] %v300_v26  ;;  %303 = vst [vmem:[%s258_s30 + $0x8] sm:$0xff] %v301_v27 }
  0x9d PF: > { %s13_s14 = sadd.s32 1, %s481_s14   ;;  %s552_s12 = smov %s477_s13 }
  0x9e   : > { %p10_p5 = scmp.ge.s32.totalorder %s13_s14, 4   ;;  %s553_s13 = smov %s555_s15 }
  0xa0   :  { %12 = sbr.rel (!%p10_p5) target bundleno = 2 (0x2), region = 68 }

// kernel: isa_forward.12
= control target key start
LH: loop header
LB: loop body
LE: loop exit
PB: predicated region body
PF: predicated region fallthrough
CT: control target
= control target key end

     0   :  { %s1807_s21 = smov 0   ;;  %s1809_s22 = smov 0   ;;  %s1959_s0 = inlined_call_operand.vmem [shape: f32[2,8,3,256], index: 0, kind: input, shape index: {}]   ;;  %s1960_s1 = inlined_call_operand.vmem [shape: f32[2,8,1,256], index: 1, kind: input, shape index: {}]   ;;  %s1961_s2 = inlined_call_operand.vmem [shape: f32[2,3,256], index: 2, kind: input, shape index: {}]   ;;  %s1962_s3 = inlined_call_operand.vmem [shape: f32[2,3,256], index: 3, kind: input, shape index: {}]   ;;  %s1963_s4 = inlined_call_operand.vmem [shape: f32[2,3,256], index: 4, kind: input, shape index: {}]   ;;  %s1964_s5 = inlined_call_operand.vmem [shape: f32[2,8,1,256], index: 5, kind: input, shape index: {}]   ;;  %s1965_s6 = inlined_call_operand.vmem [shape: f32[8,32,3], index: 6, kind: input, shape index: {}]   ;;  %s1966_s7 = inlined_call_operand.vmem [shape: f32[8,32,3], index: 7, kind: input, shape index: {}]   ;;  %s1967_s8 = inlined_call_operand.vmem [shape: f32[8,32,1], index: 8, kind: input, shape index: {}]   ;;  %s1968_s9 = inlined_call_operand.vmem [shape: f32[8,32,32], index: 9, kind: input, shape index: {}]   ;;  %s1969_s10 = inlined_call_operand.vmem [shape: f32[8,32,1], index: 10, kind: input, shape index: {}]   ;;  %s1970_s11 = inlined_call_operand.vmem [shape: f32[3,32], index: 11, kind: input, shape index: {}]   ;;  %s1971_s12 = inlined_call_operand.vmem [shape: f32[2,8,1,256], index: 12, kind: output, shape index: {}]  }
   0x1   :  { %s1811_s23 = smov 0   ;;  %s1813_s24 = smov 0  }
   0x2   :  { %s1815_s25 = smov 0  }
   0x3 LB: > { %s34_s26 = sadd.s32 1, %s1729_s23  ;;  %s41_s27 = sadd.s32 1, %s1733_s24  ;;  %s1737_s25 = sphi %s1815_s25, %s22_s25   ;;  %s1733_s24 = sphi %s1813_s24, %s1977_s24   ;;  %s1729_s23 = sphi %s1811_s23, %s1976_s23   ;;  %s1725_s22 = sphi %s1809_s22, %s1975_s22   ;;  %s1721_s21 = sphi %s1807_s21, %s1974_s21  }
   0x4   : > { %p35_p0 = scmp.ge.s32.totalorder %s34_s26, 8  ;;  %p1598_p1 = scmp.ge.s32.totalorder %s1737_s25, 1 }
   0x5   : > { %p543_p2 = scmp.lt.s32.totalorder %s1737_s25, 17 }
   0x6   : > { %s1979_s26 = smov (%p35_p0, %s34_s26), 0  ;;  %s1981_s27 = smov (!%p35_p0, %s41_s27), %s1733_s24 }
   0x7   : > { %p544_p3 = pnand %p1598_p1, %p543_p2  ;;  %p43_p4 = scmp.ge.s32.totalorder %s1981_s27, 2 }
   0x8   : > { %p677_p5 = scmp.lt.s32.totalorder (!%p544_p3), %s1725_s22, 1  ;;  %p679_p6 = scmp.lt.s32.totalorder (!%p544_p3), %s1721_s21, 7 }
   0x9   : > { %s1983_s27 = smov (%p43_p4, %s1981_s27), 0  ;;  %547 = sbr.rel (%p544_p3) target bundleno = 699 (0x2bb), region = 68 }
   0xa   : > { %1972 = sst [smem:[#allocation2_spill]] %s1983_s27 }
   0xe   : > { %v790_v0 = vlaneseq  ;;  %v1739_v1 = vmov 0.0   ;;  %s1985_s22 = smov (!%p677_p5, %s1725_s22), 1  ;;  %v1740_v3 = vmov 0   ;;  %s1987_s21 = smov (!%p679_p6, %s1721_s21), 7  ;;  %vm825_vm0 = vcmask 1042432  }
   0xf   : > { %906 = vmatprep.mubr.f32.mxu1 %v1739_v1  ;;  %894 = vmatprep.mubr.f32.mxu0 %v1739_v1  ;;  %s1600_s28 = sshll.u32 %s1985_s22, 4  ;;  %s1842_s29 = sshll.u32 %s1985_s22, 3  ;;  %vm812_vm1 = vcmask 23552   ;;  %vm1094_vm2 = vcmask 261120  }
  0x10   : > { %v1840_v2 = vshrl.u32 %v790_v0, 7  ;;  %1697 = vset.pattern.permute.xlu1 %v1740_v3  ;;  %1696 = vset.pattern.permute.xlu0 %v1740_v3  ;;  %s1599_s30 = sshll.u32 %s1987_s21, 1  ;;  %s721_s16 = scalar_lea.vmem %s1962_s3, %s1842_s29  ;;  %vm1326_vm3 = vcmp.lt.s32.totalorder %v790_v0, 256 }
  0x11   : > { %s1846_s13 = sadd.s32 %s1600_s28, %s1599_s30  ;;  %s711_s27 = scalar_lea.vmem %s1961_s2, %s1842_s29  ;;  %v787_v6 = vld [vmem:[%s721_s16] sm:$0x77] }
  0x12   : > { %v792_v4 = vsub.s32 0, %v1840_v2  ;;  %v796_v5 = vsub.s32 1, %v1840_v2  ;;  %s701_s19 = scalar_lea.vmem %s1960_s1, %s1846_s13  ;;  %v811_v8 = vcombine.high %v787_v6, %v787_v6  ;;  %s1862_s28 = sshll.u32 %s1987_s21, 5  ;;  %v1871_v11 = vld [vmem:[%s711_s27] sm:$0x77] }
  0x13   : > { %v1860_v7 = vld [vmem:[%s701_s19] sm:$0x3]  ;;  %s755_s15 = scalar_lea.vmem %s1966_s7, %s1862_s28  ;;  %s1601_s17 = sshll.u32 %s1846_s13, 2 }
  0x14   : > { %v793_v9 = vrot.slane %v1860_v7, %v792_v4  ;;  %v797_v10 = vrot.slane %v1860_v7, %v796_v5  ;;  %1651 = vmatprep.subr.msk.mxu1 %vm825_vm0, %v811_v8  ;;  %v808_v12 = vld [vmem:[%s755_s15 + $0x10] sm:$0xff]  ;;  %1624 = vmatprep.subr.msk.mxu0 %vm825_vm0, %v811_v8  ;;  %s688_s18 = scalar_lea.vmem %s1959_s0, %s1601_s17  ;;  %v806_v13 = vld [vmem:[%s755_s15] sm:$0xff]  ;;  %s760_s27 = scalar_lea.vmem %s1967_s8, %s1862_s28  ;;  %v809_v15 = vld [vmem:[%s755_s15 + $0x18] sm:$0xff] }
  0x15   : > { %1652 = vmatpush1.msk.msra.mxu1 %vm825_vm0, %v787_v6  ;;  %1625 = vmatpush1.msk.msra.mxu0 %vm825_vm0, %v787_v6  ;;  %v784_v16 = vld [vmem:[%s688_s18] sm:$0x77]  ;;  %v807_v18 = vld [vmem:[%s755_s15 + $0x8] sm:$0xff]  ;;  %v1029_v20 = vld [vmem:[%s760_s27 + $0x18] sm:$0xff]  ;;  %s750_s14 = scalar_lea.vmem %s1965_s6, %s1862_s28  ;;  %s770_s16 = scalar_lea.vmem %s1969_s10, %s1862_s28 }
  0x16   : > { %v798_v14 = vcombine.low %v793_v9, %v797_v10  ;;  %1628 = vmatmul.mubr.msk.f32.vlgmr.msra.gmra.mxu1 %vm812_vm1, %v808_v12  ;;  %1626 = vmatmul.mubr.msk.f32.vlgmr.msra.gmra.mxu0 %vm812_vm1, %v806_v13  ;;  %v1027_v19 = vld [vmem:[%s760_s27 + $0x8] sm:$0xff]  ;;  %v1026_v22 = vld [vmem:[%s760_s27] sm:$0xff]  ;;  %v1028_v23 = vld [vmem:[%s760_s27 + $0x10] sm:$0xff]  ;;  %s765_s19 = scalar_lea.vmem %s1968_s9, %s1862_s28  ;;  %s731_s30 = scalar_lea.vmem %s1963_s4, %s1842_s29 }
  0x17   : > { %912 = vmatprep.mubr.f32.mxu1 %v1739_v1  ;;  %900 = vmatprep.mubr.f32.mxu0 %v1739_v1  ;;  %v802_v25 = vld [vmem:[%s750_s14] sm:$0xff]  ;;  %v1073_v26 = vld [vmem:[%s770_s16 + $0x18] sm:$0xff]  ;;  %v1072_v27 = vld [vmem:[%s770_s16 + $0x10] sm:$0xff]  ;;  %s744_s17 = scalar_lea.vmem %s1964_s5, %s1846_s13  ;;  %s782_s15 = scalar_lea.vmem %s1971_s12, %s1846_s13 }
  0x18   : > { %v800_v17 = vmul.f32 %v798_v14, %v1871_v11  ;;  %1037 = vperm.xlu1 %1697, %v1027_v19   ;;  %1047 = vperm.xlu0 %1696, %v1029_v20   ;;  %v803_v28 = vld [vmem:[%s750_s14 + $0x8] sm:$0xff]  ;;  %v1070_v30 = vld [vmem:[%s770_s16] sm:$0xff]  ;;  %v804_v31 = vld [vmem:[%s750_s14 + $0x10] sm:$0xff] }
  0x19   : > { %v1071_v29 = vld [vmem:[%s770_s16 + $0x8] sm:$0xff]  ;;  %v805_v32 = vld [vmem:[%s750_s14 + $0x18] sm:$0xff]  ;;  %v1068_v20 = vld [vmem:[%s765_s19 + $0x10] sm:$0xff] }
  0x1a   : > { %v801_v21 = vsub.f32 %v784_v16, %v800_v17  ;;  %1629 = vmatmul.mubr.msk.f32.gmra.mxu1 %vm812_vm1, %v809_v15  ;;  %1627 = vmatmul.mubr.msk.f32.gmra.mxu0 %vm812_vm1, %v807_v18  ;;  %v1066_v18 = vld [vmem:[%s765_s19] sm:$0xff]  ;;  %v1067_v19 = vld [vmem:[%s765_s19 + $0x8] sm:$0xff] }
  0x1b   : > { %1001 = vmatprep.mubr.f32.mxu1 %v1739_v1  ;;  %1171 = vmatprep.mubr.f32.mxu0 %v1739_v1 }
  0x1c   : > { %v920_v24 = vcombine.high %v801_v21, %v801_v21  ;;  %1032 = vperm.xlu1 %1697, %v1026_v22   ;;  %1042 = vperm.xlu0 %1696, %v1028_v23  }
  0x1e   : > { %1630 = vmatprep.subr.msk.mxu1 %vm825_vm0, %v920_v24 }
  0x1f   : > { %1631 = vmatpush1.msk.msra.mxu1 %vm825_vm0, %v801_v21  ;;  %v1069_v21 = vld [vmem:[%s765_s19 + $0x18] sm:$0xff] }
  0x20   : > { %1632 = vmatmul.mubr.msk.f32.vlgmr.msra.gmra.mxu1 %vm812_vm1, %v802_v25  ;;  %1091 = vperm.xlu0 %1696, %v1073_v26  }
  0x21   : > { %1007 = vmatprep.mubr.f32.mxu1 %v1739_v1  ;;  %1086 = vperm.xlu1 %1697, %v1072_v27  }
  0x24   : > { %1633 = vmatmul.mubr.msk.f32.gmra.mxu1 %vm812_vm1, %v803_v28  ;;  %1081 = vperm.xlu0 %1696, %v1071_v29  }
  0x25   : > { %1013 = vmatprep.mubr.f32.mxu1 %v1739_v1  ;;  %1076 = vperm.xlu1 %1697, %v1070_v30  }
  0x28   : > { %1634 = vmatmul.mubr.msk.f32.gmra.mxu1 %vm812_vm1, %v804_v31 }
  0x29   : > { %1019 = vmatprep.mubr.f32.mxu1 %v1739_v1 }
  0x2c   : > { %1635 = vmatmul.mubr.msk.f32.gmra.mxu1 %vm812_vm1, %v805_v32 }
  0x2d   : > { %1272 = vmatprep.mubr.f32.mxu1 %v1739_v1 }
  0x93   : > { %v1048_v45 = vpop.permute.xlu0 %1047  ;;  %v1038_v49 = vpop.permute.xlu1 %1037 }
  0x97   : > { %v1043_v57 = vpop.permute.xlu0 %1042  ;;  %v1033_v3 = vpop.permute.xlu1 %1032 }
  0x9b   : > { %v1092_v27 = vpop.permute.xlu0 %1091 }
  0x9c   : > { %v1087_v29 = vpop.permute.xlu1 %1086 }
  0xd6   : > { %v908_v33 = vpop.f32.mrf.mxu1  ;;  %v896_v37 = vpop.f32.mrf.mxu0 }
  0xd8   : > { %v910_v34 = vpop.f32.mrf.mxu1  ;;  %v898_v40 = vpop.f32.mrf.mxu0 }
  0xda   : > { %v914_v35 = vpop.f32.mrf.mxu1  ;;  %v902_v43 = vpop.f32.mrf.mxu0 }
  0xdc   : > { %v916_v36 = vpop.f32.mrf.mxu1  ;;  %v904_v47 = vpop.f32.mrf.mxu0 }
  0xe0   : > { %v1003_v38 = vpop.f32.mrf.mxu1 }
  0xe1   : > { %v1004_v62 = vadd.f32 %v1003_v38, %v896_v37  ;;  %v1077_v38 = vpop.permute.xlu1 %1076 }
  0xe2   : > { %v1005_v39 = vpop.f32.mrf.mxu1 }
  0xe3   : > { %v1006_v59 = vadd.f32 %v1005_v39, %v898_v40  ;;  %v1050_v12 = vadd.f32 %v1033_v3, %v1004_v62 }
  0xe4   : > { %v1009_v41 = vpop.f32.mrf.mxu1 }
  0xe5   : > { %v1010_v56 = vadd.f32 %v1009_v41, %v902_v43  ;;  %v1051_v9 = vadd.f32 %v1033_v3, %v1006_v59  ;;  %v1058_v17 = vmax.f32 %v1050_v12, 0.0 }
  0xe6   : > { %v1011_v42 = vpop.f32.mrf.mxu1 }
  0xe7   : > { %v1012_v54 = vadd.f32 %v1011_v42, %v904_v47  ;;  %v1052_v6 = vadd.f32 %v1038_v49, %v1010_v56  ;;  %v1059_v16 = vmax.f32 %v1051_v9, 0.0 }
  0xe8   : > { %v1015_v44 = vpop.f32.mrf.mxu1 }
  0xe9   : > { %v1016_v52 = vadd.f32 %v1015_v44, %v908_v33  ;;  %v1053_v4 = vadd.f32 %v1038_v49, %v1012_v54  ;;  %v1060_v15 = vmax.f32 %v1052_v6, 0.0  ;;  %v1204_v49 = vld [vmem:[%s1970_s11] sm:$0x7] }
  0xea   : > { %v1017_v46 = vpop.f32.mrf.mxu1 }
  0xeb   : > { %v1018_v50 = vadd.f32 %v1017_v46, %v910_v34  ;;  %v1054_v63 = vadd.f32 %v1043_v57, %v1016_v52  ;;  %v1061_v14 = vmax.f32 %v1053_v4, 0.0 }
  0xec   : > { %v1021_v48 = vpop.f32.mrf.mxu1 }
  0xed   : > { %v1022_v51 = vadd.f32 %v1021_v48, %v914_v35  ;;  %v1055_v60 = vadd.f32 %v1043_v57, %v1018_v50  ;;  %v1062_v13 = vmax.f32 %v1054_v63, 0.0  ;;  %v1082_v35 = vpop.permute.xlu0 %1081  ;;  %v788_v50 = vld [vmem:[%s731_s30] sm:$0x77] }
  0xee   : > { %v1023_v53 = vpop.f32.mrf.mxu1 }
  0xef   : > { %v1024_v55 = vadd.f32 %v1023_v53, %v916_v36  ;;  %v1056_v58 = vadd.f32 %v1048_v45, %v1022_v51  ;;  %v1063_v10 = vmax.f32 %v1055_v60, 0.0  ;;  %v1279_v51 = vsub.f32 %v788_v50, %v1871_v11 }
  0xf1   : > { %v1057_v61 = vadd.f32 %v1048_v45, %v1024_v55  ;;  %v1064_v8 = vmax.f32 %v1056_v58, 0.0  ;;  %v1281_v52 = vcombine.high %v1279_v51, %v1279_v51 }
  0xf3   : > { %v1065_v5 = vmax.f32 %v1057_v61, 0.0 }
  0xf5   : > { %1131 = vmatprep.subr.mxu0 %v1065_v5  ;;  %v1741_v5 = vmov 1966171168  }
  0xf6   : > { %1132 = vmatpush1.msra.mxu0 %v1064_v8  ;;  %v1305_v6 = vunpack.c.l.s4 %v1741_v5 }
  0xf7   : > { %1133 = vmatprep.subr.mxu0 %v1063_v10 }
  0xf8   : > { %1134 = vmatpush1.msra.mxu0 %v1062_v13  ;;  %v1306_v12 = vunpack.c.0.s8 %v1305_v6 }
  0xf9   : > { %1135 = vmatprep.subr.mxu0 %v1061_v14 }
  0xfa   : > { %1136 = vmatpush1.msra.mxu0 %v1060_v15 }
  0xfb   : > { %1137 = vmatprep.subr.mxu0 %v1059_v16  ;;  %v1309_v16 = vsub.s32 %v1306_v12, %v1840_v2 }
  0xfc   : > { %1138 = vmatpush1.msra.mxu0 %v1058_v17 }
  0xfd   : > { %1636 = vmatmul.mubr.msk.f32.vlgmr.msra.gmra.mxu0 %vm1094_vm2, %v1066_v18 }
  0xfe   : > { %1177 = vmatprep.mubr.f32.mxu0 %v1739_v1 }
 0x101   : > { %1637 = vmatmul.mubr.msk.f32.gmra.mxu0 %vm1094_vm2, %v1067_v19 }
 0x102   : > { %1183 = vmatprep.mubr.f32.mxu0 %v1739_v1 }
 0x105   : > { %1638 = vmatmul.mubr.msk.f32.gmra.mxu0 %vm1094_vm2, %v1068_v20 }
 0x106   : > { %1189 = vmatprep.mubr.f32.mxu0 %v1739_v1 }
 0x109   : > { %1639 = vmatmul.mubr.msk.f32.gmra.mxu0 %vm1094_vm2, %v1069_v21 }
 0x1bd   : > { %v1173_v22 = vpop.f32.mrf.mxu0 }
 0x1be   : > { %v1174_v43 = vadd.f32 %v1173_v22, %v1077_v38  ;;  %v1322_v22 = vld [vmem:[%s744_s17] sm:$0x3] }
 0x1bf   : > { %v1175_v23 = vpop.f32.mrf.mxu0 }
 0x1c0   : > { %v1176_v41 = vadd.f32 %v1175_v23, %v1077_v38  ;;  %v1196_v48 = vmax.f32 %v1174_v43, 0.0 }
 0x1c1   : > { %v1179_v24 = vpop.f32.mrf.mxu0 }
 0x1c2   : > { %v1180_v39 = vadd.f32 %v1179_v24, %v1082_v35  ;;  %v1197_v47 = vmax.f32 %v1176_v41, 0.0 }
 0x1c3   : > { %v1181_v25 = vpop.f32.mrf.mxu0 }
 0x1c4   : > { %v1182_v37 = vadd.f32 %v1181_v25, %v1082_v35  ;;  %v1198_v46 = vmax.f32 %v1180_v39, 0.0 }
 0x1c5   : > { %v1185_v26 = vpop.f32.mrf.mxu0 }
 0x1c6   : > { %v1186_v36 = vadd.f32 %v1185_v26, %v1087_v29  ;;  %v1199_v45 = vmax.f32 %v1182_v37, 0.0 }
 0x1c7   : > { %v1187_v28 = vpop.f32.mrf.mxu0 }
 0x1c8   : > { %v1188_v33 = vadd.f32 %v1187_v28, %v1087_v29  ;;  %v1200_v44 = vmax.f32 %v1186_v36, 0.0 }
 0x1c9   : > { %v1191_v30 = vpop.f32.mrf.mxu0 }
 0x1ca   : > { %v1192_v31 = vadd.f32 %v1191_v30, %v1092_v27  ;;  %v1201_v42 = vmax.f32 %v1188_v33, 0.0 }
 0x1cb   : > { %v1193_v32 = vpop.f32.mrf.mxu0 }
 0x1cc   : > { %v1194_v34 = vadd.f32 %v1193_v32, %v1092_v27  ;;  %v1202_v40 = vmax.f32 %v1192_v31, 0.0 }
 0x1ce   : > { %v1203_v1 = vmax.f32 %v1194_v34, 0.0 }
 0x1d0   : > { %1232 = vmatprep.subr.mxu1 %v1203_v1 }
 0x1d1   : > { %1233 = vmatpush1.msra.mxu1 %v1202_v40 }
 0x1d2   : > { %1234 = vmatprep.subr.mxu1 %v1201_v42 }
 0x1d3   : > { %1235 = vmatpush1.msra.mxu1 %v1200_v44 }
 0x1d4   : > { %1236 = vmatprep.subr.mxu1 %v1199_v45 }
 0x1d5   : > { %1237 = vmatpush1.msra.mxu1 %v1198_v46 }
 0x1d6   : > { %1238 = vmatprep.subr.mxu1 %v1197_v47 }
 0x1d7   : > { %1239 = vmatpush1.msra.mxu1 %v1196_v48 }
 0x1d8   : > { %1640 = vmatmul.mubr.msk.f32.vlgmr.msra.gmra.mxu1 %vm1094_vm2, %v1204_v49 }
 0x298   : > { %v1274_v53 = vpop.f32.mrf.mxu1 }
 0x299   : > { %v1283_v54 = vmul.f32 %v1279_v51, %v1274_v53 }
 0x29a   : > { %v1276_v55 = vpop.f32.mrf.mxu1 }
 0x29b   : > { %v1285_v56 = vsel %vm825_vm0, %v1283_v54, 0.0  ;;  %v1284_v57 = vmul.f32 %v1281_v52, %v1276_v55 }
 0x29c   : > { %v1286_v58 = vrot.slane %v1285_v56, 4 }
 0x29d   : > { %v1292_v59 = vsel %vm825_vm0, %v1284_v57, 0.0 }
 0x29e   : > { %v1287_v60 = vadd.f32 %v1286_v58, %v1285_v56  ;;  %v1293_v61 = vrot.slane %v1292_v59, 4 }
 0x2a0   : > { %v1288_v62 = vrot.slane %v1287_v60, 2  ;;  %v1294_v63 = vadd.f32 %v1293_v61, %v1292_v59 }
 0x2a2   : > { %v1289_v3 = vadd.f32 %v1288_v62, %v1287_v60  ;;  %v1295_v4 = vrot.slane %v1294_v63, 2 }
 0x2a4   : > { %v1290_v11 = vrot.slane %v1289_v3, 1  ;;  %v1296_v8 = vadd.f32 %v1295_v4, %v1294_v63 }
 0x2a6   : > { %v1291_v9 = vadd.f32 %v1290_v11, %v1289_v3  ;;  %v1297_v10 = vrot.slane %v1296_v8, 1 }
 0x2a8   : > { %v1298_v13 = vadd.f32 %v1297_v10, %v1296_v8  ;;  %v1299_v14 = vmul.f32 0.33333334, %v1291_v9 }
 0x2aa   : > { %v1300_v15 = vmul.f32 0.33333334, %v1298_v13 }
 0x2ac   : > { %v1303_v17 = vcombine.low %v1299_v14, %v1300_v15 }
 0x2ae   : > { %v1310_v18 = vrot.slane %v1303_v17, %v1309_v16 }
 0x2b0   : > { %v1317_v19 = vrot.slane %v1310_v18, %v1309_v16 }
 0x2b2   : > { %v1319_v20 = vadd.f32 %v1317_v19, %v1860_v7 }
 0x2b4   : > { %v1320_v21 = vmax.f32 %v1319_v20, 0.0 }
 0x2b6   : > { %v1321_v23 = vmin.f32 %v1320_v21, 1.0 }
 0x2b8   : > { %v1323_v24 = vmul.f32 %v1322_v22, %v1321_v23 }
 0x2ba   : > { %1328 = vst.msk [vmem:[%s782_s15] sm:$0x3] %vm1326_vm3, %v1323_v24 }
 0x2bb PF: > { %s22_s25 = sadd.s32 1, %s1737_s25   ;;  %s1973_s18 = sld [smem:[#allocation2_spill]] }
 0x2bc   : > { %p19_p7 = scmp.ge.s32.totalorder %s22_s25, 18   ;;  %s1974_s21 = smov %s1729_s23 }
 0x2bd   : > { %s1975_s22 = smov %s1733_s24  ;;  %s1976_s23 = smov %s1979_s26 }
 0x2be   :  { %21 = sbr.rel (!%p19_p7) target bundleno = 3 (0x3), region = 128 }
 0x2c1   : > { %s1977_s24 = smov %s1973_s18 }

</bundles_post_ra>
